<compile_context>
chip_gen: v5e
topology: v5e:2x2
jax: 0.10.0
libtpu: 0.0.40
codegen_flags: <defaults>
</compile_context>

<pallas_src>
import jax
import jax.numpy as jnp
from jax.experimental import pallas as pl
from jax.experimental.pallas import tpu as pltpu

EPS = 1e-5


# ------------------------------ fused kernel ---------------------------------

def _spg_kernel(x_ref, w_in_skip_ref, b_in_ref,
                w1_ref, b1_ref,
                w2_ref, b2_ref,
                w_out_bot_ref, b_fin_ref,
                o_ref, acc_ref):
    """One image per grid step; every activation is a lane-dense (H, W*C) slab.

    x_ref:         (1, H, W*Cin)
    w_in_skip_ref: (W*Cin,  W*Cmid + W*Cout)   [blockdiag(w_in*s) | blockdiag(w_skip*s)]
    w1_ref:        (W*Cmid, 3*W*Cmid)          conv1 banded taps [up | mid | down], s1 folded
    w2_ref:        (W*Cmid, 3*W*Cmid + W*Cout) conv2 banded taps + blockdiag(w_out_top*s_out)
    w_out_bot_ref: (W*Cmid, W*Cout)            blockdiag(w_out_bot*s_out)
    b_*_ref:       (1, W*C)                    folded BN biases (b_fin = b_out + b_skip)
    o_ref:         (1, H, W*Cout)
    acc_ref:       (H+2, W*Cmid) scratch; rows 0 and H+1 are write-only catch
                   bins that absorb the top/bottom halo terms (never read).
    """
    H = x_ref.shape[1]
    WCm = b1_ref.shape[1]                 # W * Cmid

    x = x_ref[...][0]                     # (H, W*Cin), lane-dense

    # conv_in (1x1+BN+ReLU) and skip (1x1+BN) share one matmul; BN scales are
    # pre-folded into the weight columns, so only bias-add / ReLU remain.
    t = jnp.dot(x, w_in_skip_ref[...], preferred_element_type=jnp.float32)
    mid = jnp.maximum(t[:, :WCm] + b_in_ref[...], 0.0)       # (H, W*Cmid)
    skip = t[:, WCm:]                                          # (H, W*Cout), bias deferred

    def conv3x3(inp, w_ref, b_ref):
        # One matmul produces the three vertical-tap column blocks (the dx
        # shifts + left/right zero padding live inside the banded weights);
        # the dy shifts become two row-offset accumulations into the
        # (H+2)-row scratch whose boundary rows are write-only catch bins.
        r = jnp.dot(inp, w_ref[...], preferred_element_type=jnp.float32)
        acc_ref[1:H + 1, :] = r[:, WCm:2 * WCm] + b_ref[...]   # center row (ky=1)
        acc_ref[2:H + 2, :] += r[:, 0:WCm]                     # row above  (ky=0)
        acc_ref[0:H, :] += r[:, 2 * WCm:3 * WCm]               # row below  (ky=2)
        return jnp.maximum(acc_ref[1:H + 1, :], 0.0), r

    out1, _ = conv3x3(mid, w1_ref, b1_ref)                     # conv1
    out2, r2 = conv3x3(out1, w2_ref, b2_ref)                   # conv2
    main_top = r2[:, 3 * WCm:]            # folded out1 @ blockdiag(w_out_top*s_out)

    main_bot = jnp.dot(out2, w_out_bot_ref[...],
                       preferred_element_type=jnp.float32)     # (H, W*Cout)

    out = jnp.maximum(main_top + main_bot + skip + b_fin_ref[...], 0.0)
    o_ref[...] = out[None, :, :].astype(o_ref.dtype)           # lane-dense store


def spg_forward_pallas(x_nhwc, p):
    N, H, W, Cin = x_nhwc.shape
    WCin = W * Cin
    WCm = p['b_in_row'].shape[1]
    WCout = p['b_fin_row'].shape[1]
    Cout = WCout // W

    x_rows = x_nhwc.reshape(N, H, WCin)   # free: identical memory order

    def w_spec(a):                        # whole (2-D) array resident in VMEM
        return pl.BlockSpec(a.shape, lambda n: (0, 0))

    out = pl.pallas_call(
        _spg_kernel,
        out_shape=jax.ShapeDtypeStruct((N, H, WCout), jnp.float32),
        grid=(N,),
        in_specs=[
            pl.BlockSpec((1, H, WCin), lambda n: (n, 0, 0)),
            w_spec(p['w_in_skip']), w_spec(p['b_in_row']),
            w_spec(p['w1_all']), w_spec(p['b1_row']),
            w_spec(p['w2_all']), w_spec(p['b2_row']),
            w_spec(p['w_out_bot_bd']), w_spec(p['b_fin_row']),
        ],
        out_specs=pl.BlockSpec((1, H, WCout), lambda n: (n, 0, 0)),
        scratch_shapes=[pltpu.VMEM((H + 2, WCm), jnp.float32)],
        compiler_params=pltpu.CompilerParams(
            dimension_semantics=("parallel",)),
    )(x_rows,
      p['w_in_skip'], p['b_in_row'],
      p['w1_all'], p['b1_row'],
      p['w2_all'], p['b2_row'],
      p['w_out_bot_bd'], p['b_fin_row'])
    return out.reshape(N, H, W, Cout)


# --------------------------- parameter setup ---------------------------------

def fold_bn(gamma, beta, mean, var):
    scale = gamma / jnp.sqrt(var + EPS)
    return scale, beta - mean * scale


def bn_params(key, c):
    k1, k2, k3, k4 = jax.random.split(key, 4)
    gamma = 1.0 + 0.1 * jax.random.normal(k1, (c,), jnp.float32)
    beta = 0.1 * jax.random.normal(k2, (c,), jnp.float32)
    mean = 0.1 * jax.random.normal(k3, (c,), jnp.float32)
    var = jnp.abs(jax.random.normal(k4, (c,), jnp.float32)) + 0.5
    return fold_bn(gamma, beta, mean, var)


def grouped_to_dense(w_oihw, groups):
    """PyTorch grouped weight (Cout, Cin/G, kH, kW) -> dense HWIO (kH,kW,Cin,Cout)."""
    Cout, cin_pg, kH, kW = w_oihw.shape
    Cin = cin_pg * groups
    copg = Cout // groups
    w_hwio = jnp.transpose(w_oihw, (2, 3, 1, 0))  # (kH,kW,cin_pg,Cout)
    dense = jnp.zeros((kH, kW, Cin, Cout), jnp.float32)
    for g in range(groups):
        dense = dense.at[:, :, g * cin_pg:(g + 1) * cin_pg,
                         g * copg:(g + 1) * copg].set(
            w_hwio[:, :, :, g * copg:(g + 1) * copg])
    return dense


def init_params(key, in_planes, out_planes, group_num, W):
    cmid = int(out_planes * 0.5)
    ks = jax.random.split(key, 10)
    p = {}
    # raw (PyTorch-layout) parameters -- used by the reference implementation
    p['w_in_oihw'] = 0.1 * jax.random.normal(ks[0], (cmid, in_planes, 1, 1), jnp.float32)
    p['s_in'], p['b_in'] = bn_params(ks[1], cmid)
    p['w1_oihw'] = 0.1 * jax.random.normal(ks[2], (cmid, cmid // group_num, 3, 3), jnp.float32)
    p['s1'], p['b1'] = bn_params(ks[3], cmid)
    p['w2_oihw'] = 0.1 * jax.random.normal(ks[4], (cmid, cmid // group_num, 3, 3), jnp.float32)
    p['s2'], p['b2'] = bn_params(ks[5], cmid)
    p['w_out_oihw'] = 0.1 * jax.random.normal(ks[6], (out_planes, 2 * cmid, 1, 1), jnp.float32)
    p['s_out'], p['b_out'] = bn_params(ks[7], out_planes)
    p['w_skip_oihw'] = 0.1 * jax.random.normal(ks[8], (out_planes, in_planes, 1, 1), jnp.float32)
    p['s_skip'], p['b_skip'] = bn_params(ks[9], out_planes)

    # ---- lane-fused (W folded into lanes) weights for the Pallas kernel ----
    eye = jnp.eye(W, dtype=jnp.float32)

    def blockdiag(w2d, scale):
        # (Ci, Co) -> (W*Ci, W*Co) block-diagonal, BN scale folded into columns.
        return jnp.kron(eye, w2d) * jnp.tile(scale, W)[None, :]

    def banded_row(taps, scale):
        # taps: (3, Ci, Co) for one kernel row (dx = 0,1,2).  Produces the
        # (W*Ci, W*Co) banded matrix that applies the dx taps + horizontal
        # zero padding for every output column; BN scale folded into columns.
        m = jnp.zeros((W * taps.shape[1], W * taps.shape[2]), jnp.float32)
        for dx in range(3):
            m = m + jnp.kron(jnp.eye(W, k=1 - dx, dtype=jnp.float32), taps[dx])
        return m * jnp.tile(scale, W)[None, :]

    w_in = p['w_in_oihw'][:, :, 0, 0].T                   # (Cin, Cmid)
    w_skip = p['w_skip_oihw'][:, :, 0, 0].T               # (Cin, Cout)
    w_out = p['w_out_oihw'][:, :, 0, 0].T                 # (2*Cmid, Cout)
    w1_hwio = grouped_to_dense(p['w1_oihw'], group_num)   # (3,3,Cmid,Cmid)
    w2_hwio = grouped_to_dense(p['w2_oihw'], group_num)

    # conv_in and skip merged into one matmul weight (one pass over x).
    p['w_in_skip'] = jnp.concatenate(
        [blockdiag(w_in, p['s_in']), blockdiag(w_skip, p['s_skip'])], axis=1)
    p['b_in_row'] = jnp.tile(p['b_in'], W)[None, :]

    # conv1: the three vertical tap rows as column blocks of a single matmul.
    p['w1_all'] = jnp.concatenate(
        [banded_row(w1_hwio[dy], p['s1']) for dy in range(3)], axis=1)
    p['b1_row'] = jnp.tile(p['b1'], W)[None, :]

    # conv2: same, plus conv_out's top half folded in as extra output columns
    # (out1 is conv2's center-tap input, so out1 @ w_out_top comes for free).
    p['w2_all'] = jnp.concatenate(
        [banded_row(w2_hwio[dy], p['s2']) for dy in range(3)]
        + [blockdiag(w_out[:cmid], p['s_out'])], axis=1)
    p['b2_row'] = jnp.tile(p['b2'], W)[None, :]

    # conv_out bottom half (applied to out2); final bias = b_out + b_skip.
    p['w_out_bot_bd'] = blockdiag(w_out[cmid:], p['s_out'])
    p['b_fin_row'] = jnp.tile(p['b_out'] + p['b_skip'], W)[None, :]
    return p


# --------------------------- pure-JAX reference -------------------------------

def _ref_conv(x, w_oihw, stride=1, groups=1, padding=0):
    w_hwio = jnp.transpose(w_oihw, (2, 3, 1, 0))
    return jax.lax.conv_general_dilated(
        x, w_hwio, window_strides=(stride, stride),
        padding=((padding, padding), (padding, padding)),
        dimension_numbers=('NHWC', 'HWIO', 'NHWC'),
        feature_group_count=groups)


def spg_forward_ref(x_nhwc, p, group_num):
    relu = lambda t: jnp.maximum(t, 0.0)
    out = relu(_ref_conv(x_nhwc, p['w_in_oihw']) * p['s_in'] + p['b_in'])
    out1 = relu(_ref_conv(out, p['w1_oihw'], groups=group_num, padding=1) * p['s1'] + p['b1'])
    out2 = relu(_ref_conv(out1, p['w2_oihw'], groups=group_num, padding=1) * p['s2'] + p['b2'])
    cat = jnp.concatenate([out1, out2], axis=-1)
    main = _ref_conv(cat, p['w_out_oihw']) * p['s_out'] + p['b_out']
    skip = _ref_conv(x_nhwc, p['w_skip_oihw']) * p['s_skip'] + p['b_skip']
    return relu(main + skip)


if __name__ == "__main__":
    N, H, W = 2, 16, 16
    in_planes, out_planes, group_num = 16, 32, 8

    key = jax.random.PRNGKey(0)
    kx, kp = jax.random.split(key)
    x_nchw = jax.random.normal(kx, (N, in_planes, H, W), jnp.float32)  # PyTorch NCHW input
    x_nhwc = jnp.transpose(x_nchw, (0, 2, 3, 1))                       # kernel layout NHWC

    params = init_params(kp, in_planes, out_planes, group_num, W)

    out = spg_forward_pallas(x_nhwc, params)
    out = jax.block_until_ready(out)

    ref = spg_forward_ref(x_nhwc, params, group_num)
    err = float(jnp.max(jnp.abs(out - ref)))
    assert jnp.allclose(out, ref, rtol=1e-3, atol=1e-3), f"max abs err {err}"

    print("KERNEL_OK")
</pallas_src>

<mosaic_0001>
module attributes {stable_mosaic.version = 11 : i64} {
  func.func @_spg_kernel(%arg0: i32, %arg1: memref<1x16x256xf32, #tpu.memory_space<vmem>>, %arg2: memref<256x768xf32, #tpu.memory_space<vmem>>, %arg3: memref<1x256xf32, #tpu.memory_space<vmem>>, %arg4: memref<256x768xf32, #tpu.memory_space<vmem>>, %arg5: memref<1x256xf32, #tpu.memory_space<vmem>>, %arg6: memref<256x1280xf32, #tpu.memory_space<vmem>>, %arg7: memref<1x256xf32, #tpu.memory_space<vmem>>, %arg8: memref<256x512xf32, #tpu.memory_space<vmem>>, %arg9: memref<1x512xf32, #tpu.memory_space<vmem>>, %arg10: memref<1x16x512xf32, #tpu.memory_space<vmem>>, %arg11: memref<18x256xf32, #tpu.memory_space<vmem>>) attributes {dimension_semantics = [#tpu.dimension_semantics<parallel>], iteration_bounds = array<i64: 2>, scalar_prefetch = 0 : i64, scratch_operands = 1 : i64, tpu.core_type = #tpu.core_type<tc>, window_params = [{transform_indices = @transform_0, window_bounds = array<i64: 1, 16, 256>}, {pipeline_mode = #tpu.pipeline_mode<synchronous>, transform_indices = @transform_1, window_bounds = array<i64: 256, 768>}, {pipeline_mode = #tpu.pipeline_mode<synchronous>, transform_indices = @transform_2, window_bounds = array<i64: 1, 256>}, {pipeline_mode = #tpu.pipeline_mode<synchronous>, transform_indices = @transform_3, window_bounds = array<i64: 256, 768>}, {pipeline_mode = #tpu.pipeline_mode<synchronous>, transform_indices = @transform_4, window_bounds = array<i64: 1, 256>}, {pipeline_mode = #tpu.pipeline_mode<synchronous>, transform_indices = @transform_5, window_bounds = array<i64: 256, 1280>}, {pipeline_mode = #tpu.pipeline_mode<synchronous>, transform_indices = @transform_6, window_bounds = array<i64: 1, 256>}, {pipeline_mode = #tpu.pipeline_mode<synchronous>, transform_indices = @transform_7, window_bounds = array<i64: 256, 512>}, {pipeline_mode = #tpu.pipeline_mode<synchronous>, transform_indices = @transform_8, window_bounds = array<i64: 1, 512>}, {transform_indices = @transform_9, window_bounds = array<i64: 1, 16, 512>}]} {
    %c0 = arith.constant 0 : index
    %c0_0 = arith.constant 0 : index
    %c0_1 = arith.constant 0 : index
    %0 = vector.load %arg1[%c0, %c0_0, %c0_1] : memref<1x16x256xf32, #tpu.memory_space<vmem>>, vector<1x16x256xf32>
    %1 = vector.shape_cast %0 : vector<1x16x256xf32> to vector<16x256xf32>
    %c0_2 = arith.constant 0 : index
    %c0_3 = arith.constant 0 : index
    %2 = vector.load %arg2[%c0_2, %c0_3] : memref<256x768xf32, #tpu.memory_space<vmem>>, vector<256x768xf32>
    %cst = arith.constant dense<0.000000e+00> : vector<16x768xf32>
    %3 = tpu.matmul %1, %2, %cst {dimension_numbers = #tpu.dot_dimension_numbers<[1], [0], [0], [1], [0, 0, 1, 1], [], []>} : vector<16x256xf32>, vector<256x768xf32>, vector<16x768xf32> -> vector<16x768xf32>
    %4 = vector.extract_strided_slice %3 {offsets = [0, 0], sizes = [16, 256], strides = [1, 1]} : vector<16x768xf32> to vector<16x256xf32>
    %c0_4 = arith.constant 0 : index
    %c0_5 = arith.constant 0 : index
    %5 = vector.load %arg3[%c0_4, %c0_5] : memref<1x256xf32, #tpu.memory_space<vmem>>, vector<1x256xf32>
    %6 = vector.broadcast %5 : vector<1x256xf32> to vector<16x256xf32>
    %7 = arith.addf %4, %6 : vector<16x256xf32>
    %cst_6 = arith.constant 0.000000e+00 : f32
    %8 = vector.broadcast %cst_6 : f32 to vector<16x256xf32>
    %9 = arith.maximumf %7, %8 : vector<16x256xf32>
    %10 = vector.extract_strided_slice %3 {offsets = [0, 256], sizes = [16, 512], strides = [1, 1]} : vector<16x768xf32> to vector<16x512xf32>
    %c0_7 = arith.constant 0 : index
    %c0_8 = arith.constant 0 : index
    %11 = vector.load %arg4[%c0_7, %c0_8] : memref<256x768xf32, #tpu.memory_space<vmem>>, vector<256x768xf32>
    %cst_9 = arith.constant dense<0.000000e+00> : vector<16x768xf32>
    %12 = tpu.matmul %9, %11, %cst_9 {dimension_numbers = #tpu.dot_dimension_numbers<[1], [0], [0], [1], [0, 0, 1, 1], [], []>} : vector<16x256xf32>, vector<256x768xf32>, vector<16x768xf32> -> vector<16x768xf32>
    %13 = vector.extract_strided_slice %12 {offsets = [0, 256], sizes = [16, 256], strides = [1, 1]} : vector<16x768xf32> to vector<16x256xf32>
    %c0_10 = arith.constant 0 : index
    %c0_11 = arith.constant 0 : index
    %14 = vector.load %arg5[%c0_10, %c0_11] : memref<1x256xf32, #tpu.memory_space<vmem>>, vector<1x256xf32>
    %15 = vector.broadcast %14 : vector<1x256xf32> to vector<16x256xf32>
    %16 = arith.addf %13, %15 : vector<16x256xf32>
    %c1 = arith.constant 1 : index
    %c0_12 = arith.constant 0 : index
    %17 = vector.load %arg11[%c1, %c0_12] : memref<18x256xf32, #tpu.memory_space<vmem>>, vector<16x256xf32>
    tpu.vector_store %arg11[%c1, %c0_12], %16 {strides = array<i32>} : memref<18x256xf32, #tpu.memory_space<vmem>>, vector<16x256xf32>,
    %c2 = arith.constant 2 : index
    %c0_13 = arith.constant 0 : index
    %18 = vector.load %arg11[%c2, %c0_13] : memref<18x256xf32, #tpu.memory_space<vmem>>, vector<16x256xf32>
    %19 = vector.extract_strided_slice %12 {offsets = [0, 0], sizes = [16, 256], strides = [1, 1]} : vector<16x768xf32> to vector<16x256xf32>
    %20 = arith.addf %18, %19 : vector<16x256xf32>
    %c2_14 = arith.constant 2 : index
    %c0_15 = arith.constant 0 : index
    %21 = vector.load %arg11[%c2_14, %c0_15] : memref<18x256xf32, #tpu.memory_space<vmem>>, vector<16x256xf32>
    tpu.vector_store %arg11[%c2_14, %c0_15], %20 {strides = array<i32>} : memref<18x256xf32, #tpu.memory_space<vmem>>, vector<16x256xf32>,
    %c0_16 = arith.constant 0 : index
    %c0_17 = arith.constant 0 : index
    %22 = vector.load %arg11[%c0_16, %c0_17] : memref<18x256xf32, #tpu.memory_space<vmem>>, vector<16x256xf32>
    %23 = vector.extract_strided_slice %12 {offsets = [0, 512], sizes = [16, 256], strides = [1, 1]} : vector<16x768xf32> to vector<16x256xf32>
    %24 = arith.addf %22, %23 : vector<16x256xf32>
    %c0_18 = arith.constant 0 : index
    %c0_19 = arith.constant 0 : index
    %25 = vector.load %arg11[%c0_18, %c0_19] : memref<18x256xf32, #tpu.memory_space<vmem>>, vector<16x256xf32>
    tpu.vector_store %arg11[%c0_18, %c0_19], %24 {strides = array<i32>} : memref<18x256xf32, #tpu.memory_space<vmem>>, vector<16x256xf32>,
    %c1_20 = arith.constant 1 : index
    %c0_21 = arith.constant 0 : index
    %26 = vector.load %arg11[%c1_20, %c0_21] : memref<18x256xf32, #tpu.memory_space<vmem>>, vector<16x256xf32>
    %cst_22 = arith.constant 0.000000e+00 : f32
    %27 = vector.broadcast %cst_22 : f32 to vector<16x256xf32>
    %28 = arith.maximumf %26, %27 : vector<16x256xf32>
    %c0_23 = arith.constant 0 : index
    %c0_24 = arith.constant 0 : index
    %29 = vector.load %arg6[%c0_23, %c0_24] : memref<256x1280xf32, #tpu.memory_space<vmem>>, vector<256x1280xf32>
    %cst_25 = arith.constant dense<0.000000e+00> : vector<16x1280xf32>
    %30 = tpu.matmul %28, %29, %cst_25 {dimension_numbers = #tpu.dot_dimension_numbers<[1], [0], [0], [1], [0, 0, 1, 1], [], []>} : vector<16x256xf32>, vector<256x1280xf32>, vector<16x1280xf32> -> vector<16x1280xf32>
    %31 = vector.extract_strided_slice %30 {offsets = [0, 256], sizes = [16, 256], strides = [1, 1]} : vector<16x1280xf32> to vector<16x256xf32>
    %c0_26 = arith.constant 0 : index
    %c0_27 = arith.constant 0 : index
    %32 = vector.load %arg7[%c0_26, %c0_27] : memref<1x256xf32, #tpu.memory_space<vmem>>, vector<1x256xf32>
    %33 = vector.broadcast %32 : vector<1x256xf32> to vector<16x256xf32>
    %34 = arith.addf %31, %33 : vector<16x256xf32>
    %c1_28 = arith.constant 1 : index
    %c0_29 = arith.constant 0 : index
    %35 = vector.load %arg11[%c1_28, %c0_29] : memref<18x256xf32, #tpu.memory_space<vmem>>, vector<16x256xf32>
    tpu.vector_store %arg11[%c1_28, %c0_29], %34 {strides = array<i32>} : memref<18x256xf32, #tpu.memory_space<vmem>>, vector<16x256xf32>,
    %c2_30 = arith.constant 2 : index
    %c0_31 = arith.constant 0 : index
    %36 = vector.load %arg11[%c2_30, %c0_31] : memref<18x256xf32, #tpu.memory_space<vmem>>, vector<16x256xf32>
    %37 = vector.extract_strided_slice %30 {offsets = [0, 0], sizes = [16, 256], strides = [1, 1]} : vector<16x1280xf32> to vector<16x256xf32>
    %38 = arith.addf %36, %37 : vector<16x256xf32>
    %c2_32 = arith.constant 2 : index
    %c0_33 = arith.constant 0 : index
    %39 = vector.load %arg11[%c2_32, %c0_33] : memref<18x256xf32, #tpu.memory_space<vmem>>, vector<16x256xf32>
    tpu.vector_store %arg11[%c2_32, %c0_33], %38 {strides = array<i32>} : memref<18x256xf32, #tpu.memory_space<vmem>>, vector<16x256xf32>,
    %c0_34 = arith.constant 0 : index
    %c0_35 = arith.constant 0 : index
    %40 = vector.load %arg11[%c0_34, %c0_35] : memref<18x256xf32, #tpu.memory_space<vmem>>, vector<16x256xf32>
    %41 = vector.extract_strided_slice %30 {offsets = [0, 512], sizes = [16, 256], strides = [1, 1]} : vector<16x1280xf32> to vector<16x256xf32>
    %42 = arith.addf %40, %41 : vector<16x256xf32>
    %c0_36 = arith.constant 0 : index
    %c0_37 = arith.constant 0 : index
    %43 = vector.load %arg11[%c0_36, %c0_37] : memref<18x256xf32, #tpu.memory_space<vmem>>, vector<16x256xf32>
    tpu.vector_store %arg11[%c0_36, %c0_37], %42 {strides = array<i32>} : memref<18x256xf32, #tpu.memory_space<vmem>>, vector<16x256xf32>,
    %c1_38 = arith.constant 1 : index
    %c0_39 = arith.constant 0 : index
    %44 = vector.load %arg11[%c1_38, %c0_39] : memref<18x256xf32, #tpu.memory_space<vmem>>, vector<16x256xf32>
    %cst_40 = arith.constant 0.000000e+00 : f32
    %45 = vector.broadcast %cst_40 : f32 to vector<16x256xf32>
    %46 = arith.maximumf %44, %45 : vector<16x256xf32>
    %47 = vector.extract_strided_slice %30 {offsets = [0, 768], sizes = [16, 512], strides = [1, 1]} : vector<16x1280xf32> to vector<16x512xf32>
    %c0_41 = arith.constant 0 : index
    %c0_42 = arith.constant 0 : index
    %48 = vector.load %arg8[%c0_41, %c0_42] : memref<256x512xf32, #tpu.memory_space<vmem>>, vector<256x512xf32>
    %cst_43 = arith.constant dense<0.000000e+00> : vector<16x512xf32>
    %49 = tpu.matmul %46, %48, %cst_43 {dimension_numbers = #tpu.dot_dimension_numbers<[1], [0], [0], [1], [0, 0, 1, 1], [], []>} : vector<16x256xf32>, vector<256x512xf32>, vector<16x512xf32> -> vector<16x512xf32>
    %50 = arith.addf %47, %49 : vector<16x512xf32>
    %51 = arith.addf %50, %10 : vector<16x512xf32>
    %c0_44 = arith.constant 0 : index
    %c0_45 = arith.constant 0 : index
    %52 = vector.load %arg9[%c0_44, %c0_45] : memref<1x512xf32, #tpu.memory_space<vmem>>, vector<1x512xf32>
    %53 = vector.broadcast %52 : vector<1x512xf32> to vector<16x512xf32>
    %54 = arith.addf %51, %53 : vector<16x512xf32>
    %cst_46 = arith.constant 0.000000e+00 : f32
    %55 = vector.broadcast %cst_46 : f32 to vector<16x512xf32>
    %56 = arith.maximumf %54, %55 : vector<16x512xf32>
    %57 = vector.shape_cast %56 : vector<16x512xf32> to vector<1x16x512xf32>
    %c0_47 = arith.constant 0 : index
    %c0_48 = arith.constant 0 : index
    %c0_49 = arith.constant 0 : index
    %58 = vector.load %arg10[%c0_47, %c0_48, %c0_49] : memref<1x16x512xf32, #tpu.memory_space<vmem>>, vector<1x16x512xf32>
    tpu.vector_store %arg10[%c0_47, %c0_48, %c0_49], %57 {strides = array<i32>} : memref<1x16x512xf32, #tpu.memory_space<vmem>>, vector<1x16x512xf32>,
    return
  }
  func.func @transform_0(%arg0: i32) -> (i32, i32, i32) {
    %c0_i32 = arith.constant 0 : i32
    %c0_i32_0 = arith.constant 0 : i32
    %c0_i32_1 = arith.constant 0 : i32
    return %arg0, %c0_i32, %c0_i32_0 : i32, i32, i32
  }
  func.func @transform_1(%arg0: i32) -> (i32, i32) {
    %c0_i32 = arith.constant 0 : i32
    %c0_i32_0 = arith.constant 0 : i32
    %c0_i32_1 = arith.constant 0 : i32
    return %c0_i32, %c0_i32_0 : i32, i32
  }
  func.func @transform_2(%arg0: i32) -> (i32, i32) {
    %c0_i32 = arith.constant 0 : i32
    %c0_i32_0 = arith.constant 0 : i32
    %c0_i32_1 = arith.constant 0 : i32
    return %c0_i32, %c0_i32_0 : i32, i32
  }
  func.func @transform_3(%arg0: i32) -> (i32, i32) {
    %c0_i32 = arith.constant 0 : i32
    %c0_i32_0 = arith.constant 0 : i32
    %c0_i32_1 = arith.constant 0 : i32
    return %c0_i32, %c0_i32_0 : i32, i32
  }
  func.func @transform_4(%arg0: i32) -> (i32, i32) {
    %c0_i32 = arith.constant 0 : i32
    %c0_i32_0 = arith.constant 0 : i32
    %c0_i32_1 = arith.constant 0 : i32
    return %c0_i32, %c0_i32_0 : i32, i32
  }
  func.func @transform_5(%arg0: i32) -> (i32, i32) {
    %c0_i32 = arith.constant 0 : i32
    %c0_i32_0 = arith.constant 0 : i32
    %c0_i32_1 = arith.constant 0 : i32
    return %c0_i32, %c0_i32_0 : i32, i32
  }
  func.func @transform_6(%arg0: i32) -> (i32, i32) {
    %c0_i32 = arith.constant 0 : i32
    %c0_i32_0 = arith.constant 0 : i32
    %c0_i32_1 = arith.constant 0 : i32
    return %c0_i32, %c0_i32_0 : i32, i32
  }
  func.func @transform_7(%arg0: i32) -> (i32, i32) {
    %c0_i32 = arith.constant 0 : i32
    %c0_i32_0 = arith.constant 0 : i32
    %c0_i32_1 = arith.constant 0 : i32
    return %c0_i32, %c0_i32_0 : i32, i32
  }
  func.func @transform_8(%arg0: i32) -> (i32, i32) {
    %c0_i32 = arith.constant 0 : i32
    %c0_i32_0 = arith.constant 0 : i32
    %c0_i32_1 = arith.constant 0 : i32
    return %c0_i32, %c0_i32_0 : i32, i32
  }
  func.func @transform_9(%arg0: i32) -> (i32, i32, i32) {
    %c0_i32 = arith.constant 0 : i32
    %c0_i32_0 = arith.constant 0 : i32
    %c0_i32_1 = arith.constant 0 : i32
    return %arg0, %c0_i32, %c0_i32_0 : i32, i32, i32
  }
}

</mosaic_0001>

<bundles_post_ra>
// kernel: tpu_custom_call.1
= control target key start
LH: loop header
LB: loop body
LE: loop exit
PB: predicated region body
PF: predicated region fallthrough
CT: control target
= control target key end

     0   :  { %s4078_s0 = inlined_call_operand.hbm [shape: f32[2,16,256], index: 0, kind: input, shape index: {}]   ;;  %s4079_s1 = inlined_call_operand.hbm [shape: f32[256,768], index: 1, kind: input, shape index: {}]   ;;  %s4080_s2 = inlined_call_operand.hbm [shape: f32[1,256], index: 2, kind: input, shape index: {}]   ;;  %s4081_s3 = inlined_call_operand.hbm [shape: f32[256,768], index: 3, kind: input, shape index: {}]   ;;  %s4082_s4 = inlined_call_operand.hbm [shape: f32[1,256], index: 4, kind: input, shape index: {}]   ;;  %s4083_s5 = inlined_call_operand.hbm [shape: f32[256,1280], index: 5, kind: input, shape index: {}]   ;;  %s4084_s6 = inlined_call_operand.hbm [shape: f32[1,256], index: 6, kind: input, shape index: {}]   ;;  %s4085_s7 = inlined_call_operand.hbm [shape: f32[256,512], index: 7, kind: input, shape index: {}]   ;;  %s4086_s8 = inlined_call_operand.hbm [shape: f32[1,512], index: 8, kind: input, shape index: {}]   ;;  %s4087_s9 = inlined_call_operand.hbm [shape: f32[2,16,512], index: 9, kind: output, shape index: {}]  }
   0x1   :  { %4088 = sst [smem:[#allocation25_spill]] %s4079_s1 }
   0x2   :  { %4089 = sst [smem:[#allocation26_spill]] %s4080_s2 }
   0x3   :  { %4090 = sst [smem:[#allocation27_spill]] %s4081_s3 }
   0x4   :  { %4091 = sst [smem:[#allocation28_spill]] %s4082_s4 }
   0x5   :  { %14 = vsyncpa [#allocation4], 0 }
   0x6   :  { %16 = vsyncpa [#allocation4 + $0x1], 0 }
   0x7   :  { %17 = vsyncpa [#allocation7], 0 }
   0x8   :  { %18 = vsyncpa [#allocation10], 0 }
   0x9   :  { %19 = vsyncpa [#allocation13], 0 }
   0xa   :  { %20 = vsyncpa [#allocation16], 0 }
   0xb   :  { %21 = vsyncpa [#allocation5], 0 }
   0xc   :  { %23 = vsyncpa [#allocation5 + $0x1], 0  ;;  %s3552_s30 = smov 0   ;;  %s3554_s10 = smov 0  }
   0xd   :  { %s3556_s11 = smov 0   ;;  %s3558_s12 = smov 0  }
   0xe LB: > { %s4092_s1 = sld [smem:[#allocation25_spill]]  ;;  %s3576_s16 = sadd.s32 4294967295, %s3482_s12   ;;  %s3482_s12 = sphi %s3558_s12, %s4107_s12   ;;  %s3478_s11 = sphi %s3556_s11, %s4106_s11   ;;  %s3474_s10 = sphi %s3554_s10, %s4105_s10   ;;  %s3470_s30 = sphi %s3552_s30, %s4104_s30  }
   0xf   : > { %p2962_p0 = scmp.ge.s32.totalorder %s3482_s12, 1  ;;  %p50_p1 = scmp.eq.s32.totalorder %s3576_s16, 0 }
  0x10   : > { %p254_p2 = scmp.lt.s32.totalorder %s3482_s12, 3  ;;  %s3484_s18 = smov [#allocation6]  }
  0x11   : > { %s267_s19 = sshll.u32 %s3484_s18, 4  ;;  %s4094_s3 = sld [smem:[#allocation27_spill]]  ;;  %s268_s19 = int_to_ptr.vmem [resolvable:$true] %s267_s19 }
  0x12   : > { %p3581_p3 = pnand %p2962_p0, %p254_p2  ;;  %s317_s26 = sshll.u32 %s4083_s5, 4  ;;  %s318_s26 = int_to_ptr.hbm [resolvable:$true] %s317_s26 }
  0x13   : > { %s3485_s27 = smov [#allocation9]   ;;  %s3486_s29 = smov 768  }
  0x14   : > { %s265_s15 = sshll.u32 %s4092_s1, 4  ;;  %p3029_p4 = pneg %p3581_p3  ;;  %s266_s15 = int_to_ptr.hbm [resolvable:$true] %s265_s15 }
  0x15   : > { %s293_s28 = sshll.u32 %s3485_s27, 4  ;;  %s3487_s13 = smov 48   ;;  %s294_s28 = int_to_ptr.vmem [resolvable:$true] %s293_s28 }
  0x16   : > { %p3593_p6 = pnand %p3029_p4, %p50_p1  ;;  %s3488_s14 = smov [#allocation12]  }
  0x17   : > { %s291_s22 = sshll.u32 %s4094_s3, 4  ;;  %s319_s18 = sshll.u32 %s3488_s14, 4  ;;  %s292_s22 = int_to_ptr.hbm [resolvable:$true] %s291_s22  ;;  %s320_s18 = int_to_ptr.vmem [resolvable:$true] %s319_s18 }
  0x18   : > { %3032 = dma.hbm_to_vmem [thread:$0]  (!%p3593_p6), %s266_s15, 24576, %s268_s19, [#allocation7], %s3486_s29, %s3486_s29, %s3487_s13  }
  0x19   : > { %3038 = dma.hbm_to_vmem [thread:$0]  (!%p3593_p6), %s292_s22, 24576, %s294_s28, [#allocation10], %s3486_s29, %s3486_s29, %s3487_s13  }
  0x1a   : > { %s343_s24 = sshll.u32 %s4085_s7, 4  ;;  %s3489_s25 = smov 1280   ;;  %s344_s24 = int_to_ptr.hbm [resolvable:$true] %s343_s24 }
  0x1b   : > { %s3490_s1 = smov 80   ;;  %s3491_s27 = smov [#allocation15]  }
  0x1c   : > { %3044 = dma.hbm_to_vmem [thread:$0]  (!%p3593_p6), %s318_s26, 40960, %s320_s18, [#allocation13], %s3489_s25, %s3489_s25, %s3490_s1  }
  0x1d   : > { %s345_s15 = sshll.u32 %s3491_s27, 4  ;;  %s3492_s19 = smov 512   ;;  %s346_s15 = int_to_ptr.vmem [resolvable:$true] %s345_s15 }
  0x1e   : > { %s3493_s3 = smov 32   ;;  %s4096_s2 = sld [smem:[#allocation26_spill]] }
  0x1f   : > { %3050 = dma.hbm_to_vmem [thread:$0]  (!%p3593_p6), %s344_s24, 16384, %s346_s15, [#allocation16], %s3492_s19, %s3492_s19, %s3493_s3  }
  0x20   : > { %s3494_s13 = smov [#allocation8]   ;;  %s4097_s4 = sld [smem:[#allocation28_spill]] }
  0x21   : > { %s282_s14 = sshll.u32 %s3494_s13, 4  ;;  %s3495_s18 = smov [#allocation11]   ;;  %s283_s14 = int_to_ptr.vmem [resolvable:$true] %s282_s14 }
  0x22   : > { %s308_s3 = sshll.u32 %s3495_s18, 4  ;;  %s332_s25 = sshll.u32 %s4084_s6, 4  ;;  %s309_s3 = int_to_ptr.vmem [resolvable:$true] %s308_s3  ;;  %s333_s25 = int_to_ptr.hbm [resolvable:$true] %s332_s25 }
  0x23   : > { %s358_s19 = sshll.u32 %s4086_s8, 4  ;;  %s3496_s22 = smov [#allocation14]   ;;  %s359_s19 = int_to_ptr.hbm [resolvable:$true] %s358_s19 }
  0x24   : > { %s280_s29 = sshll.u32 %s4096_s2, 4  ;;  %s334_s28 = sshll.u32 %s3496_s22, 4  ;;  %s281_s29 = int_to_ptr.hbm [resolvable:$true] %s280_s29  ;;  %s335_s28 = int_to_ptr.vmem [resolvable:$true] %s334_s28 }
  0x25   : > { %3035 = dma.hbm_to_vmem [thread:$0]  (!%p3593_p6), %s281_s29, 32, %s283_s14, [#allocation7]  }
  0x26   : > { %s306_s26 = sshll.u32 %s4097_s4, 4  ;;  %s3497_s29 = smov [#allocation17]   ;;  %s307_s26 = int_to_ptr.hbm [resolvable:$true] %s306_s26 }
  0x27   : > { %3041 = dma.hbm_to_vmem [thread:$0]  (!%p3593_p6), %s307_s26, 32, %s309_s3, [#allocation10]  }
  0x28   : > { %3047 = dma.hbm_to_vmem [thread:$0]  (!%p3593_p6), %s333_s25, 32, %s335_s28, [#allocation13]  }
  0x29   : > { %s360_s13 = sshll.u32 %s3497_s29, 4  ;;  %s2961_s14 = sadd.s32 4294967294, %s3482_s12   ;;  %s361_s13 = int_to_ptr.vmem [resolvable:$true] %s360_s13 }
  0x2a   : > { %3053 = dma.hbm_to_vmem [thread:$0]  (!%p3593_p6), %s359_s19, 64, %s361_s13, [#allocation16]  }
  0x2b   : > { %s3633_s20 = sadd.s32 1, %s3482_s12   ;;  %s36_s26 = sadd.s32 1, %s3478_s11 }
  0x2c   : > { %s33_s1 = ssub.s32 %s3482_s12, %s3633_s20  ;;  %p43_p8 = scmp.ne.s32.totalorder %s3478_s11, %s3474_s10 }
  0x2d   : > { %p34_p7 = scmp.eq.s32.totalorder %s33_s1, 0  ;;  %p44_p9 = scmp.eq.s32.totalorder %s3482_s12, 0 }
  0x2e   : > { %p49_p10 = scmp.ne.s32.totalorder %s3474_s10, %s3470_s30  ;;  %p241_p13 = scmp.eq.s32.totalorder %s3576_s16, 1 }
  0x2f   : > { %s3644_s18 = scalar_select %p34_p7, %s3478_s11, %s36_s26  }
  0x30   : > { %p3646_p11 = por %p44_p9, %p43_p8  ;;  %p3652_p12 = por %p50_p1, %p49_p10 }
  0x31   : > { %p247_p0 = scmp.eq.s32.totalorder %s2961_s14, 1  ;;  %p3070_p2 = scmp.lt.s32.totalorder %s3482_s12, 2 }
  0x32   : > { %s371_s21 = sand.u32 1, %s3478_s11   ;;  %p3659_p4 = por %p241_p13, %p43_p8 }
  0x33   : > { %p3663_p6 = por %p247_p0, %p49_p10  ;;  %s2972_s27 = sshll.u32 %s371_s21, 5 }
  0x34   : > { %s2991_s15 = sshll.u32 %s3482_s12, 5  ;;  %s375_s29 = scalar_lea.vmem [#allocation3], %s2972_s27 }
  0x35   : > { %s380_s28 = scalar_lea.hbm %s4078_s0, %s2991_s15  ;;  %s383_s13 = sshll.u32 %s375_s29, 4  ;;  %s384_s13 = int_to_ptr.vmem [resolvable:$true] %s383_s13 }
  0x36   : > { %s381_s1 = sshll.u32 %s380_s28, 4  ;;  %p3673_p7 = pnand %p3070_p2, %p3646_p11  ;;  %s382_s1 = int_to_ptr.hbm [resolvable:$true] %s381_s1 }
  0x37   : > { %s372_s26 = scalar_lea.sflag [#allocation4], %s371_s21  ;;  %s3370_s2 = sshra.s32 %s382_s1, 4  ;;  %s3371_s2 = int_to_ptr.hbm [resolvable:$true] %s3370_s2 }
  0x38   : > { %s3372_s4 = scalar_lea.hbm %s3371_s2, 32  ;;  %p3374_p9 = pneg %p3673_p7 }
  0x39   : > { %p3373_p8 = scmp.ne.s32.totalorder %s3371_s2, %s3372_s4  ;;  %s3377_s19 = scalar_lea.hbm %s4078_s0, 64 }
  0x3a   : > { %p3378_p11 = scmp.lt.s32.totalorder %s3371_s2, %s4078_s0  ;;  %p3379_p0 = scmp.lt.s32.totalorder %s3377_s19, %s3372_s4 }
  0x3b   : > { %p3375_p10 = pnand %p3374_p9, %p3373_p8 }
  0x3c   : > { %p3380_p2 = por %p3379_p0, %p3378_p11 }
  0x3d   : > { %p3376_p13 = pneg %p3375_p10 }
  0x3f   : > { %p3381_p5 = pnand %p3380_p2, %p3376_p13 }
  0x41   : > { %3384 = shalt.err (!%p3381_p5)
}
  0x42   : > { %s3498_s21 = smov 256   ;;  %s3499_s28 = smov 16  }
  0x43   : > { %3057 = dma.hbm_to_vmem [thread:$0]  (!%p3673_p7), %s382_s1, 512, %s384_s13, %s372_s26, %s3498_s21, %s3498_s21, %s3499_s28  }
  0x44   : > { %395 = sbr.rel (%p3581_p3) target bundleno = 813 (0x32d), region = 56  ;;  %s3690_s29 = sand.u32 (!%p3581_p3), 1, %s3474_s10  }
  0x45   : > { %s2976_s27 = sshll.u32 (!%p3581_p3), %s3690_s29, 5  ;;  %s398_s2 = scalar_lea.sflag (!%p3581_p3), [#allocation4], %s3690_s29 }
  0x46   : > { %s3694_s4 = scalar_lea.vmem (!%p3581_p3), [#allocation3], %s2976_s27 }
  0x49   : > { %3445 = dma.done.wait (%p3652_p12), %s398_s2, 512  }
  0x4a   : > { %3447 = vsyncadd (%p3652_p12), %s398_s2, 4294966784 }
  0x4b   : > { %3449 = dma.done.wait (%p50_p1), [#allocation7], 24608  }
  0x4c   : > { %3451 = vsyncadd (%p50_p1), [#allocation7], 4294942688 }
  0x4d   : > { %3453 = dma.done.wait (%p50_p1), [#allocation10], 24608  }
  0x4e   : > { %3455 = vsyncadd (%p50_p1), [#allocation10], 4294942688 }
  0x4f   : > { %3457 = dma.done.wait (%p50_p1), [#allocation13], 40992  }
  0x50   : > { %3459 = vsyncadd (%p50_p1), [#allocation13], 4294926304 }
  0x51   : > { %3461 = dma.done.wait (%p50_p1), [#allocation16], 16448  }
  0x52   : > { %3463 = vsyncadd (%p50_p1), [#allocation16], 4294950848  ;;  %v571_v0 = vld [vmem:[#allocation6 + $0x2d0] sm:$0xff]  ;;  %v572_v2 = vld [vmem:[#allocation6 + $0x2d8] sm:$0xff]  ;;  %vm1445_vm0 = vcmask 1040384   ;;  %vm1474_vm1 = vcmask 1041408  }
  0x53   : > { %v667_v1 = vld [vmem:[#allocation6 + $0x5d0] sm:$0xff]  ;;  %673 = vmatpush.msra.mxu0 %v571_v0  ;;  %v668_v3 = vld [vmem:[#allocation6 + $0x5d8] sm:$0xff]  ;;  %v565_v4 = vld [vmem:[#allocation6 + $0x2a0] sm:$0xff]  ;;  %719 = vmatpush.msra.mxu2 %v572_v2  ;;  %vm1849_vm2 = vcmask 1046528   ;;  %s2985_s17 = sshll.u32 %s3690_s29, 6  ;;  %s2992_s13 = sshll.u32 %s3576_s16, 6 }
  0x54   : > { %696 = vmatpush.msra.mxu1 %v667_v1  ;;  %v661_v5 = vld [vmem:[#allocation6 + $0x5a0] sm:$0xff]  ;;  %742 = vmatpush.msra.mxu3 %v668_v3  ;;  %v566_v6 = vld [vmem:[#allocation6 + $0x2a8] sm:$0xff]  ;;  %v559_v8 = vld [vmem:[#allocation6 + $0x270] sm:$0xff]  ;;  %s4023_s23 = scalar_lea.vmem [#allocation18], %s2985_s17  ;;  %s2808_s26 = scalar_lea.hbm %s4087_s9, %s2992_s13 }
  0x55   : > { %v662_v7 = vld [vmem:[#allocation6 + $0x5a8] sm:$0xff]  ;;  %674 = vmatpush.msra.mxu0 %v565_v4  ;;  %v655_v9 = vld [vmem:[#allocation6 + $0x570] sm:$0xff]  ;;  %v560_v10 = vld [vmem:[#allocation6 + $0x278] sm:$0xff]  ;;  %720 = vmatpush.msra.mxu2 %v566_v6  ;;  %s2809_s16 = sshll.u32 %s4023_s23, 4  ;;  %s2811_s15 = sshll.u32 %s2808_s26, 4  ;;  %s2810_s16 = int_to_ptr.vmem [resolvable:$true] %s2809_s16  ;;  %s2812_s15 = int_to_ptr.hbm [resolvable:$true] %s2811_s15 }
  0x56   : > { %697 = vmatpush.msra.mxu1 %v661_v5  ;;  %v656_v11 = vld [vmem:[#allocation6 + $0x578] sm:$0xff]  ;;  %743 = vmatpush.msra.mxu3 %v662_v7  ;;  %v553_v12 = vld [vmem:[#allocation6 + $0x240] sm:$0xff]  ;;  %v554_v14 = vld [vmem:[#allocation6 + $0x248] sm:$0xff]  ;;  %s2797_s19 = scalar_lea.sflag [#allocation5], %s3690_s29  ;;  %s3414_s22 = sshra.s32 %s2812_s15, 4  ;;  %s3415_s22 = int_to_ptr.hbm [resolvable:$true] %s3414_s22 }
  0x57   : > { %v649_v13 = vld [vmem:[#allocation6 + $0x540] sm:$0xff]  ;;  %675 = vmatpush.msra.mxu0 %v559_v8  ;;  %v650_v15 = vld [vmem:[#allocation6 + $0x548] sm:$0xff]  ;;  %721 = vmatpush.msra.mxu2 %v560_v10  ;;  %v547_v16 = vld [vmem:[#allocation6 + $0x210] sm:$0xff]  ;;  %s3416_s3 = scalar_lea.hbm %s3415_s22, 64  ;;  %s3420_s27 = scalar_lea.hbm %s4087_s9, 128 }
  0x58   : > { %698 = vmatpush.msra.mxu1 %v655_v9  ;;  %744 = vmatpush.msra.mxu3 %v656_v11  ;;  %v643_v17 = vld [vmem:[#allocation6 + $0x510] sm:$0xff]  ;;  %v548_v18 = vld [vmem:[#allocation6 + $0x218] sm:$0xff]  ;;  %v541_v20 = vld [vmem:[#allocation6 + $0x1e0] sm:$0xff]  ;;  %p3417_p1 = scmp.ne.s32.totalorder %s3415_s22, %s3416_s3  ;;  %p3421_p12 = scmp.lt.s32.totalorder %s3415_s22, %s4087_s9 }
  0x59   : > { %676 = vmatpush.msra.mxu0 %v553_v12  ;;  %v644_v19 = vld [vmem:[#allocation6 + $0x518] sm:$0xff]  ;;  %722 = vmatpush.msra.mxu2 %v554_v14  ;;  %v637_v21 = vld [vmem:[#allocation6 + $0x4e0] sm:$0xff]  ;;  %v542_v22 = vld [vmem:[#allocation6 + $0x1e8] sm:$0xff]  ;;  %p3422_p7 = scmp.lt.s32.totalorder %s3420_s27, %s3416_s3 }
  0x5a   : > { %699 = vmatpush.msra.mxu1 %v649_v13  ;;  %745 = vmatpush.msra.mxu3 %v650_v15  ;;  %v638_v23 = vld [vmem:[#allocation6 + $0x4e8] sm:$0xff]  ;;  %v535_v24 = vld [vmem:[#allocation6 + $0x1b0] sm:$0xff]  ;;  %v536_v26 = vld [vmem:[#allocation6 + $0x1b8] sm:$0xff]  ;;  %p3418_p3 = pnand %p3417_p1, %p3659_p4 }
  0x5b   : > { %677 = vmatpush.msra.mxu0 %v547_v16  ;;  %723 = vmatpush.msra.mxu2 %v548_v18  ;;  %v631_v25 = vld [vmem:[#allocation6 + $0x4b0] sm:$0xff]  ;;  %v632_v27 = vld [vmem:[#allocation6 + $0x4b8] sm:$0xff]  ;;  %v529_v28 = vld [vmem:[#allocation6 + $0x180] sm:$0xff]  ;;  %p3423_p8 = por %p3422_p7, %p3421_p12 }
  0x5c   : > { %700 = vmatpush.msra.mxu1 %v643_v17  ;;  %746 = vmatpush.msra.mxu3 %v644_v19  ;;  %v625_v29 = vld [vmem:[#allocation6 + $0x480] sm:$0xff]  ;;  %v530_v30 = vld [vmem:[#allocation6 + $0x188] sm:$0xff]  ;;  %v523_v32 = vld [vmem:[#allocation6 + $0x150] sm:$0xff]  ;;  %p3419_p5 = pneg %p3418_p3 }
  0x5d   : > { %678 = vmatpush.msra.mxu0 %v541_v20  ;;  %724 = vmatpush.msra.mxu2 %v542_v22  ;;  %v626_v31 = vld [vmem:[#allocation6 + $0x488] sm:$0xff]  ;;  %v619_v33 = vld [vmem:[#allocation6 + $0x450] sm:$0xff]  ;;  %v524_v34 = vld [vmem:[#allocation6 + $0x158] sm:$0xff] }
  0x5e   : > { %701 = vmatpush.msra.mxu1 %v637_v21  ;;  %747 = vmatpush.msra.mxu3 %v638_v23  ;;  %v620_v35 = vld [vmem:[#allocation6 + $0x458] sm:$0xff]  ;;  %v517_v36 = vld [vmem:[#allocation6 + $0x120] sm:$0xff]  ;;  %v518_v38 = vld [vmem:[#allocation6 + $0x128] sm:$0xff]  ;;  %p3424_p9 = pnand %p3423_p8, %p3419_p5 }
  0x5f   : > { %679 = vmatpush.msra.mxu0 %v535_v24  ;;  %725 = vmatpush.msra.mxu2 %v536_v26  ;;  %v613_v37 = vld [vmem:[#allocation6 + $0x420] sm:$0xff]  ;;  %v614_v39 = vld [vmem:[#allocation6 + $0x428] sm:$0xff]  ;;  %v511_v40 = vld [vmem:[#allocation6 + $0xf0] sm:$0xff] }
  0x60   : > { %702 = vmatpush.msra.mxu1 %v631_v25  ;;  %748 = vmatpush.msra.mxu3 %v632_v27  ;;  %v607_v41 = vld [vmem:[#allocation6 + $0x3f0] sm:$0xff]  ;;  %v512_v42 = vld [vmem:[#allocation6 + $0xf8] sm:$0xff]  ;;  %v505_v44 = vld [vmem:[#allocation6 + $0xc0] sm:$0xff] }
  0x61   : > { %680 = vmatpush.msra.mxu0 %v529_v28  ;;  %726 = vmatpush.msra.mxu2 %v530_v30  ;;  %v608_v43 = vld [vmem:[#allocation6 + $0x3f8] sm:$0xff]  ;;  %v601_v45 = vld [vmem:[#allocation6 + $0x3c0] sm:$0xff]  ;;  %v506_v46 = vld [vmem:[#allocation6 + $0xc8] sm:$0xff] }
  0x62   : > { %703 = vmatpush.msra.mxu1 %v625_v29  ;;  %749 = vmatpush.msra.mxu3 %v626_v31  ;;  %v602_v47 = vld [vmem:[#allocation6 + $0x3c8] sm:$0xff]  ;;  %v499_v48 = vld [vmem:[#allocation6 + $0x90] sm:$0xff]  ;;  %v500_v50 = vld [vmem:[#allocation6 + $0x98] sm:$0xff] }
  0x63   : > { %681 = vmatpush.msra.mxu0 %v523_v32  ;;  %727 = vmatpush.msra.mxu2 %v524_v34  ;;  %v595_v49 = vld [vmem:[#allocation6 + $0x390] sm:$0xff]  ;;  %v596_v51 = vld [vmem:[#allocation6 + $0x398] sm:$0xff]  ;;  %v493_v52 = vld [vmem:[#allocation6 + $0x60] sm:$0xff] }
  0x64   : > { %704 = vmatpush.msra.mxu1 %v619_v33  ;;  %750 = vmatpush.msra.mxu3 %v620_v35  ;;  %v589_v53 = vld [vmem:[#allocation6 + $0x360] sm:$0xff]  ;;  %v494_v54 = vld [vmem:[#allocation6 + $0x68] sm:$0xff]  ;;  %v487_v56 = vld [vmem:[#allocation6 + $0x30] sm:$0xff] }
  0x65   : > { %682 = vmatpush.msra.mxu0 %v517_v36  ;;  %728 = vmatpush.msra.mxu2 %v518_v38  ;;  %v590_v55 = vld [vmem:[#allocation6 + $0x368] sm:$0xff]  ;;  %v583_v57 = vld [vmem:[#allocation6 + $0x330] sm:$0xff]  ;;  %v488_v58 = vld [vmem:[#allocation6 + $0x38] sm:$0xff] }
  0x66   : > { %705 = vmatpush.msra.mxu1 %v613_v37  ;;  %751 = vmatpush.msra.mxu3 %v614_v39  ;;  %v584_v59 = vld [vmem:[#allocation6 + $0x338] sm:$0xff]  ;;  %v481_v60 = vld [vmem:[#allocation6] sm:$0xff]  ;;  %v482_v62 = vld [vmem:[#allocation6 + $0x8] sm:$0xff] }
  0x67   : > { %683 = vmatpush.msra.mxu0 %v511_v40  ;;  %729 = vmatpush.msra.mxu2 %v512_v42  ;;  %v577_v61 = vld [vmem:[#allocation6 + $0x300] sm:$0xff]  ;;  %v578_v63 = vld [vmem:[#allocation6 + $0x308] sm:$0xff]  ;;  %v567_v6 = vld [vmem:[#allocation6 + $0x2b0] sm:$0xff] }
  0x68   : > { %706 = vmatpush.msra.mxu1 %v607_v41  ;;  %752 = vmatpush.msra.mxu3 %v608_v43  ;;  %v3717_v0 = vld [vmem:[%s3694_s4] sm:$0xff]  ;;  %v3720_v1 = vld [vmem:[%s3694_s4 + $0x8] sm:$0xff]  ;;  %v568_v7 = vld [vmem:[#allocation6 + $0x2b8] sm:$0xff] }
  0x69   : > { %684 = vmatpush.msra.mxu0 %v505_v44  ;;  %730 = vmatpush.msra.mxu2 %v506_v46  ;;  %v573_v2 = vld [vmem:[#allocation6 + $0x2e0] sm:$0xff]  ;;  %v574_v3 = vld [vmem:[#allocation6 + $0x2e8] sm:$0xff]  ;;  %v663_v8 = vld [vmem:[#allocation6 + $0x5b0] sm:$0xff] }
  0x6a   : > { %707 = vmatpush.msra.mxu1 %v601_v45  ;;  %753 = vmatpush.msra.mxu3 %v602_v47  ;;  %v669_v4 = vld [vmem:[#allocation6 + $0x5e0] sm:$0xff]  ;;  %v670_v5 = vld [vmem:[#allocation6 + $0x5e8] sm:$0xff]  ;;  %v664_v9 = vld [vmem:[#allocation6 + $0x5b8] sm:$0xff] }
  0x6b   : > { %685 = vmatpush.msra.mxu0 %v499_v48  ;;  %731 = vmatpush.msra.mxu2 %v500_v50  ;;  %v561_v10 = vld [vmem:[#allocation6 + $0x280] sm:$0xff]  ;;  %v562_v11 = vld [vmem:[#allocation6 + $0x288] sm:$0xff]  ;;  %v3727_v14 = vld [vmem:[%s3694_s4 + $0x10] sm:$0xff] }
  0x6c   : > { %708 = vmatpush.msra.mxu1 %v595_v49  ;;  %754 = vmatpush.msra.mxu3 %v596_v51  ;;  %v657_v12 = vld [vmem:[#allocation6 + $0x580] sm:$0xff]  ;;  %v658_v13 = vld [vmem:[#allocation6 + $0x588] sm:$0xff]  ;;  %v3730_v15 = vld [vmem:[%s3694_s4 + $0x18] sm:$0xff] }
  0x6d   : > { %686 = vmatpush.msra.mxu0 %v493_v52  ;;  %732 = vmatpush.msra.mxu2 %v494_v54  ;;  %v555_v16 = vld [vmem:[#allocation6 + $0x250] sm:$0xff]  ;;  %v556_v17 = vld [vmem:[#allocation6 + $0x258] sm:$0xff]  ;;  %v549_v20 = vld [vmem:[#allocation6 + $0x220] sm:$0xff] }
  0x6e   : > { %709 = vmatpush.msra.mxu1 %v589_v53  ;;  %755 = vmatpush.msra.mxu3 %v590_v55  ;;  %v651_v18 = vld [vmem:[#allocation6 + $0x550] sm:$0xff]  ;;  %v652_v19 = vld [vmem:[#allocation6 + $0x558] sm:$0xff]  ;;  %v550_v21 = vld [vmem:[#allocation6 + $0x228] sm:$0xff] }
  0x6f   : > { %687 = vmatpush.msra.mxu0 %v487_v56  ;;  %733 = vmatpush.msra.mxu2 %v488_v58  ;;  %v645_v22 = vld [vmem:[#allocation6 + $0x520] sm:$0xff]  ;;  %v646_v23 = vld [vmem:[#allocation6 + $0x528] sm:$0xff]  ;;  %v543_v24 = vld [vmem:[#allocation6 + $0x1f0] sm:$0xff] }
  0x70   : > { %710 = vmatpush.msra.mxu1 %v583_v57  ;;  %756 = vmatpush.msra.mxu3 %v584_v59  ;;  %v544_v25 = vld [vmem:[#allocation6 + $0x1f8] sm:$0xff]  ;;  %v639_v26 = vld [vmem:[#allocation6 + $0x4f0] sm:$0xff]  ;;  %v537_v28 = vld [vmem:[#allocation6 + $0x1c0] sm:$0xff] }
  0x71   : > { %688 = vmatpush.msra.mxu0 %v481_v60  ;;  %734 = vmatpush.msra.mxu2 %v482_v62  ;;  %v640_v27 = vld [vmem:[#allocation6 + $0x4f8] sm:$0xff]  ;;  %v538_v29 = vld [vmem:[#allocation6 + $0x1c8] sm:$0xff]  ;;  %v633_v30 = vld [vmem:[#allocation6 + $0x4c0] sm:$0xff] }
  0x72   : > { %711 = vmatpush.msra.mxu1 %v577_v61  ;;  %757 = vmatpush.msra.mxu3 %v578_v63  ;;  %v634_v31 = vld [vmem:[#allocation6 + $0x4c8] sm:$0xff]  ;;  %v531_v32 = vld [vmem:[#allocation6 + $0x190] sm:$0xff]  ;;  %v532_v33 = vld [vmem:[#allocation6 + $0x198] sm:$0xff] }
  0x73   : > { %689 = vmatmul.f32.vlgmr.msra.gmra.mxu0 %v3717_v0  ;;  %712 = vmatmul.f32.vlgmr.msra.gmra.mxu1 %v3720_v1  ;;  %v627_v34 = vld [vmem:[#allocation6 + $0x490] sm:$0xff]  ;;  %v628_v35 = vld [vmem:[#allocation6 + $0x498] sm:$0xff]  ;;  %v525_v36 = vld [vmem:[#allocation6 + $0x160] sm:$0xff] }
  0x74   : > { %735 = vmatmul.f32.vlgmr.msra.gmra.mxu2 %v3717_v0  ;;  %758 = vmatmul.f32.vlgmr.msra.gmra.mxu3 %v3720_v1  ;;  %v526_v37 = vld [vmem:[#allocation6 + $0x168] sm:$0xff]  ;;  %v621_v38 = vld [vmem:[#allocation6 + $0x460] sm:$0xff]  ;;  %v519_v40 = vld [vmem:[#allocation6 + $0x130] sm:$0xff] }
  0x75   : > { %765 = vmatpush.msrb.mxu0 %v573_v2  ;;  %811 = vmatpush.msrb.mxu2 %v574_v3  ;;  %v622_v39 = vld [vmem:[#allocation6 + $0x468] sm:$0xff]  ;;  %v520_v41 = vld [vmem:[#allocation6 + $0x138] sm:$0xff]  ;;  %v615_v42 = vld [vmem:[#allocation6 + $0x430] sm:$0xff] }
  0x76   : > { %788 = vmatpush.msrb.mxu1 %v669_v4  ;;  %834 = vmatpush.msrb.mxu3 %v670_v5  ;;  %v616_v43 = vld [vmem:[#allocation6 + $0x438] sm:$0xff]  ;;  %v513_v44 = vld [vmem:[#allocation6 + $0x100] sm:$0xff]  ;;  %v514_v45 = vld [vmem:[#allocation6 + $0x108] sm:$0xff] }
  0x77   : > { %766 = vmatpush.msrb.mxu0 %v567_v6  ;;  %812 = vmatpush.msrb.mxu2 %v568_v7  ;;  %v609_v46 = vld [vmem:[#allocation6 + $0x400] sm:$0xff]  ;;  %v610_v47 = vld [vmem:[#allocation6 + $0x408] sm:$0xff]  ;;  %v507_v48 = vld [vmem:[#allocation6 + $0xd0] sm:$0xff] }
  0x78   : > { %789 = vmatpush.msrb.mxu1 %v663_v8  ;;  %835 = vmatpush.msrb.mxu3 %v664_v9  ;;  %v508_v49 = vld [vmem:[#allocation6 + $0xd8] sm:$0xff]  ;;  %v603_v50 = vld [vmem:[#allocation6 + $0x3d0] sm:$0xff]  ;;  %v501_v52 = vld [vmem:[#allocation6 + $0xa0] sm:$0xff] }
  0x79   : > { %767 = vmatpush.msrb.mxu0 %v561_v10  ;;  %813 = vmatpush.msrb.mxu2 %v562_v11  ;;  %v604_v51 = vld [vmem:[#allocation6 + $0x3d8] sm:$0xff]  ;;  %v502_v53 = vld [vmem:[#allocation6 + $0xa8] sm:$0xff]  ;;  %v597_v54 = vld [vmem:[#allocation6 + $0x3a0] sm:$0xff] }
  0x7a   : > { %790 = vmatpush.msrb.mxu1 %v657_v12  ;;  %836 = vmatpush.msrb.mxu3 %v658_v13  ;;  %v598_v55 = vld [vmem:[#allocation6 + $0x3a8] sm:$0xff]  ;;  %v495_v56 = vld [vmem:[#allocation6 + $0x70] sm:$0xff]  ;;  %v496_v57 = vld [vmem:[#allocation6 + $0x78] sm:$0xff] }
  0x7b   : > { %692 = vmatmul.f32.gmra.mxu0 %v3727_v14  ;;  %715 = vmatmul.f32.gmra.mxu1 %v3730_v15  ;;  %v591_v58 = vld [vmem:[#allocation6 + $0x370] sm:$0xff]  ;;  %v592_v59 = vld [vmem:[#allocation6 + $0x378] sm:$0xff]  ;;  %v489_v60 = vld [vmem:[#allocation6 + $0x40] sm:$0xff] }
  0x7c   : > { %738 = vmatmul.f32.gmra.mxu2 %v3727_v14  ;;  %761 = vmatmul.f32.gmra.mxu3 %v3730_v15  ;;  %v490_v61 = vld [vmem:[#allocation6 + $0x48] sm:$0xff]  ;;  %v585_v62 = vld [vmem:[#allocation6 + $0x340] sm:$0xff]  ;;  %v483_v2 = vld [vmem:[#allocation6 + $0x10] sm:$0xff] }
  0x7d   : > { %768 = vmatpush.msrb.mxu0 %v555_v16  ;;  %814 = vmatpush.msrb.mxu2 %v556_v17  ;;  %v586_v63 = vld [vmem:[#allocation6 + $0x348] sm:$0xff]  ;;  %v484_v3 = vld [vmem:[#allocation6 + $0x18] sm:$0xff]  ;;  %v575_v4 = vld [vmem:[#allocation6 + $0x2f0] sm:$0xff] }
  0x7e   : > { %791 = vmatpush.msrb.mxu1 %v651_v18  ;;  %837 = vmatpush.msrb.mxu3 %v652_v19  ;;  %v576_v5 = vld [vmem:[#allocation6 + $0x2f8] sm:$0xff]  ;;  %v579_v6 = vld [vmem:[#allocation6 + $0x310] sm:$0xff]  ;;  %v569_v8 = vld [vmem:[#allocation6 + $0x2c0] sm:$0xff] }
  0x7f   : > { %769 = vmatpush.msrb.mxu0 %v549_v20  ;;  %815 = vmatpush.msrb.mxu2 %v550_v21  ;;  %v580_v7 = vld [vmem:[#allocation6 + $0x318] sm:$0xff]  ;;  %v570_v9 = vld [vmem:[#allocation6 + $0x2c8] sm:$0xff]  ;;  %v671_v10 = vld [vmem:[#allocation6 + $0x5f0] sm:$0xff] }
  0x80   : > { %792 = vmatpush.msrb.mxu1 %v645_v22  ;;  %838 = vmatpush.msrb.mxu3 %v646_v23  ;;  %v672_v11 = vld [vmem:[#allocation6 + $0x5f8] sm:$0xff]  ;;  %v563_v12 = vld [vmem:[#allocation6 + $0x290] sm:$0xff]  ;;  %v665_v16 = vld [vmem:[#allocation6 + $0x5c0] sm:$0xff] }
  0x81   : > { %770 = vmatpush.msrb.mxu0 %v543_v24  ;;  %816 = vmatpush.msrb.mxu2 %v544_v25  ;;  %v564_v13 = vld [vmem:[#allocation6 + $0x298] sm:$0xff]  ;;  %v666_v17 = vld [vmem:[#allocation6 + $0x5c8] sm:$0xff]  ;;  %v557_v18 = vld [vmem:[#allocation6 + $0x260] sm:$0xff] }
  0x82   : > { %793 = vmatpush.msrb.mxu1 %v639_v26  ;;  %839 = vmatpush.msrb.mxu3 %v640_v27  ;;  %v558_v19 = vld [vmem:[#allocation6 + $0x268] sm:$0xff]  ;;  %v659_v20 = vld [vmem:[#allocation6 + $0x590] sm:$0xff]  ;;  %v660_v21 = vld [vmem:[#allocation6 + $0x598] sm:$0xff] }
  0x83   : > { %771 = vmatpush.msrb.mxu0 %v537_v28  ;;  %817 = vmatpush.msrb.mxu2 %v538_v29  ;;  %v551_v22 = vld [vmem:[#allocation6 + $0x230] sm:$0xff]  ;;  %v552_v23 = vld [vmem:[#allocation6 + $0x238] sm:$0xff]  ;;  %v653_v24 = vld [vmem:[#allocation6 + $0x560] sm:$0xff] }
  0x84   : > { %794 = vmatpush.msrb.mxu1 %v633_v30  ;;  %840 = vmatpush.msrb.mxu3 %v634_v31  ;;  %v654_v25 = vld [vmem:[#allocation6 + $0x568] sm:$0xff]  ;;  %v545_v26 = vld [vmem:[#allocation6 + $0x200] sm:$0xff]  ;;  %v647_v28 = vld [vmem:[#allocation6 + $0x530] sm:$0xff] }
  0x85   : > { %772 = vmatpush.msrb.mxu0 %v531_v32  ;;  %818 = vmatpush.msrb.mxu2 %v532_v33  ;;  %v546_v27 = vld [vmem:[#allocation6 + $0x208] sm:$0xff]  ;;  %v648_v29 = vld [vmem:[#allocation6 + $0x538] sm:$0xff]  ;;  %v539_v30 = vld [vmem:[#allocation6 + $0x1d0] sm:$0xff] }
  0x86   : > { %795 = vmatpush.msrb.mxu1 %v627_v34  ;;  %841 = vmatpush.msrb.mxu3 %v628_v35  ;;  %v540_v31 = vld [vmem:[#allocation6 + $0x1d8] sm:$0xff]  ;;  %v641_v32 = vld [vmem:[#allocation6 + $0x500] sm:$0xff]  ;;  %v642_v33 = vld [vmem:[#allocation6 + $0x508] sm:$0xff] }
  0x87   : > { %773 = vmatpush.msrb.mxu0 %v525_v36  ;;  %819 = vmatpush.msrb.mxu2 %v526_v37  ;;  %v533_v34 = vld [vmem:[#allocation6 + $0x1a0] sm:$0xff]  ;;  %v534_v35 = vld [vmem:[#allocation6 + $0x1a8] sm:$0xff]  ;;  %v635_v36 = vld [vmem:[#allocation6 + $0x4d0] sm:$0xff] }
  0x88   : > { %796 = vmatpush.msrb.mxu1 %v621_v38  ;;  %842 = vmatpush.msrb.mxu3 %v622_v39  ;;  %v636_v37 = vld [vmem:[#allocation6 + $0x4d8] sm:$0xff]  ;;  %v527_v38 = vld [vmem:[#allocation6 + $0x170] sm:$0xff] }
  0x89   : > { %774 = vmatpush.msrb.mxu0 %v519_v40  ;;  %820 = vmatpush.msrb.mxu2 %v520_v41  ;;  %v528_v39 = vld [vmem:[#allocation6 + $0x178] sm:$0xff]  ;;  %v629_v40 = vld [vmem:[#allocation6 + $0x4a0] sm:$0xff]  ;;  %v630_v41 = vld [vmem:[#allocation6 + $0x4a8] sm:$0xff] }
  0x8a   : > { %797 = vmatpush.msrb.mxu1 %v615_v42  ;;  %843 = vmatpush.msrb.mxu3 %v616_v43  ;;  %v521_v42 = vld [vmem:[#allocation6 + $0x140] sm:$0xff]  ;;  %v522_v43 = vld [vmem:[#allocation6 + $0x148] sm:$0xff] }
  0x8b   : > { %775 = vmatpush.msrb.mxu0 %v513_v44  ;;  %821 = vmatpush.msrb.mxu2 %v514_v45  ;;  %v623_v44 = vld [vmem:[#allocation6 + $0x470] sm:$0xff]  ;;  %v624_v45 = vld [vmem:[#allocation6 + $0x478] sm:$0xff] }
  0x8c   : > { %798 = vmatpush.msrb.mxu1 %v609_v46  ;;  %844 = vmatpush.msrb.mxu3 %v610_v47  ;;  %v515_v46 = vld [vmem:[#allocation6 + $0x110] sm:$0xff]  ;;  %v516_v47 = vld [vmem:[#allocation6 + $0x118] sm:$0xff] }
  0x8d   : > { %776 = vmatpush.msrb.mxu0 %v507_v48  ;;  %822 = vmatpush.msrb.mxu2 %v508_v49  ;;  %v617_v48 = vld [vmem:[#allocation6 + $0x440] sm:$0xff]  ;;  %v618_v49 = vld [vmem:[#allocation6 + $0x448] sm:$0xff] }
  0x8e   : > { %799 = vmatpush.msrb.mxu1 %v603_v50  ;;  %845 = vmatpush.msrb.mxu3 %v604_v51  ;;  %v509_v50 = vld [vmem:[#allocation6 + $0xe0] sm:$0xff]  ;;  %v510_v51 = vld [vmem:[#allocation6 + $0xe8] sm:$0xff] }
  0x8f   : > { %777 = vmatpush.msrb.mxu0 %v501_v52  ;;  %823 = vmatpush.msrb.mxu2 %v502_v53  ;;  %v611_v52 = vld [vmem:[#allocation6 + $0x410] sm:$0xff]  ;;  %v612_v53 = vld [vmem:[#allocation6 + $0x418] sm:$0xff] }
  0x90   : > { %800 = vmatpush.msrb.mxu1 %v597_v54  ;;  %846 = vmatpush.msrb.mxu3 %v598_v55  ;;  %v503_v54 = vld [vmem:[#allocation6 + $0xb0] sm:$0xff]  ;;  %v504_v55 = vld [vmem:[#allocation6 + $0xb8] sm:$0xff] }
  0x91   : > { %778 = vmatpush.msrb.mxu0 %v495_v56  ;;  %824 = vmatpush.msrb.mxu2 %v496_v57  ;;  %v605_v56 = vld [vmem:[#allocation6 + $0x3e0] sm:$0xff]  ;;  %v606_v57 = vld [vmem:[#allocation6 + $0x3e8] sm:$0xff] }
  0x92   : > { %801 = vmatpush.msrb.mxu1 %v591_v58  ;;  %847 = vmatpush.msrb.mxu3 %v592_v59  ;;  %v497_v58 = vld [vmem:[#allocation6 + $0x80] sm:$0xff]  ;;  %v498_v59 = vld [vmem:[#allocation6 + $0x88] sm:$0xff] }
  0x93   : > { %779 = vmatpush.msrb.mxu0 %v489_v60  ;;  %825 = vmatpush.msrb.mxu2 %v490_v61  ;;  %v599_v60 = vld [vmem:[#allocation6 + $0x3b0] sm:$0xff]  ;;  %v600_v61 = vld [vmem:[#allocation6 + $0x3b8] sm:$0xff] }
  0x94   : > { %802 = vmatpush.msrb.mxu1 %v585_v62  ;;  %848 = vmatpush.msrb.mxu3 %v586_v63  ;;  %v491_v62 = vld [vmem:[#allocation6 + $0x50] sm:$0xff]  ;;  %v492_v63 = vld [vmem:[#allocation6 + $0x58] sm:$0xff] }
  0x95   : > { %780 = vmatpush.msrb.mxu0 %v483_v2  ;;  %826 = vmatpush.msrb.mxu2 %v484_v3  ;;  %v485_v2 = vld [vmem:[#allocation6 + $0x20] sm:$0xff]  ;;  %v486_v3 = vld [vmem:[#allocation6 + $0x28] sm:$0xff] }
  0x96   : > { %803 = vmatpush.msrb.mxu1 %v579_v6  ;;  %849 = vmatpush.msrb.mxu3 %v580_v7  ;;  %v593_v6 = vld [vmem:[#allocation6 + $0x380] sm:$0xff]  ;;  %v594_v7 = vld [vmem:[#allocation6 + $0x388] sm:$0xff] }
  0x97   : > { %857 = vmatpush.msra.mxu0 %v575_v4  ;;  %903 = vmatpush.msra.mxu2 %v576_v5  ;;  %v1053_v4 = vld [vmem:[#allocation9 + $0x2d0] sm:$0xff]  ;;  %v1054_v5 = vld [vmem:[#allocation9 + $0x2d8] sm:$0xff] }
  0x98   : > { %880 = vmatpush.msra.mxu1 %v671_v10  ;;  %926 = vmatpush.msra.mxu3 %v672_v11  ;;  %v587_v10 = vld [vmem:[#allocation6 + $0x350] sm:$0xff]  ;;  %v588_v11 = vld [vmem:[#allocation6 + $0x358] sm:$0xff] }
  0x99   : > { %858 = vmatpush.msra.mxu0 %v569_v8  ;;  %904 = vmatpush.msra.mxu2 %v570_v9  ;;  %v1047_v8 = vld [vmem:[#allocation9 + $0x2a0] sm:$0xff]  ;;  %v1048_v9 = vld [vmem:[#allocation9 + $0x2a8] sm:$0xff] }
  0x9a   : > { %881 = vmatpush.msra.mxu1 %v665_v16  ;;  %927 = vmatpush.msra.mxu3 %v666_v17  ;;  %v581_v16 = vld [vmem:[#allocation6 + $0x320] sm:$0xff]  ;;  %v582_v17 = vld [vmem:[#allocation6 + $0x328] sm:$0xff] }
  0x9b   : > { %859 = vmatpush.msra.mxu0 %v563_v12  ;;  %905 = vmatpush.msra.mxu2 %v564_v13  ;;  %v1041_v12 = vld [vmem:[#allocation9 + $0x270] sm:$0xff]  ;;  %v1042_v13 = vld [vmem:[#allocation9 + $0x278] sm:$0xff] }
  0x9c   : > { %882 = vmatpush.msra.mxu1 %v659_v20  ;;  %928 = vmatpush.msra.mxu3 %v660_v21  ;;  %v1036_v20 = vld [vmem:[#allocation9 + $0x248] sm:$0xff]  ;;  %v1150_v21 = vld [vmem:[#allocation9 + $0x5d8] sm:$0xff] }
  0x9d   : > { %860 = vmatpush.msra.mxu0 %v557_v18  ;;  %906 = vmatpush.msra.mxu2 %v558_v19  ;;  %v1035_v18 = vld [vmem:[#allocation9 + $0x240] sm:$0xff]  ;;  %v1149_v19 = vld [vmem:[#allocation9 + $0x5d0] sm:$0xff] }
  0x9e   : > { %883 = vmatpush.msra.mxu1 %v653_v24  ;;  %929 = vmatpush.msra.mxu3 %v654_v25  ;;  %v1030_v24 = vld [vmem:[#allocation9 + $0x218] sm:$0xff]  ;;  %v1144_v25 = vld [vmem:[#allocation9 + $0x5a8] sm:$0xff] }
  0x9f   : > { %861 = vmatpush.msra.mxu0 %v551_v22  ;;  %907 = vmatpush.msra.mxu2 %v552_v23  ;;  %v1029_v22 = vld [vmem:[#allocation9 + $0x210] sm:$0xff]  ;;  %v1143_v23 = vld [vmem:[#allocation9 + $0x5a0] sm:$0xff] }
  0xa0   : > { %884 = vmatpush.msra.mxu1 %v647_v28  ;;  %930 = vmatpush.msra.mxu3 %v648_v29  ;;  %v1024_v28 = vld [vmem:[#allocation9 + $0x1e8] sm:$0xff]  ;;  %v1138_v29 = vld [vmem:[#allocation9 + $0x578] sm:$0xff] }
  0xa1   : > { %862 = vmatpush.msra.mxu0 %v545_v26  ;;  %908 = vmatpush.msra.mxu2 %v546_v27  ;;  %v1023_v26 = vld [vmem:[#allocation9 + $0x1e0] sm:$0xff]  ;;  %v1137_v27 = vld [vmem:[#allocation9 + $0x570] sm:$0xff] }
  0xa2   : > { %885 = vmatpush.msra.mxu1 %v641_v32  ;;  %931 = vmatpush.msra.mxu3 %v642_v33  ;;  %v1018_v32 = vld [vmem:[#allocation9 + $0x1b8] sm:$0xff]  ;;  %v1132_v33 = vld [vmem:[#allocation9 + $0x548] sm:$0xff] }
  0xa3   : > { %863 = vmatpush.msra.mxu0 %v539_v30  ;;  %909 = vmatpush.msra.mxu2 %v540_v31  ;;  %v1017_v30 = vld [vmem:[#allocation9 + $0x1b0] sm:$0xff]  ;;  %v1131_v31 = vld [vmem:[#allocation9 + $0x540] sm:$0xff] }
  0xa4   : > { %886 = vmatpush.msra.mxu1 %v635_v36  ;;  %932 = vmatpush.msra.mxu3 %v636_v37  ;;  %v1012_v36 = vld [vmem:[#allocation9 + $0x188] sm:$0xff]  ;;  %v1126_v37 = vld [vmem:[#allocation9 + $0x518] sm:$0xff] }
  0xa5   : > { %864 = vmatpush.msra.mxu0 %v533_v34  ;;  %910 = vmatpush.msra.mxu2 %v534_v35  ;;  %v1011_v34 = vld [vmem:[#allocation9 + $0x180] sm:$0xff]  ;;  %v1125_v35 = vld [vmem:[#allocation9 + $0x510] sm:$0xff] }
  0xa6   : > { %887 = vmatpush.msra.mxu1 %v629_v40  ;;  %933 = vmatpush.msra.mxu3 %v630_v41  ;;  %v1006_v40 = vld [vmem:[#allocation9 + $0x158] sm:$0xff]  ;;  %v1120_v41 = vld [vmem:[#allocation9 + $0x4e8] sm:$0xff] }
  0xa7   : > { %865 = vmatpush.msra.mxu0 %v527_v38  ;;  %911 = vmatpush.msra.mxu2 %v528_v39  ;;  %v1005_v38 = vld [vmem:[#allocation9 + $0x150] sm:$0xff]  ;;  %v1119_v39 = vld [vmem:[#allocation9 + $0x4e0] sm:$0xff] }
  0xa8   : > { %888 = vmatpush.msra.mxu1 %v623_v44  ;;  %934 = vmatpush.msra.mxu3 %v624_v45  ;;  %v1000_v44 = vld [vmem:[#allocation9 + $0x128] sm:$0xff]  ;;  %v1114_v45 = vld [vmem:[#allocation9 + $0x4b8] sm:$0xff] }
  0xa9   : > { %866 = vmatpush.msra.mxu0 %v521_v42  ;;  %912 = vmatpush.msra.mxu2 %v522_v43  ;;  %v999_v42 = vld [vmem:[#allocation9 + $0x120] sm:$0xff]  ;;  %v1113_v43 = vld [vmem:[#allocation9 + $0x4b0] sm:$0xff] }
  0xaa   : > { %889 = vmatpush.msra.mxu1 %v617_v48  ;;  %935 = vmatpush.msra.mxu3 %v618_v49  ;;  %v994_v48 = vld [vmem:[#allocation9 + $0xf8] sm:$0xff]  ;;  %v1108_v49 = vld [vmem:[#allocation9 + $0x488] sm:$0xff] }
  0xab   : > { %867 = vmatpush.msra.mxu0 %v515_v46  ;;  %913 = vmatpush.msra.mxu2 %v516_v47  ;;  %v993_v46 = vld [vmem:[#allocation9 + $0xf0] sm:$0xff]  ;;  %v1107_v47 = vld [vmem:[#allocation9 + $0x480] sm:$0xff] }
  0xac   : > { %890 = vmatpush.msra.mxu1 %v611_v52  ;;  %936 = vmatpush.msra.mxu3 %v612_v53  ;;  %v988_v52 = vld [vmem:[#allocation9 + $0xc8] sm:$0xff]  ;;  %v1102_v53 = vld [vmem:[#allocation9 + $0x458] sm:$0xff] }
  0xad   : > { %868 = vmatpush.msra.mxu0 %v509_v50  ;;  %914 = vmatpush.msra.mxu2 %v510_v51  ;;  %v987_v50 = vld [vmem:[#allocation9 + $0xc0] sm:$0xff]  ;;  %v1101_v51 = vld [vmem:[#allocation9 + $0x450] sm:$0xff] }
  0xae   : > { %891 = vmatpush.msra.mxu1 %v605_v56  ;;  %937 = vmatpush.msra.mxu3 %v606_v57  ;;  %v982_v56 = vld [vmem:[#allocation9 + $0x98] sm:$0xff]  ;;  %v1096_v57 = vld [vmem:[#allocation9 + $0x428] sm:$0xff] }
  0xaf   : > { %869 = vmatpush.msra.mxu0 %v503_v54  ;;  %915 = vmatpush.msra.mxu2 %v504_v55  ;;  %v981_v54 = vld [vmem:[#allocation9 + $0x90] sm:$0xff]  ;;  %v1095_v55 = vld [vmem:[#allocation9 + $0x420] sm:$0xff] }
  0xb0   : > { %892 = vmatpush.msra.mxu1 %v599_v60  ;;  %938 = vmatpush.msra.mxu3 %v600_v61  ;;  %v976_v60 = vld [vmem:[#allocation9 + $0x68] sm:$0xff]  ;;  %v1090_v61 = vld [vmem:[#allocation9 + $0x3f8] sm:$0xff] }
  0xb1   : > { %870 = vmatpush.msra.mxu0 %v497_v58  ;;  %916 = vmatpush.msra.mxu2 %v498_v59  ;;  %v975_v58 = vld [vmem:[#allocation9 + $0x60] sm:$0xff]  ;;  %v1089_v59 = vld [vmem:[#allocation9 + $0x3f0] sm:$0xff] }
  0xb2   : > { %781 = vmatmul.f32.vlgmr.msrb.gmra.mxu0 %v3717_v0  ;;  %827 = vmatmul.f32.vlgmr.msrb.gmra.mxu2 %v3717_v0 }
  0xb3   : > { %871 = vmatpush.msra.mxu0 %v491_v62  ;;  %917 = vmatpush.msra.mxu2 %v492_v63  ;;  %v969_v62 = vld [vmem:[#allocation9 + $0x30] sm:$0xff]  ;;  %v1083_v63 = vld [vmem:[#allocation9 + $0x3c0] sm:$0xff] }
  0xb4   : > { %893 = vmatpush.msra.mxu1 %v593_v6  ;;  %939 = vmatpush.msra.mxu3 %v594_v7  ;;  %v964_v6 = vld [vmem:[#allocation9 + $0x8] sm:$0xff]  ;;  %v1078_v7 = vld [vmem:[#allocation9 + $0x398] sm:$0xff] }
  0xb5   : > { %872 = vmatpush.msra.mxu0 %v485_v2  ;;  %918 = vmatpush.msra.mxu2 %v486_v3  ;;  %v970_v2 = vld [vmem:[#allocation9 + $0x38] sm:$0xff]  ;;  %v1084_v3 = vld [vmem:[#allocation9 + $0x3c8] sm:$0xff] }
  0xb6   : > { %894 = vmatpush.msra.mxu1 %v587_v10  ;;  %940 = vmatpush.msra.mxu3 %v588_v11  ;;  %v1071_v10 = vld [vmem:[#allocation9 + $0x360] sm:$0xff]  ;;  %v1072_v11 = vld [vmem:[#allocation9 + $0x368] sm:$0xff] }
  0xb7   : > { %1155 = vmatpush.msrb.mxu0 %v1053_v4  ;;  %1201 = vmatpush.msrb.mxu2 %v1054_v5  ;;  %v963_v4 = vld [vmem:[#allocation9] sm:$0xff]  ;;  %v1077_v5 = vld [vmem:[#allocation9 + $0x390] sm:$0xff] }
  0xb8   : > { %895 = vmatpush.msra.mxu1 %v581_v16  ;;  %941 = vmatpush.msra.mxu3 %v582_v17  ;;  %v1065_v16 = vld [vmem:[#allocation9 + $0x330] sm:$0xff]  ;;  %v1066_v17 = vld [vmem:[#allocation9 + $0x338] sm:$0xff] }
  0xb9   : > { %1156 = vmatpush.msrb.mxu0 %v1047_v8  ;;  %1202 = vmatpush.msrb.mxu2 %v1048_v9  ;;  %v1055_v8 = vld [vmem:[#allocation9 + $0x2e0] sm:$0xff]  ;;  %v1056_v9 = vld [vmem:[#allocation9 + $0x2e8] sm:$0xff] }
  0xba   : > { %804 = vmatmul.f32.vlgmr.msrb.gmra.mxu1 %v3720_v1  ;;  %850 = vmatmul.f32.vlgmr.msrb.gmra.mxu3 %v3720_v1 }
  0xbb   : > { %1157 = vmatpush.msrb.mxu0 %v1041_v12  ;;  %1203 = vmatpush.msrb.mxu2 %v1042_v13  ;;  %v1049_v12 = vld [vmem:[#allocation9 + $0x2b0] sm:$0xff]  ;;  %v1050_v13 = vld [vmem:[#allocation9 + $0x2b8] sm:$0xff] }
  0xbc   : > { %1178 = vmatpush.msrb.mxu1 %v1149_v19  ;;  %1224 = vmatpush.msrb.mxu3 %v1150_v21  ;;  %v1044_v19 = vld [vmem:[#allocation9 + $0x288] sm:$0xff] }
  0xbd   : > { %1158 = vmatpush.msrb.mxu0 %v1035_v18  ;;  %1204 = vmatpush.msrb.mxu2 %v1036_v20  ;;  %v1043_v18 = vld [vmem:[#allocation9 + $0x280] sm:$0xff]  ;;  %v1060_v21 = vld [vmem:[#allocation9 + $0x308] sm:$0xff] }
  0xbe   : > { %1179 = vmatpush.msrb.mxu1 %v1143_v23  ;;  %1225 = vmatpush.msrb.mxu3 %v1144_v25  ;;  %v1059_v20 = vld [vmem:[#allocation9 + $0x300] sm:$0xff]  ;;  %v1038_v23 = vld [vmem:[#allocation9 + $0x258] sm:$0xff] }
  0xbf   : > { %1159 = vmatpush.msrb.mxu0 %v1029_v22  ;;  %1205 = vmatpush.msrb.mxu2 %v1030_v24  ;;  %v1037_v22 = vld [vmem:[#allocation9 + $0x250] sm:$0xff]  ;;  %v1152_v24 = vld [vmem:[#allocation9 + $0x5e8] sm:$0xff]  ;;  %v1031_v25 = vld [vmem:[#allocation9 + $0x220] sm:$0xff] }
  0xc0   : > { %1180 = vmatpush.msrb.mxu1 %v1137_v27  ;;  %1226 = vmatpush.msrb.mxu3 %v1138_v29  ;;  %v1032_v27 = vld [vmem:[#allocation9 + $0x228] sm:$0xff]  ;;  %v1025_v29 = vld [vmem:[#allocation9 + $0x1f0] sm:$0xff] }
  0xc1   : > { %1160 = vmatpush.msrb.mxu0 %v1023_v26  ;;  %1206 = vmatpush.msrb.mxu2 %v1024_v28  ;;  %v1145_v26 = vld [vmem:[#allocation9 + $0x5b0] sm:$0xff]  ;;  %v1146_v28 = vld [vmem:[#allocation9 + $0x5b8] sm:$0xff] }
  0xc2   : > { %1181 = vmatpush.msrb.mxu1 %v1131_v31  ;;  %1227 = vmatpush.msrb.mxu3 %v1132_v33  ;;  %v1026_v31 = vld [vmem:[#allocation9 + $0x1f8] sm:$0xff]  ;;  %v1019_v33 = vld [vmem:[#allocation9 + $0x1c0] sm:$0xff] }
  0xc3   : > { %1161 = vmatpush.msrb.mxu0 %v1017_v30  ;;  %1207 = vmatpush.msrb.mxu2 %v1018_v32  ;;  %v1139_v30 = vld [vmem:[#allocation9 + $0x580] sm:$0xff]  ;;  %v1140_v32 = vld [vmem:[#allocation9 + $0x588] sm:$0xff] }
  0xc4   : > { %1182 = vmatpush.msrb.mxu1 %v1125_v35  ;;  %1228 = vmatpush.msrb.mxu3 %v1126_v37  ;;  %v1134_v35 = vld [vmem:[#allocation9 + $0x558] sm:$0xff]  ;;  %v1127_v37 = vld [vmem:[#allocation9 + $0x520] sm:$0xff] }
  0xc5   : > { %1162 = vmatpush.msrb.mxu0 %v1011_v34  ;;  %1208 = vmatpush.msrb.mxu2 %v1012_v36  ;;  %v1133_v34 = vld [vmem:[#allocation9 + $0x550] sm:$0xff] }
  0xc6   : > { %1183 = vmatpush.msrb.mxu1 %v1119_v39  ;;  %1229 = vmatpush.msrb.mxu3 %v1120_v41  ;;  %v1013_v36 = vld [vmem:[#allocation9 + $0x190] sm:$0xff]  ;;  %v1128_v39 = vld [vmem:[#allocation9 + $0x528] sm:$0xff] }
  0xc7   : > { %1163 = vmatpush.msrb.mxu0 %v1005_v38  ;;  %1209 = vmatpush.msrb.mxu2 %v1006_v40  ;;  %v1014_v38 = vld [vmem:[#allocation9 + $0x198] sm:$0xff]  ;;  %v1007_v40 = vld [vmem:[#allocation9 + $0x160] sm:$0xff]  ;;  %v1121_v41 = vld [vmem:[#allocation9 + $0x4f0] sm:$0xff] }
  0xc8   : > { %1184 = vmatpush.msrb.mxu1 %v1113_v43  ;;  %1230 = vmatpush.msrb.mxu3 %v1114_v45  ;;  %v1122_v43 = vld [vmem:[#allocation9 + $0x4f8] sm:$0xff]  ;;  %v1115_v45 = vld [vmem:[#allocation9 + $0x4c0] sm:$0xff] }
  0xc9   : > { %1164 = vmatpush.msrb.mxu0 %v999_v42  ;;  %1210 = vmatpush.msrb.mxu2 %v1000_v44  ;;  %v1008_v42 = vld [vmem:[#allocation9 + $0x168] sm:$0xff]  ;;  %v1001_v44 = vld [vmem:[#allocation9 + $0x130] sm:$0xff] }
  0xca   : > { %1185 = vmatpush.msrb.mxu1 %v1107_v47  ;;  %1231 = vmatpush.msrb.mxu3 %v1108_v49  ;;  %v1116_v47 = vld [vmem:[#allocation9 + $0x4c8] sm:$0xff]  ;;  %v1109_v49 = vld [vmem:[#allocation9 + $0x490] sm:$0xff] }
  0xcb   : > { %1165 = vmatpush.msrb.mxu0 %v993_v46  ;;  %1211 = vmatpush.msrb.mxu2 %v994_v48  ;;  %v1002_v46 = vld [vmem:[#allocation9 + $0x138] sm:$0xff]  ;;  %v995_v48 = vld [vmem:[#allocation9 + $0x100] sm:$0xff] }
  0xcc   : > { %1186 = vmatpush.msrb.mxu1 %v1101_v51  ;;  %1232 = vmatpush.msrb.mxu3 %v1102_v53  ;;  %v1110_v51 = vld [vmem:[#allocation9 + $0x498] sm:$0xff]  ;;  %v989_v53 = vld [vmem:[#allocation9 + $0xd0] sm:$0xff] }
  0xcd   : > { %1166 = vmatpush.msrb.mxu0 %v987_v50  ;;  %1212 = vmatpush.msrb.mxu2 %v988_v52  ;;  %v996_v50 = vld [vmem:[#allocation9 + $0x108] sm:$0xff]  ;;  %v3748_v52 = vld [vmem:[#allocation8] sm:$0x3] }
  0xce   : > { %784 = vmatmul.f32.gmra.mxu0 %v3727_v14  ;;  %830 = vmatmul.f32.gmra.mxu2 %v3727_v14 }
  0xcf   : > { %1167 = vmatpush.msrb.mxu0 %v981_v54  ;;  %1187 = vmatpush.msrb.mxu1 %v1095_v55  ;;  %v1103_v54 = vld [vmem:[#allocation9 + $0x460] sm:$0xff]  ;;  %v990_v55 = vld [vmem:[#allocation9 + $0xd8] sm:$0xff] }
  0xd0   : > { %1213 = vmatpush.msrb.mxu2 %v982_v56  ;;  %1233 = vmatpush.msrb.mxu3 %v1096_v57  ;;  %v1104_v56 = vld [vmem:[#allocation9 + $0x468] sm:$0xff]  ;;  %v951_v57 = vperm.slane %v3748_v52, 0 }
  0xd1   : > { %1168 = vmatpush.msrb.mxu0 %v975_v58  ;;  %1188 = vmatpush.msrb.mxu1 %v1089_v59 }
  0xd2   : > { %1214 = vmatpush.msrb.mxu2 %v976_v60  ;;  %1234 = vmatpush.msrb.mxu3 %v1090_v61  ;;  %v983_v60 = vld [vmem:[#allocation9 + $0xa0] sm:$0xff]  ;;  %v1097_v61 = vld [vmem:[#allocation9 + $0x430] sm:$0xff] }
  0xd3   : > { %1169 = vmatpush.msrb.mxu0 %v969_v62  ;;  %1189 = vmatpush.msrb.mxu1 %v1083_v63  ;;  %v984_v63 = vld [vmem:[#allocation9 + $0xa8] sm:$0xff] }
  0xd4   : > { %1215 = vmatpush.msrb.mxu2 %v970_v2  ;;  %1235 = vmatpush.msrb.mxu3 %v1084_v3  ;;  %v1098_v2 = vld [vmem:[#allocation9 + $0x438] sm:$0xff]  ;;  %v977_v3 = vld [vmem:[#allocation9 + $0x70] sm:$0xff] }
  0xd5   : > { %807 = vmatmul.f32.gmra.mxu1 %v3730_v15  ;;  %853 = vmatmul.f32.gmra.mxu3 %v3730_v15 }
  0xd6   : > { %1170 = vmatpush.msrb.mxu0 %v963_v4  ;;  %1190 = vmatpush.msrb.mxu1 %v1077_v5  ;;  %v1091_v4 = vld [vmem:[#allocation9 + $0x400] sm:$0xff] }
  0xd7   : > { %1216 = vmatpush.msrb.mxu2 %v964_v6  ;;  %1236 = vmatpush.msrb.mxu3 %v1078_v7  ;;  %v978_v6 = vld [vmem:[#allocation9 + $0x78] sm:$0xff]  ;;  %v971_v7 = vld [vmem:[#allocation9 + $0x40] sm:$0xff] }
  0xd8   : > { %873 = vmatmul.f32.vlgmr.msra.gmra.mxu0 %v3717_v0  ;;  %919 = vmatmul.f32.vlgmr.msra.gmra.mxu2 %v3717_v0  ;;  %v1151_v0 = vld [vmem:[#allocation9 + $0x5e0] sm:$0xff] }
  0xd9   : > { %1247 = vmatpush.msra.mxu0 %v1055_v8  ;;  %1293 = vmatpush.msra.mxu2 %v1056_v9  ;;  %v1085_v8 = vld [vmem:[#allocation9 + $0x3d0] sm:$0xff] }
  0xda   : > { %1191 = vmatpush.msrb.mxu1 %v1071_v10  ;;  %1237 = vmatpush.msrb.mxu3 %v1072_v11  ;;  %v972_v10 = vld [vmem:[#allocation9 + $0x48] sm:$0xff]  ;;  %v1086_v11 = vld [vmem:[#allocation9 + $0x3d8] sm:$0xff] }
  0xdb   : > { %1248 = vmatpush.msra.mxu0 %v1049_v12  ;;  %1294 = vmatpush.msra.mxu2 %v1050_v13  ;;  %v952_v12 = vperm.slane %v3748_v52, 1 }
  0xdc   : > { %1192 = vmatpush.msrb.mxu1 %v1065_v16  ;;  %1238 = vmatpush.msrb.mxu3 %v1066_v17 }
  0xdd   : > { %1249 = vmatpush.msra.mxu0 %v1043_v18  ;;  %1295 = vmatpush.msra.mxu2 %v1044_v19  ;;  %v965_v18 = vld [vmem:[#allocation9 + $0x10] sm:$0xff]  ;;  %v1079_v19 = vld [vmem:[#allocation9 + $0x3a0] sm:$0xff] }
  0xde   : > { %1193 = vmatpush.msrb.mxu1 %v1059_v20  ;;  %1239 = vmatpush.msrb.mxu3 %v1060_v21 }
  0xdf   : > { %896 = vmatmul.f32.vlgmr.msra.gmra.mxu1 %v3720_v1  ;;  %942 = vmatmul.f32.vlgmr.msra.gmra.mxu3 %v3720_v1  ;;  %v1020_v1 = vld [vmem:[#allocation9 + $0x1c8] sm:$0xff] }
  0xe0   : > { %1250 = vmatpush.msra.mxu0 %v1037_v22  ;;  %1270 = vmatpush.msra.mxu1 %v1151_v0  ;;  %v966_v22 = vld [vmem:[#allocation9 + $0x18] sm:$0xff]  ;;  %v1080_v0 = vld [vmem:[#allocation9 + $0x3a8] sm:$0xff] }
  0xe1   : > { %1296 = vmatpush.msra.mxu2 %v1038_v23  ;;  %1316 = vmatpush.msra.mxu3 %v1152_v24  ;;  %v1057_v24 = vld [vmem:[#allocation9 + $0x2f0] sm:$0xff] }
  0xe2   : > { %1251 = vmatpush.msra.mxu0 %v1031_v25  ;;  %1271 = vmatpush.msra.mxu1 %v1145_v26  ;;  %v1058_v25 = vld [vmem:[#allocation9 + $0x2f8] sm:$0xff]  ;;  %v1073_v26 = vld [vmem:[#allocation9 + $0x370] sm:$0xff] }
  0xe3   : > { %1297 = vmatpush.msra.mxu2 %v1032_v27  ;;  %1317 = vmatpush.msra.mxu3 %v1146_v28  ;;  %v1074_v27 = vld [vmem:[#allocation9 + $0x378] sm:$0xff]  ;;  %v1051_v28 = vld [vmem:[#allocation9 + $0x2c0] sm:$0xff] }
  0xe4   : > { %1252 = vmatpush.msra.mxu0 %v1025_v29  ;;  %1272 = vmatpush.msra.mxu1 %v1139_v30  ;;  %v1052_v29 = vld [vmem:[#allocation9 + $0x2c8] sm:$0xff]  ;;  %v1067_v30 = vld [vmem:[#allocation9 + $0x340] sm:$0xff] }
  0xe5   : > { %1298 = vmatpush.msra.mxu2 %v1026_v31  ;;  %1318 = vmatpush.msra.mxu3 %v1140_v32  ;;  %v1068_v31 = vld [vmem:[#allocation9 + $0x348] sm:$0xff] }
  0xe6   : > { %1253 = vmatpush.msra.mxu0 %v1019_v33  ;;  %1273 = vmatpush.msra.mxu1 %v1133_v34  ;;  %v1045_v34 = vld [vmem:[#allocation9 + $0x290] sm:$0xff] }
  0xe7   : > { %1299 = vmatpush.msra.mxu2 %v1020_v1  ;;  %1319 = vmatpush.msra.mxu3 %v1134_v35  ;;  %v1046_v1 = vld [vmem:[#allocation9 + $0x298] sm:$0xff] }
  0xe8   : > { %1254 = vmatpush.msra.mxu0 %v1013_v36  ;;  %1274 = vmatpush.msra.mxu1 %v1127_v37  ;;  %v1061_v37 = vld [vmem:[#allocation9 + $0x310] sm:$0xff] }
  0xe9   : > { %1300 = vmatpush.msra.mxu2 %v1014_v38  ;;  %1320 = vmatpush.msra.mxu3 %v1128_v39  ;;  %v1062_v38 = vld [vmem:[#allocation9 + $0x318] sm:$0xff] }
  0xea   : > { %1255 = vmatpush.msra.mxu0 %v1007_v40  ;;  %1275 = vmatpush.msra.mxu1 %v1121_v41  ;;  %v1039_v40 = vld [vmem:[#allocation9 + $0x260] sm:$0xff]  ;;  %v1153_v41 = vld [vmem:[#allocation9 + $0x5f0] sm:$0xff] }
  0xeb   : > { %1301 = vmatpush.msra.mxu2 %v1008_v42  ;;  %1321 = vmatpush.msra.mxu3 %v1122_v43  ;;  %v1040_v43 = vld [vmem:[#allocation9 + $0x268] sm:$0xff] }
  0xec   : > { %1256 = vmatpush.msra.mxu0 %v1001_v44  ;;  %1276 = vmatpush.msra.mxu1 %v1115_v45  ;;  %v1154_v44 = vld [vmem:[#allocation9 + $0x5f8] sm:$0xff]  ;;  %v1033_v45 = vld [vmem:[#allocation9 + $0x230] sm:$0xff] }
  0xed   : > { %1302 = vmatpush.msra.mxu2 %v1002_v46  ;;  %1322 = vmatpush.msra.mxu3 %v1116_v47  ;;  %v1147_v46 = vld [vmem:[#allocation9 + $0x5c0] sm:$0xff] }
  0xee   : > { %1257 = vmatpush.msra.mxu0 %v995_v48  ;;  %1277 = vmatpush.msra.mxu1 %v1109_v49  ;;  %v1034_v48 = vld [vmem:[#allocation9 + $0x238] sm:$0xff]  ;;  %v1148_v49 = vld [vmem:[#allocation9 + $0x5c8] sm:$0xff] }
  0xef   : > { %1303 = vmatpush.msra.mxu2 %v996_v50  ;;  %1323 = vmatpush.msra.mxu3 %v1110_v51  ;;  %v1027_v50 = vld [vmem:[#allocation9 + $0x200] sm:$0xff]  ;;  %v1141_v51 = vld [vmem:[#allocation9 + $0x590] sm:$0xff] }
  0xf0   : > { %876 = vmatmul.f32.gmra.mxu0 %v3727_v14  ;;  %922 = vmatmul.f32.gmra.mxu2 %v3727_v14  ;;  %v690_v58 = vpop.f32.mrf.mxu0  ;;  %v713_v59 = vpop.f32.mrf.mxu1  ;;  %v1092_v14 = vld [vmem:[#allocation9 + $0x408] sm:$0xff] }
  0xf1   : > { %1258 = vmatpush.msra.mxu0 %v989_v53  ;;  %1278 = vmatpush.msra.mxu1 %v1103_v54  ;;  %v714_v62 = vadd.f32 %v713_v59, %v690_v58  ;;  %v1028_v53 = vld [vmem:[#allocation9 + $0x208] sm:$0xff]  ;;  %v1142_v54 = vld [vmem:[#allocation9 + $0x598] sm:$0xff]  ;;  %v1015_v59 = vld [vmem:[#allocation9 + $0x1a0] sm:$0xff] }
  0xf2   : > { %1304 = vmatpush.msra.mxu2 %v990_v55  ;;  %1324 = vmatpush.msra.mxu3 %v1104_v56  ;;  %v1021_v55 = vld [vmem:[#allocation9 + $0x1d0] sm:$0xff]  ;;  %v1135_v56 = vld [vmem:[#allocation9 + $0x560] sm:$0xff]  ;;  %v1136_v58 = vld [vmem:[#allocation9 + $0x568] sm:$0xff] }
  0xf3   : > { %v955_v5 = vadd.f32 %v951_v57, %v714_v62  ;;  %1259 = vmatpush.msra.mxu0 %v983_v60  ;;  %1279 = vmatpush.msra.mxu1 %v1097_v61  ;;  %v1129_v60 = vld [vmem:[#allocation9 + $0x530] sm:$0xff]  ;;  %v1016_v61 = vld [vmem:[#allocation9 + $0x1a8] sm:$0xff]  ;;  %v1130_v62 = vld [vmem:[#allocation9 + $0x538] sm:$0xff] }
  0xf4   : > { %1305 = vmatpush.msra.mxu2 %v984_v63  ;;  %1325 = vmatpush.msra.mxu3 %v1098_v2  ;;  %v1009_v63 = vld [vmem:[#allocation9 + $0x170] sm:$0xff]  ;;  %v1123_v2 = vld [vmem:[#allocation9 + $0x500] sm:$0xff] }
  0xf5   : > { %1260 = vmatpush.msra.mxu0 %v977_v3  ;;  %1280 = vmatpush.msra.mxu1 %v1091_v4  ;;  %v3755_v9 = vmax.f32 %v955_v5, 0.0  ;;  %v1010_v3 = vld [vmem:[#allocation9 + $0x178] sm:$0xff]  ;;  %v1124_v4 = vld [vmem:[#allocation9 + $0x508] sm:$0xff]  ;;  %v1003_v5 = vld [vmem:[#allocation9 + $0x140] sm:$0xff] }
  0xf6   : > { %1306 = vmatpush.msra.mxu2 %v978_v6  ;;  %1326 = vmatpush.msra.mxu3 %v1092_v14  ;;  %v1117_v6 = vld [vmem:[#allocation9 + $0x4d0] sm:$0xff]  ;;  %v1004_v14 = vld [vmem:[#allocation9 + $0x148] sm:$0xff] }
  0xf7   : > { %899 = vmatmul.f32.gmra.mxu1 %v3730_v15  ;;  %945 = vmatmul.f32.gmra.mxu3 %v3730_v15  ;;  %v736_v13 = vpop.f32.mrf.mxu2  ;;  %v759_v16 = vpop.f32.mrf.mxu3 }
  0xf8   : > { %1261 = vmatpush.msra.mxu0 %v971_v7  ;;  %1281 = vmatpush.msra.mxu1 %v1085_v8  ;;  %v760_v17 = vadd.f32 %v759_v16, %v736_v13  ;;  %v693_v20 = vpop.f32.mrf.mxu0  ;;  %v716_v21 = vpop.f32.mrf.mxu1  ;;  %v1118_v7 = vld [vmem:[#allocation9 + $0x4d8] sm:$0xff]  ;;  %v997_v8 = vld [vmem:[#allocation9 + $0x110] sm:$0xff]  ;;  %v991_v13 = vld [vmem:[#allocation9 + $0xe0] sm:$0xff] }
  0xf9   : > { %1307 = vmatpush.msra.mxu2 %v972_v10  ;;  %1327 = vmatpush.msra.mxu3 %v1086_v11  ;;  %v717_v15 = vadd.f32 %v716_v21, %v693_v20  ;;  %v1111_v10 = vld [vmem:[#allocation9 + $0x4a0] sm:$0xff]  ;;  %v998_v11 = vld [vmem:[#allocation9 + $0x118] sm:$0xff]  ;;  %v1105_v16 = vld [vmem:[#allocation9 + $0x470] sm:$0xff] }
  0xfa   : > { %v956_v23 = vadd.f32 %v952_v12, %v760_v17  ;;  %1171 = vmatmul.f32.vlgmr.msrb.gmra.mxu0 %v3755_v9  ;;  %1217 = vmatmul.f32.vlgmr.msrb.gmra.mxu2 %v3755_v9  ;;  %v992_v17 = vld [vmem:[#allocation9 + $0xe8] sm:$0xff]  ;;  %v1099_v20 = vld [vmem:[#allocation9 + $0x440] sm:$0xff]  ;;  %v986_v21 = vld [vmem:[#allocation9 + $0xb8] sm:$0xff] }
  0xfb   : > { %1262 = vmatpush.msra.mxu0 %v965_v18  ;;  %1282 = vmatpush.msra.mxu1 %v1079_v19  ;;  %v957_v33 = vadd.f32 %v951_v57, %v717_v15  ;;  %v1022_v57 = vld [vmem:[#allocation9 + $0x1d8] sm:$0xff]  ;;  %v985_v19 = vld [vmem:[#allocation9 + $0xb0] sm:$0xff]  ;;  %v980_v15 = vld [vmem:[#allocation9 + $0x88] sm:$0xff] }
  0xfc   : > { %1308 = vmatpush.msra.mxu2 %v966_v22  ;;  %1328 = vmatpush.msra.mxu3 %v1080_v0  ;;  %v3764_v32 = vmax.f32 %v956_v23, 0.0  ;;  %v1106_v18 = vld [vmem:[#allocation9 + $0x478] sm:$0xff]  ;;  %v1100_v22 = vld [vmem:[#allocation9 + $0x448] sm:$0xff]  ;;  %v979_v0 = vld [vmem:[#allocation9 + $0x80] sm:$0xff] }
  0xfd   : > { %1339 = vmatpush.msrb.mxu0 %v1057_v24  ;;  %1283 = vmatpush.msra.mxu1 %v1073_v26  ;;  %v3768_v42 = vmax.f32 %v957_v33, 0.0  ;;  %v1093_v23 = vld [vmem:[#allocation9 + $0x410] sm:$0xff]  ;;  %v1094_v24 = vld [vmem:[#allocation9 + $0x418] sm:$0xff]  ;;  %v1087_v26 = vld [vmem:[#allocation9 + $0x3e0] sm:$0xff] }
  0xfe   : > { %1385 = vmatpush.msrb.mxu2 %v1058_v25  ;;  %1329 = vmatpush.msra.mxu3 %v1074_v27  ;;  %v973_v25 = vld [vmem:[#allocation9 + $0x50] sm:$0xff]  ;;  %v974_v27 = vld [vmem:[#allocation9 + $0x58] sm:$0xff] }
  0xff   : > { %1340 = vmatpush.msrb.mxu0 %v1051_v28  ;;  %v739_v35 = vpop.f32.mrf.mxu2  ;;  %v762_v36 = vpop.f32.mrf.mxu3  ;;  %1284 = vmatpush.msra.mxu1 %v1067_v30  ;;  %v1088_v28 = vld [vmem:[#allocation9 + $0x3e8] sm:$0xff]  ;;  %v1081_v30 = vld [vmem:[#allocation9 + $0x3b0] sm:$0xff]  ;;  %v1082_v33 = vld [vmem:[#allocation9 + $0x3b8] sm:$0xff] }
 0x100   : > { %1386 = vmatpush.msrb.mxu2 %v1052_v29  ;;  %1330 = vmatpush.msra.mxu3 %v1068_v31  ;;  %v763_v39 = vadd.f32 %v762_v36, %v739_v35  ;;  %v967_v29 = vld [vmem:[#allocation9 + $0x20] sm:$0xff]  ;;  %v968_v31 = vld [vmem:[#allocation9 + $0x28] sm:$0xff]  ;;  %v1069_v35 = vld [vmem:[#allocation9 + $0x350] sm:$0xff] }
 0x101   : > { %1341 = vmatpush.msrb.mxu0 %v1045_v34  ;;  %1194 = vmatmul.f32.vlgmr.msrb.gmra.mxu1 %v3764_v32  ;;  %v1075_v34 = vld [vmem:[#allocation9 + $0x380] sm:$0xff]  ;;  %v1070_v36 = vld [vmem:[#allocation9 + $0x358] sm:$0xff] }
 0x102   : > { %1387 = vmatpush.msrb.mxu2 %v1046_v1  ;;  %1240 = vmatmul.f32.vlgmr.msrb.gmra.mxu3 %v3764_v32  ;;  %v958_v47 = vadd.f32 %v952_v12, %v763_v39  ;;  %v1112_v12 = vld [vmem:[#allocation9 + $0x4a8] sm:$0xff] }
 0x103   : > { %1285 = vmatpush.msra.mxu1 %v1061_v37  ;;  %1331 = vmatpush.msra.mxu3 %v1062_v38  ;;  %v1076_v1 = vld [vmem:[#allocation9 + $0x388] sm:$0xff]  ;;  %v1063_v37 = vld [vmem:[#allocation9 + $0x320] sm:$0xff] }
 0x104   : > { %1342 = vmatpush.msrb.mxu0 %v1039_v40  ;;  %1388 = vmatpush.msrb.mxu2 %v1040_v43  ;;  %v3776_v52 = vmax.f32 %v958_v47, 0.0  ;;  %v1064_v38 = vld [vmem:[#allocation9 + $0x328] sm:$0xff] }
 0x105   : > { %1362 = vmatpush.msrb.mxu1 %v1153_v41  ;;  %1408 = vmatpush.msrb.mxu3 %v1154_v44 }
 0x106   : > { %1174 = vmatmul.f32.gmra.mxu0 %v3768_v42  ;;  %1220 = vmatmul.f32.gmra.mxu2 %v3768_v42 }
 0x107   : > { %1343 = vmatpush.msrb.mxu0 %v1033_v45  ;;  %1363 = vmatpush.msrb.mxu1 %v1147_v46 }
 0x108   : > { %1389 = vmatpush.msrb.mxu2 %v1034_v48  ;;  %1409 = vmatpush.msrb.mxu3 %v1148_v49 }
 0x109   : > { %1344 = vmatpush.msrb.mxu0 %v1027_v50  ;;  %1364 = vmatpush.msrb.mxu1 %v1141_v51 }
 0x10a   : > { %1390 = vmatpush.msrb.mxu2 %v1028_v53  ;;  %1410 = vmatpush.msrb.mxu3 %v1142_v54  ;;  %v1673_v54 = vld [vmem:[#allocation12 + $0x4b0] sm:$0xff] }
 0x10b   : > { %1345 = vmatpush.msrb.mxu0 %v1021_v55  ;;  %1365 = vmatpush.msrb.mxu1 %v1135_v56  ;;  %v1674_v55 = vld [vmem:[#allocation12 + $0x4b8] sm:$0xff] }
 0x10c   : > { %1391 = vmatpush.msrb.mxu2 %v1022_v57  ;;  %1411 = vmatpush.msrb.mxu3 %v1136_v58  ;;  %v1664_v57 = vld [vmem:[#allocation12 + $0x468] sm:$0xff] }
 0x10d   : > { %1197 = vmatmul.f32.gmra.mxu1 %v3776_v52  ;;  %1243 = vmatmul.f32.gmra.mxu3 %v3776_v52 }
 0x10e   : > { %1346 = vmatpush.msrb.mxu0 %v1015_v59  ;;  %1366 = vmatpush.msrb.mxu1 %v1129_v60  ;;  %v1653_v59 = vld [vmem:[#allocation12 + $0x410] sm:$0xff]  ;;  %v1654_v60 = vld [vmem:[#allocation12 + $0x418] sm:$0xff] }
 0x10f   : > { %1392 = vmatpush.msrb.mxu2 %v1016_v61  ;;  %1412 = vmatpush.msrb.mxu3 %v1130_v62  ;;  %v1643_v61 = vld [vmem:[#allocation12 + $0x3c0] sm:$0xff]  ;;  %v1833_v62 = vld [vmem:[#allocation12 + $0x9b0] sm:$0xff] }
 0x110   : > { %1263 = vmatmul.f32.vlgmr.msra.gmra.mxu0 %v3755_v9  ;;  %1309 = vmatmul.f32.vlgmr.msra.gmra.mxu2 %v3755_v9 }
 0x111   : > { %1347 = vmatpush.msrb.mxu0 %v1009_v63  ;;  %1367 = vmatpush.msrb.mxu1 %v1123_v2  ;;  %v1644_v63 = vld [vmem:[#allocation12 + $0x3c8] sm:$0xff]  ;;  %v1834_v2 = vld [vmem:[#allocation12 + $0x9b8] sm:$0xff] }
 0x112   : > { %1393 = vmatpush.msrb.mxu2 %v1010_v3  ;;  %1413 = vmatpush.msrb.mxu3 %v1124_v4  ;;  %v1633_v3 = vld [vmem:[#allocation12 + $0x370] sm:$0xff]  ;;  %v1823_v4 = vld [vmem:[#allocation12 + $0x960] sm:$0xff] }
 0x113   : > { %1348 = vmatpush.msrb.mxu0 %v1003_v5  ;;  %1368 = vmatpush.msrb.mxu1 %v1117_v6  ;;  %v1634_v5 = vld [vmem:[#allocation12 + $0x378] sm:$0xff]  ;;  %v1824_v6 = vld [vmem:[#allocation12 + $0x968] sm:$0xff] }
 0x114   : > { %1394 = vmatpush.msrb.mxu2 %v1004_v14  ;;  %1414 = vmatpush.msrb.mxu3 %v1118_v7  ;;  %v1623_v14 = vld [vmem:[#allocation12 + $0x320] sm:$0xff]  ;;  %v1813_v7 = vld [vmem:[#allocation12 + $0x910] sm:$0xff] }
 0x115   : > { %1349 = vmatpush.msrb.mxu0 %v997_v8  ;;  %1369 = vmatpush.msrb.mxu1 %v1111_v10  ;;  %v1624_v8 = vld [vmem:[#allocation12 + $0x328] sm:$0xff]  ;;  %v1814_v10 = vld [vmem:[#allocation12 + $0x918] sm:$0xff] }
 0x116   : > { %1395 = vmatpush.msrb.mxu2 %v998_v11  ;;  %1415 = vmatpush.msrb.mxu3 %v1112_v12  ;;  %v1613_v11 = vld [vmem:[#allocation12 + $0x2d0] sm:$0xff]  ;;  %v1803_v12 = vld [vmem:[#allocation12 + $0x8c0] sm:$0xff] }
 0x117   : > { %1286 = vmatmul.f32.vlgmr.msra.gmra.mxu1 %v3764_v32  ;;  %1332 = vmatmul.f32.vlgmr.msra.gmra.mxu3 %v3764_v32 }
 0x118   : > { %1350 = vmatpush.msrb.mxu0 %v991_v13  ;;  %1370 = vmatpush.msrb.mxu1 %v1105_v16  ;;  %v1614_v13 = vld [vmem:[#allocation12 + $0x2d8] sm:$0xff]  ;;  %v1804_v16 = vld [vmem:[#allocation12 + $0x8c8] sm:$0xff] }
 0x119   : > { %1396 = vmatpush.msrb.mxu2 %v992_v17  ;;  %1416 = vmatpush.msrb.mxu3 %v1106_v18  ;;  %v1603_v17 = vld [vmem:[#allocation12 + $0x280] sm:$0xff]  ;;  %v1793_v18 = vld [vmem:[#allocation12 + $0x870] sm:$0xff] }
 0x11a   : > { %1266 = vmatmul.f32.gmra.mxu0 %v3768_v42  ;;  %1312 = vmatmul.f32.gmra.mxu2 %v3768_v42 }
 0x11b   : > { %1351 = vmatpush.msrb.mxu0 %v985_v19  ;;  %1371 = vmatpush.msrb.mxu1 %v1099_v20  ;;  %v1604_v19 = vld [vmem:[#allocation12 + $0x288] sm:$0xff]  ;;  %v1794_v20 = vld [vmem:[#allocation12 + $0x878] sm:$0xff] }
 0x11c   : > { %1397 = vmatpush.msrb.mxu2 %v986_v21  ;;  %1417 = vmatpush.msrb.mxu3 %v1100_v22  ;;  %v1593_v21 = vld [vmem:[#allocation12 + $0x230] sm:$0xff]  ;;  %v1783_v22 = vld [vmem:[#allocation12 + $0x820] sm:$0xff] }
 0x11d   : > { %1352 = vmatpush.msrb.mxu0 %v979_v0  ;;  %1372 = vmatpush.msrb.mxu1 %v1093_v23  ;;  %v1594_v0 = vld [vmem:[#allocation12 + $0x238] sm:$0xff]  ;;  %v1784_v23 = vld [vmem:[#allocation12 + $0x828] sm:$0xff] }
 0x11e   : > { %1398 = vmatpush.msrb.mxu2 %v980_v15  ;;  %1418 = vmatpush.msrb.mxu3 %v1094_v24  ;;  %v1583_v15 = vld [vmem:[#allocation12 + $0x1e0] sm:$0xff]  ;;  %v1773_v24 = vld [vmem:[#allocation12 + $0x7d0] sm:$0xff] }
 0x11f   : > { %1353 = vmatpush.msrb.mxu0 %v973_v25  ;;  %1373 = vmatpush.msrb.mxu1 %v1087_v26  ;;  %v1584_v25 = vld [vmem:[#allocation12 + $0x1e8] sm:$0xff] }
 0x120   : > { %1399 = vmatpush.msrb.mxu2 %v974_v27  ;;  %1419 = vmatpush.msrb.mxu3 %v1088_v28  ;;  %v1774_v27 = vld [vmem:[#allocation12 + $0x7d8] sm:$0xff] }
 0x121   : > { %1289 = vmatmul.f32.gmra.mxu1 %v3776_v52  ;;  %1335 = vmatmul.f32.gmra.mxu3 %v3776_v52 }
 0x122   : > { %1354 = vmatpush.msrb.mxu0 %v967_v29  ;;  %1374 = vmatpush.msrb.mxu1 %v1081_v30  ;;  %v1573_v29 = vld [vmem:[#allocation12 + $0x190] sm:$0xff]  ;;  %v1763_v30 = vld [vmem:[#allocation12 + $0x780] sm:$0xff] }
 0x123   : > { %1400 = vmatpush.msrb.mxu2 %v968_v31  ;;  %1420 = vmatpush.msrb.mxu3 %v1082_v33  ;;  %v1574_v31 = vld [vmem:[#allocation12 + $0x198] sm:$0xff] }
 0x124   : > { %1355 = vmatmul.f32.vlgmr.msrb.gmra.mxu0 %v3755_v9  ;;  %1401 = vmatmul.f32.vlgmr.msrb.gmra.mxu2 %v3755_v9 }
 0x125   : > { %1375 = vmatpush.msrb.mxu1 %v1075_v34  ;;  %1421 = vmatpush.msrb.mxu3 %v1076_v1  ;;  %v1764_v34 = vld [vmem:[#allocation12 + $0x788] sm:$0xff]  ;;  %v1563_v1 = vld [vmem:[#allocation12 + $0x140] sm:$0xff] }
 0x126   : > { %1864 = vmatpush.msra.mxu0 %v1673_v54  ;;  %1910 = vmatpush.msra.mxu2 %v1674_v55  ;;  %v1723_v54 = vld [vmem:[#allocation12 + $0x640] sm:$0xff]  ;;  %v1534_v55 = vld [vmem:[#allocation12 + $0x58] sm:$0xff] }
 0x127   : > { %1376 = vmatpush.msrb.mxu1 %v1069_v35  ;;  %1422 = vmatpush.msrb.mxu3 %v1070_v36  ;;  %v1753_v35 = vld [vmem:[#allocation12 + $0x730] sm:$0xff]  ;;  %v1564_v36 = vld [vmem:[#allocation12 + $0x148] sm:$0xff] }
 0x128   : > { %1911 = vmatpush.msra.mxu2 %v1664_v57  ;;  %v1523_v57 = vld [vmem:[#allocation12] sm:$0xff] }
 0x129   : > { %1377 = vmatpush.msrb.mxu1 %v1063_v37  ;;  %1423 = vmatpush.msrb.mxu3 %v1064_v38  ;;  %v1754_v37 = vld [vmem:[#allocation12 + $0x738] sm:$0xff]  ;;  %v1553_v38 = vld [vmem:[#allocation12 + $0xf0] sm:$0xff] }
 0x12a   : > { %1378 = vmatmul.f32.vlgmr.msrb.gmra.mxu1 %v3764_v32  ;;  %1424 = vmatmul.f32.vlgmr.msrb.gmra.mxu3 %v3764_v32 }
 0x12b   : > { %1912 = vmatpush.msra.mxu2 %v1654_v60  ;;  %1887 = vmatpush.msra.mxu1 %v1833_v62  ;;  %v1524_v60 = vld [vmem:[#allocation12 + $0x8] sm:$0xff]  ;;  %v1675_v62 = vld [vmem:[#allocation12 + $0x4c0] sm:$0xff] }
 0x12c   : > { %1358 = vmatmul.f32.gmra.mxu0 %v3768_v42  ;;  %1404 = vmatmul.f32.gmra.mxu2 %v3768_v42 }
 0x12d   : > { %1913 = vmatpush.msra.mxu2 %v1644_v63  ;;  %1933 = vmatpush.msra.mxu3 %v1834_v2  ;;  %v1676_v63 = vld [vmem:[#allocation12 + $0x4c8] sm:$0xff] }
 0x12e   : > { %1888 = vmatpush.msra.mxu1 %v1823_v4  ;;  %v1704_v4 = vld [vmem:[#allocation12 + $0x5a8] sm:$0xff] }
 0x12f   : > { %v782_v9 = vpop.f32.mrf.mxu0  ;;  %1914 = vmatpush.msra.mxu2 %v1634_v5  ;;  %1934 = vmatpush.msra.mxu3 %v1824_v6  ;;  %v1665_v5 = vld [vmem:[#allocation12 + $0x470] sm:$0xff]  ;;  %v1666_v6 = vld [vmem:[#allocation12 + $0x478] sm:$0xff] }
 0x130   : > { %1889 = vmatpush.msra.mxu1 %v1813_v7  ;;  %v1694_v7 = vld [vmem:[#allocation12 + $0x558] sm:$0xff] }
 0x131   : > { %1915 = vmatpush.msra.mxu2 %v1624_v8  ;;  %1935 = vmatpush.msra.mxu3 %v1814_v10  ;;  %v1655_v10 = vld [vmem:[#allocation12 + $0x420] sm:$0xff] }
 0x132   : > { %1381 = vmatmul.f32.gmra.mxu1 %v3776_v52  ;;  %1427 = vmatmul.f32.gmra.mxu3 %v3776_v52  ;;  %v1663_v52 = vld [vmem:[#allocation12 + $0x460] sm:$0xff] }
 0x133   : > { %1865 = vmatpush.msra.mxu0 %v1663_v52  ;;  %1890 = vmatpush.msra.mxu1 %v1803_v12  ;;  %v1724_v52 = vld [vmem:[#allocation12 + $0x648] sm:$0xff]  ;;  %v1683_v12 = vld [vmem:[#allocation12 + $0x500] sm:$0xff] }
 0x134   : > { %1916 = vmatpush.msra.mxu2 %v1614_v13  ;;  %1936 = vmatpush.msra.mxu3 %v1804_v16  ;;  %v1684_v13 = vld [vmem:[#allocation12 + $0x508] sm:$0xff]  ;;  %v1645_v16 = vld [vmem:[#allocation12 + $0x3d0] sm:$0xff] }
 0x135   : > { %v828_v41 = vpop.f32.mrf.mxu2  ;;  %1866 = vmatpush.msra.mxu0 %v1653_v59  ;;  %1891 = vmatpush.msra.mxu1 %v1793_v18  ;;  %v1713_v59 = vld [vmem:[#allocation12 + $0x5f0] sm:$0xff]  ;;  %v1646_v18 = vld [vmem:[#allocation12 + $0x3d8] sm:$0xff] }
 0x136   : > { %1917 = vmatpush.msra.mxu2 %v1604_v19  ;;  %1937 = vmatpush.msra.mxu3 %v1794_v20  ;;  %v1836_v20 = vld [vmem:[#allocation12 + $0x9c8] sm:$0xff] }
 0x137   : > { %v805_v39 = vpop.f32.mrf.mxu1  ;;  %1867 = vmatpush.msra.mxu0 %v1643_v61  ;;  %1892 = vmatpush.msra.mxu1 %v1783_v22  ;;  %v1714_v61 = vld [vmem:[#allocation12 + $0x5f8] sm:$0xff]  ;;  %v1635_v22 = vld [vmem:[#allocation12 + $0x380] sm:$0xff] }
 0x138   : > { %v3796_v40 = vadd.f32 %v805_v39, %v782_v9  ;;  %1918 = vmatpush.msra.mxu2 %v1594_v0  ;;  %1938 = vmatpush.msra.mxu3 %v1784_v23  ;;  %v1743_v9 = vld [vmem:[#allocation12 + $0x6e0] sm:$0xff]  ;;  %v1554_v39 = vld [vmem:[#allocation12 + $0xf8] sm:$0xff]  ;;  %v1825_v0 = vld [vmem:[#allocation12 + $0x970] sm:$0xff] }
 0x139   : > { %1868 = vmatpush.msra.mxu0 %v1633_v3  ;;  %1893 = vmatpush.msra.mxu1 %v1773_v24  ;;  %v1703_v3 = vld [vmem:[#allocation12 + $0x5a0] sm:$0xff]  ;;  %v1636_v23 = vld [vmem:[#allocation12 + $0x388] sm:$0xff]  ;;  %v1625_v24 = vld [vmem:[#allocation12 + $0x330] sm:$0xff] }
 0x13a   : > { %1919 = vmatpush.msra.mxu2 %v1584_v25  ;;  %1939 = vmatpush.msra.mxu3 %v1774_v27  ;;  %v1815_v25 = vld [vmem:[#allocation12 + $0x920] sm:$0xff] }
 0x13b   : > { %1869 = vmatpush.msra.mxu0 %v1623_v14  ;;  %1894 = vmatpush.msra.mxu1 %v1763_v30  ;;  %v1693_v14 = vld [vmem:[#allocation12 + $0x550] sm:$0xff] }
 0x13c   : > { %1920 = vmatpush.msra.mxu2 %v1574_v31  ;;  %1940 = vmatpush.msra.mxu3 %v1764_v34  ;;  %v1805_v30 = vld [vmem:[#allocation12 + $0x8d0] sm:$0xff]  ;;  %v1616_v31 = vld [vmem:[#allocation12 + $0x2e8] sm:$0xff]  ;;  %v1806_v34 = vld [vmem:[#allocation12 + $0x8d8] sm:$0xff] }
 0x13d   : > { %v851_v43 = vpop.f32.mrf.mxu3  ;;  %1870 = vmatpush.msra.mxu0 %v1613_v11  ;;  %1895 = vmatpush.msra.mxu1 %v1753_v35  ;;  %v1656_v11 = vld [vmem:[#allocation12 + $0x428] sm:$0xff]  ;;  %v1605_v35 = vld [vmem:[#allocation12 + $0x290] sm:$0xff] }
 0x13e   : > { %v3798_v44 = vadd.f32 %v851_v43, %v828_v41  ;;  %1921 = vmatpush.msra.mxu2 %v1564_v36  ;;  %1941 = vmatpush.msra.mxu3 %v1754_v37  ;;  %v1744_v43 = vld [vmem:[#allocation12 + $0x6e8] sm:$0xff]  ;;  %v1795_v36 = vld [vmem:[#allocation12 + $0x880] sm:$0xff]  ;;  %v1606_v37 = vld [vmem:[#allocation12 + $0x298] sm:$0xff] }
 0x13f   : > { %1871 = vmatpush.msra.mxu0 %v1603_v17  ;;  %1896 = vmatpush.msra.mxu1 %v1743_v9  ;;  %v1835_v17 = vld [vmem:[#allocation12 + $0x9c0] sm:$0xff] }
 0x140   : > { %1922 = vmatpush.msra.mxu2 %v1554_v39  ;;  %1942 = vmatpush.msra.mxu3 %v1744_v43  ;;  %v1595_v9 = vld [vmem:[#allocation12 + $0x240] sm:$0xff]  ;;  %v1785_v39 = vld [vmem:[#allocation12 + $0x830] sm:$0xff] }
 0x141   : > { %1872 = vmatpush.msra.mxu0 %v1593_v21 }
 0x143   : > { %1873 = vmatpush.msra.mxu0 %v1583_v15  ;;  %v1826_v15 = vld [vmem:[#allocation12 + $0x978] sm:$0xff] }
 0x145   : > { %1874 = vmatpush.msra.mxu0 %v1573_v29  ;;  %v1615_v29 = vld [vmem:[#allocation12 + $0x2e0] sm:$0xff] }
 0x147   : > { %1875 = vmatpush.msra.mxu0 %v1563_v1 }
 0x149   : > { %1876 = vmatpush.msra.mxu0 %v1553_v38  ;;  %v1796_v38 = vld [vmem:[#allocation12 + $0x888] sm:$0xff] }
 0x14b   : > { %v785_v45 = vpop.f32.mrf.mxu0 }
 0x151   : > { %v831_v32 = vpop.f32.mrf.mxu2 }
 0x152   : > { %v808_v46 = vpop.f32.mrf.mxu1 }
 0x153   : > { %v3800_v47 = vadd.f32 %v808_v46, %v785_v45  ;;  %v1543_v46 = vld [vmem:[#allocation12 + $0xa0] sm:$0xff] }
 0x154   : > { %1877 = vmatpush.msra.mxu0 %v1543_v46  ;;  %v1786_v46 = vld [vmem:[#allocation12 + $0x838] sm:$0xff] }
 0x155   : > { %v874_v42 = vpop.f32.mrf.mxu0 }
 0x158   : > { %v854_v48 = vpop.f32.mrf.mxu3 }
 0x159   : > { %v3802_v49 = vadd.f32 %v854_v48, %v831_v32  ;;  %v1733_v32 = vld [vmem:[#allocation12 + $0x690] sm:$0xff]  ;;  %v1544_v48 = vld [vmem:[#allocation12 + $0xa8] sm:$0xff] }
 0x15a   : > { %1897 = vmatpush.msra.mxu1 %v1733_v32  ;;  %1923 = vmatpush.msra.mxu2 %v1544_v48  ;;  %v1585_v48 = vld [vmem:[#allocation12 + $0x1f0] sm:$0xff] }
 0x15b   : > { %v920_v53 = vpop.f32.mrf.mxu2 }
 0x15c   : > { %v897_v50 = vpop.f32.mrf.mxu1  ;;  %1898 = vmatpush.msra.mxu1 %v1723_v54  ;;  %1924 = vmatpush.msra.mxu2 %v1534_v55  ;;  %v1776_v54 = vld [vmem:[#allocation12 + $0x7e8] sm:$0xff] }
 0x15d   : > { %v3804_v51 = vadd.f32 %v897_v50, %v874_v42  ;;  %v1734_v50 = vld [vmem:[#allocation12 + $0x698] sm:$0xff] }
 0x15e   : > { %1943 = vmatpush.msra.mxu3 %v1734_v50  ;;  %1899 = vmatpush.msra.mxu1 %v1713_v59  ;;  %v1775_v50 = vld [vmem:[#allocation12 + $0x7e0] sm:$0xff]  ;;  %v1576_v59 = vld [vmem:[#allocation12 + $0x1a8] sm:$0xff] }
 0x15f   : > { %1925 = vmatpush.msra.mxu2 %v1524_v60 }
 0x160   : > { %1944 = vmatpush.msra.mxu3 %v1724_v52  ;;  %1900 = vmatpush.msra.mxu1 %v1703_v3  ;;  %v1575_v52 = vld [vmem:[#allocation12 + $0x1a0] sm:$0xff] }
 0x161   : > { %2002 = vmatpush.msrb.mxu2 %v1676_v63  ;;  %v1565_v63 = vld [vmem:[#allocation12 + $0x150] sm:$0xff]  ;;  %v1755_v3 = vld [vmem:[#allocation12 + $0x740] sm:$0xff] }
 0x162   : > { %v943_v56 = vpop.f32.mrf.mxu3  ;;  %1945 = vmatpush.msra.mxu3 %v1714_v61  ;;  %1901 = vmatpush.msra.mxu1 %v1693_v14  ;;  %v1766_v61 = vld [vmem:[#allocation12 + $0x798] sm:$0xff] }
 0x163   : > { %v3806_v58 = vadd.f32 %v943_v56, %v920_v53  ;;  %v1533_v53 = vld [vmem:[#allocation12 + $0x50] sm:$0xff]  ;;  %2003 = vmatpush.msrb.mxu2 %v1666_v6 }
 0x164   : > { %1878 = vmatpush.msra.mxu0 %v1533_v53  ;;  %1946 = vmatpush.msra.mxu3 %v1704_v4  ;;  %v1586_v53 = vld [vmem:[#allocation12 + $0x1f8] sm:$0xff] }
 0x165   : > { %2004 = vmatpush.msrb.mxu2 %v1656_v11  ;;  %1902 = vmatpush.msra.mxu1 %v1683_v12  ;;  %v1566_v4 = vld [vmem:[#allocation12 + $0x158] sm:$0xff]  ;;  %v1556_v11 = vld [vmem:[#allocation12 + $0x108] sm:$0xff] }
 0x166   : > { %1879 = vmatpush.msra.mxu0 %v1523_v57  ;;  %1947 = vmatpush.msra.mxu3 %v1694_v7  ;;  %v1765_v57 = vld [vmem:[#allocation12 + $0x790] sm:$0xff]  ;;  %v1555_v7 = vld [vmem:[#allocation12 + $0x100] sm:$0xff]  ;;  %v1746_v12 = vld [vmem:[#allocation12 + $0x6f8] sm:$0xff] }
 0x167   : > { %1979 = vmatpush.msrb.mxu1 %v1835_v17  ;;  %2005 = vmatpush.msrb.mxu2 %v1646_v18 }
 0x168   : > { %1956 = vmatpush.msrb.mxu0 %v1675_v62  ;;  %1948 = vmatpush.msra.mxu3 %v1684_v13  ;;  %v1545_v13 = vld [vmem:[#allocation12 + $0xb0] sm:$0xff] }
 0x169   : > { %1980 = vmatpush.msrb.mxu1 %v1825_v0  ;;  %2006 = vmatpush.msrb.mxu2 %v1636_v23  ;;  %v1535_v23 = vld [vmem:[#allocation12 + $0x60] sm:$0xff] }
 0x16a   : > { %1957 = vmatpush.msrb.mxu0 %v1665_v5  ;;  %2025 = vmatpush.msrb.mxu3 %v1836_v20  ;;  %v1756_v5 = vld [vmem:[#allocation12 + $0x748] sm:$0xff]  ;;  %v1546_v20 = vld [vmem:[#allocation12 + $0xb8] sm:$0xff] }
 0x16b   : > { %1981 = vmatpush.msrb.mxu1 %v1815_v25 }
 0x16c   : > { %1958 = vmatpush.msrb.mxu0 %v1655_v10  ;;  %2026 = vmatpush.msrb.mxu3 %v1826_v15  ;;  %v1745_v10 = vld [vmem:[#allocation12 + $0x6f0] sm:$0xff] }
 0x16d   : > { %v877_v26 = vpop.f32.mrf.mxu0  ;;  %1982 = vmatpush.msrb.mxu1 %v1805_v30  ;;  %v1725_v15 = vld [vmem:[#allocation12 + $0x650] sm:$0xff]  ;;  %v1715_v30 = vld [vmem:[#allocation12 + $0x600] sm:$0xff] }
 0x16e   : > { %1959 = vmatpush.msrb.mxu0 %v1645_v16  ;;  %v1735_v16 = vld [vmem:[#allocation12 + $0x6a0] sm:$0xff] }
 0x16f   : > { %1983 = vmatpush.msrb.mxu1 %v1795_v36  ;;  %v1716_v36 = vld [vmem:[#allocation12 + $0x608] sm:$0xff] }
 0x170   : > { %1960 = vmatpush.msrb.mxu0 %v1635_v22  ;;  %v1736_v22 = vld [vmem:[#allocation12 + $0x6a8] sm:$0xff] }
 0x171   : > { %1984 = vmatpush.msrb.mxu1 %v1785_v39 }
 0x172   : > { %1961 = vmatpush.msrb.mxu0 %v1625_v24 }
 0x173   : > { %v923_v41 = vpop.f32.mrf.mxu2  ;;  %1985 = vmatpush.msrb.mxu1 %v1775_v50 }
 0x174   : > { %v900_v28 = vpop.f32.mrf.mxu1  ;;  %1962 = vmatpush.msrb.mxu0 %v1615_v29  ;;  %v1525_v29 = vld [vmem:[#allocation12 + $0x10] sm:$0xff] }
 0x175   : > { %v3808_v33 = vadd.f32 %v900_v28, %v877_v26  ;;  %v1626_v26 = vld [vmem:[#allocation12 + $0x338] sm:$0xff]  ;;  %v1816_v28 = vld [vmem:[#allocation12 + $0x928] sm:$0xff]  ;;  %1986 = vmatpush.msrb.mxu1 %v1765_v57 }
 0x176   : > { %2007 = vmatpush.msrb.mxu2 %v1626_v26  ;;  %2027 = vmatpush.msrb.mxu3 %v1816_v28  ;;  %v1536_v26 = vld [vmem:[#allocation12 + $0x68] sm:$0xff]  ;;  %v1726_v28 = vld [vmem:[#allocation12 + $0x658] sm:$0xff] }
 0x177   : > { %v3812_v56 = vpop.f32.mrf.mxu0  ;;  %1963 = vmatpush.msrb.mxu0 %v1605_v35  ;;  %1987 = vmatpush.msrb.mxu1 %v1755_v3  ;;  %v1526_v35 = vld [vmem:[#allocation12 + $0x18] sm:$0xff] }
 0x178   : > { %2008 = vmatpush.msrb.mxu2 %v1616_v31  ;;  %2028 = vmatpush.msrb.mxu3 %v1806_v34 }
 0x179   : > { %1964 = vmatpush.msrb.mxu0 %v1595_v9  ;;  %1988 = vmatpush.msrb.mxu1 %v1745_v10 }
 0x17a   : > { %v946_v45 = vpop.f32.mrf.mxu3  ;;  %2009 = vmatpush.msrb.mxu2 %v1606_v37  ;;  %2029 = vmatpush.msrb.mxu3 %v1796_v38  ;;  %v1705_v38 = vld [vmem:[#allocation12 + $0x5b0] sm:$0xff] }
 0x17b   : > { %v3810_v42 = vadd.f32 %v946_v45, %v923_v41  ;;  %v1596_v41 = vld [vmem:[#allocation12 + $0x248] sm:$0xff]  ;;  %v3828_v45 = vld [vmem:[#allocation11] sm:$0x3]  ;;  %1965 = vmatpush.msrb.mxu0 %v1585_v48  ;;  %1989 = vmatpush.msrb.mxu1 %v1735_v16 }
 0x17c   : > { %2010 = vmatpush.msrb.mxu2 %v1596_v41  ;;  %2030 = vmatpush.msrb.mxu3 %v1786_v46  ;;  %v1433_v55 = vperm.slane %v3828_v45, 0  ;;  %v1434_v18 = vperm.slane %v3828_v45, 1  ;;  %v1706_v41 = vld [vmem:[#allocation12 + $0x5b8] sm:$0xff]  ;;  %v1696_v48 = vld [vmem:[#allocation12 + $0x568] sm:$0xff] }
 0x17d   : > { %v3816_v8 = vpop.f32.mrf.mxu2  ;;  %1966 = vmatpush.msrb.mxu0 %v1575_v52  ;;  %1990 = vmatpush.msrb.mxu1 %v1725_v15 }
 0x17e   : > { %v3814_v2 = vpop.f32.mrf.mxu1  ;;  %2011 = vmatpush.msrb.mxu2 %v1586_v53  ;;  %2031 = vmatpush.msrb.mxu3 %v1776_v54  ;;  %v1685_v53 = vld [vmem:[#allocation12 + $0x510] sm:$0xff] }
 0x17f   : > { %1967 = vmatpush.msrb.mxu0 %v1565_v63  ;;  %v3841_v31 = vadd.f32 %v3814_v2, %v3812_v56  ;;  %1991 = vmatpush.msrb.mxu1 %v1715_v30  ;;  %v1695_v56 = vld [vmem:[#allocation12 + $0x560] sm:$0xff] }
 0x180   : > { %2012 = vmatpush.msrb.mxu2 %v1576_v59  ;;  %2032 = vmatpush.msrb.mxu3 %v1766_v61  ;;  %v1686_v59 = vld [vmem:[#allocation12 + $0x518] sm:$0xff] }
 0x181   : > { %1968 = vmatpush.msrb.mxu0 %v1555_v7  ;;  %v1475_v2 = vrot.slane %v3841_v31, 6  ;;  %1992 = vmatpush.msrb.mxu1 %v1705_v38 }
 0x182   : > { %2013 = vmatpush.msrb.mxu2 %v1566_v4  ;;  %2033 = vmatpush.msrb.mxu3 %v1756_v5 }
 0x183   : > { %v3820_v21 = vpop.f32.mrf.mxu0  ;;  %1969 = vmatpush.msrb.mxu0 %v1545_v13  ;;  %1993 = vmatpush.msrb.mxu1 %v1695_v56 }
 0x184   : > { %2014 = vmatpush.msrb.mxu2 %v1556_v11  ;;  %2034 = vmatpush.msrb.mxu3 %v1746_v12 }
 0x185   : > { %v3818_v19 = vpop.f32.mrf.mxu3  ;;  %1970 = vmatpush.msrb.mxu0 %v1535_v23  ;;  %1994 = vmatpush.msrb.mxu1 %v1685_v53 }
 0x186   : > { %2015 = vmatpush.msrb.mxu2 %v1546_v20  ;;  %2035 = vmatpush.msrb.mxu3 %v1736_v22  ;;  %v1242_v54 = vadd.f32 %v3818_v19, %v3816_v8 }
 0x187   : > { %1971 = vmatpush.msrb.mxu0 %v1525_v29 }
 0x188   : > { %2016 = vmatpush.msrb.mxu2 %v1536_v26  ;;  %2036 = vmatpush.msrb.mxu3 %v1726_v28 }
 0x189   : > { %v3824_v1 = vpop.f32.mrf.mxu2 }
 0x18a   : > { %v3822_v27 = vpop.f32.mrf.mxu1  ;;  %2017 = vmatpush.msrb.mxu2 %v1526_v35  ;;  %2037 = vmatpush.msrb.mxu3 %v1716_v36 }
 0x18b   : > { %v1199_v63 = vadd.f32 %v3822_v27, %v3820_v21 }
 0x18c   : > { %2038 = vmatpush.msrb.mxu3 %v1706_v41 }
 0x18d   : > { %v1264_v32 = vpop.f32.mrf.mxu0 }
 0x18e   : > { %2039 = vmatpush.msrb.mxu3 %v1696_v48  ;;  %v1667_v48 = vld [vmem:[#allocation12 + $0x480] sm:$0xff] }
 0x190   : > { %v3826_v43 = vpop.f32.mrf.mxu3  ;;  %2040 = vmatpush.msrb.mxu3 %v1686_v59  ;;  %v1658_v59 = vld [vmem:[#allocation12 + $0x438] sm:$0xff] }
 0x191   : > { %v1245_v12 = vadd.f32 %v3826_v43, %v3824_v1 }
 0x193   : > { %v1310_v14 = vpop.f32.mrf.mxu2  ;;  %v1479_v15 = vrot.slane %v1245_v12, 6  ;;  %v1828_v12 = vld [vmem:[#allocation12 + $0x988] sm:$0xff] }
 0x194   : > { %v1287_v60 = vpop.f32.mrf.mxu1 }
 0x195   : > { %v1288_v62 = vadd.f32 %v1287_v60, %v1264_v32 }
 0x197   : > { %v3833_v6 = vadd.f32 %v1433_v55, %v1288_v62  ;;  %v1267_v24 = vpop.f32.mrf.mxu0 }
 0x199   : > { %v1446_v17 = vrot.slane %v3833_v6, 7 }
 0x19a   : > { %v1333_v0 = vpop.f32.mrf.mxu3 }
 0x19b   : > { %1458 = vst [vmem:[#allocation2 + $0x28] sm:$0xfe] %v1446_v17  ;;  %v1334_v25 = vadd.f32 %v1333_v0, %v1310_v14  ;;  %v1477_v14 = vrot.slane %v1199_v63, 6 }
 0x19d   : > { %v3845_v34 = vadd.f32 %v1434_v18, %v1334_v25  ;;  %v1313_v32 = vpop.f32.mrf.mxu2 }
 0x19e   : > { %v1290_v37 = vpop.f32.mrf.mxu1 }
 0x19f   : > { %v1447_v9 = vrot.slane %v3845_v34, 7  ;;  %v1291_v39 = vadd.f32 %v1290_v37, %v1267_v24 }
 0x1a1   : > { %1459 = vst [vmem:[#allocation2 + $0x10] sm:$0xfe] %v1447_v9  ;;  %v1439_v46 = vadd.f32 %v1433_v55, %v1291_v39  ;;  %v1356_v61 = vpop.f32.mrf.mxu0  ;;  %v1476_v55 = vrot.slane %v1242_v54, 6 }
 0x1a2   : > { %v1464_v50 = vld [vmem:[#allocation2 + $0x28] sm:$0xfc] }
 0x1a3   : > { %v1487_v52 = vadd.f32 %v1475_v2, %v1464_v50  ;;  %v1448_v57 = vrot.slane %v1439_v46, 7  ;;  %v1480_v28 = vsel %vm1474_vm1, %v1476_v55, %v1479_v15  ;;  %v1668_v50 = vld [vmem:[#allocation12 + $0x488] sm:$0xff] }
 0x1a4   : > { %v1336_v60 = vpop.f32.mrf.mxu3 }
 0x1a5   : > { %1493 = vst [vmem:[#allocation2 + $0x28] sm:$0xfc] %v1487_v52  ;;  %v1337_v62 = vadd.f32 %v1336_v60, %v1313_v32  ;;  %v1449_v21 = vsel %vm1445_vm0, %v1446_v17, %v1448_v57 }
 0x1a6   : > { %1462 = vst [vmem:[#allocation2 + $0x18] sm:$0x1] %v1448_v57  ;;  %v1657_v57 = vld [vmem:[#allocation12 + $0x430] sm:$0xff] }
 0x1a7   : > { %v1440_v3 = vadd.f32 %v1434_v18, %v1337_v62  ;;  %v1379_v8 = vpop.f32.mrf.mxu1  ;;  %v1402_v10 = vpop.f32.mrf.mxu2  ;;  %v1478_v18 = vsel %vm1474_vm1, %v1475_v2, %v1477_v14  ;;  %v1678_v2 = vld [vmem:[#allocation12 + $0x4d8] sm:$0xff]  ;;  %v1647_v62 = vld [vmem:[#allocation12 + $0x3e0] sm:$0xff] }
 0x1a8   : > { %v1465_v19 = vld [vmem:[#allocation2 + $0x10] sm:$0xfc]  ;;  %v1380_v7 = vadd.f32 %v1379_v8, %v1356_v61  ;;  %v1489_v23 = vadd.f32 %v1478_v18, %v1449_v21 }
 0x1a9   : > { %v1488_v4 = vadd.f32 %v1476_v55, %v1465_v19  ;;  %v1450_v5 = vrot.slane %v1440_v3, 7  ;;  %v1359_v20 = vpop.f32.mrf.mxu0  ;;  %v1837_v55 = vld [vmem:[#allocation12 + $0x9d0] sm:$0xff]  ;;  %v1648_v19 = vld [vmem:[#allocation12 + $0x3e8] sm:$0xff]  ;;  %v1627_v21 = vld [vmem:[#allocation12 + $0x340] sm:$0xff] }
 0x1aa   : > { %v1807_v18 = vld [vmem:[#allocation12 + $0x8e0] sm:$0xff] }
 0x1ab   : > { %1494 = vst [vmem:[#allocation2 + $0x10] sm:$0xfc] %v1488_v4  ;;  %v1451_v43 = vsel %vm1445_vm0, %v1447_v9, %v1450_v5  ;;  %v1677_v9 = vld [vmem:[#allocation12 + $0x4d0] sm:$0xff]  ;;  %v1838_v4 = vld [vmem:[#allocation12 + $0x9d8] sm:$0xff] }
 0x1ac   : > { %1463 = vst [vmem:[#allocation2 + $0x20] sm:$0x1] %v1450_v5  ;;  %v1499_v11 = vld [vmem:[#allocation2 + $0x28] sm:$0xff]  ;;  %v1490_v36 = vadd.f32 %v1480_v28, %v1451_v43  ;;  %v1587_v28 = vld [vmem:[#allocation12 + $0x200] sm:$0xff] }
 0x1ad   : > { %v1468_v27 = vld [vmem:[#allocation2 + $0x18] sm:$0x3]  ;;  %v1503_v45 = vadd.f32 %v1499_v11, %v1380_v7  ;;  %v1425_v13 = vpop.f32.mrf.mxu3  ;;  %v1637_v5 = vld [vmem:[#allocation12 + $0x390] sm:$0xff]  ;;  %v1638_v11 = vld [vmem:[#allocation12 + $0x398] sm:$0xff] }
 0x1ae   : > { %v1491_v16 = vadd.f32 %v1477_v14, %v1468_v27  ;;  %v1426_v24 = vadd.f32 %v1425_v13, %v1402_v10  ;;  %v1827_v14 = vld [vmem:[#allocation12 + $0x980] sm:$0xff]  ;;  %v1817_v27 = vld [vmem:[#allocation12 + $0x930] sm:$0xff]  ;;  %v1818_v13 = vld [vmem:[#allocation12 + $0x938] sm:$0xff] }
 0x1af   : > { %1507 = vst [vmem:[#allocation2 + $0x28] sm:$0xff] %v1503_v45  ;;  %v1382_v22 = vpop.f32.mrf.mxu1  ;;  %v1405_v29 = vpop.f32.mrf.mxu2  ;;  %v1628_v45 = vld [vmem:[#allocation12 + $0x348] sm:$0xff]  ;;  %v1597_v43 = vld [vmem:[#allocation12 + $0x250] sm:$0xff] }
 0x1b0   : > { %1497 = vst [vmem:[#allocation2 + $0x18] sm:$0x3] %v1491_v16  ;;  %v1383_v0 = vadd.f32 %v1382_v22, %v1359_v20  ;;  %v1617_v16 = vld [vmem:[#allocation12 + $0x2f0] sm:$0xff]  ;;  %v1618_v22 = vld [vmem:[#allocation12 + $0x2f8] sm:$0xff] }
 0x1b2   : > { %v1500_v25 = vld [vmem:[#allocation2 + $0x10] sm:$0xff]  ;;  %v1505_v1 = vadd.f32 %v1489_v23, %v1383_v0  ;;  %v1808_v0 = vld [vmem:[#allocation12 + $0x8e8] sm:$0xff] }
 0x1b3   : > { %v1469_v6 = vld [vmem:[#allocation2 + $0x20] sm:$0x3]  ;;  %v1504_v17 = vadd.f32 %v1500_v25, %v1426_v24  ;;  %v1607_v23 = vld [vmem:[#allocation12 + $0x2a0] sm:$0xff] }
 0x1b4   : > { %v1492_v26 = vadd.f32 %v1479_v15, %v1469_v6  ;;  %v1519_v31 = vmax.f32 %v1505_v1, 0.0  ;;  %v1797_v15 = vld [vmem:[#allocation12 + $0x890] sm:$0xff]  ;;  %v1608_v25 = vld [vmem:[#allocation12 + $0x2a8] sm:$0xff]  ;;  %v1798_v1 = vld [vmem:[#allocation12 + $0x898] sm:$0xff] }
 0x1b5   : > { %1508 = vst [vmem:[#allocation2 + $0x10] sm:$0xff] %v1504_v17  ;;  %v1428_v30 = vpop.f32.mrf.mxu3  ;;  %v1787_v6 = vld [vmem:[#allocation12 + $0x840] sm:$0xff]  ;;  %v1598_v17 = vld [vmem:[#allocation12 + $0x258] sm:$0xff] }
 0x1b6   : > { %1498 = vst [vmem:[#allocation2 + $0x20] sm:$0x3] %v1492_v26  ;;  %v1429_v35 = vadd.f32 %v1428_v30, %v1405_v29  ;;  %v1511_v37 = vld [vmem:[#allocation2 + $0x28] sm:$0xfe]  ;;  %v1851_v56 = vrot.slane %v1519_v31, 1  ;;  %v1788_v26 = vld [vmem:[#allocation12 + $0x848] sm:$0xff] }
 0x1b7   : > { %v1517_v38 = vmax.f32 %v1511_v37, 0.0  ;;  %v1515_v34 = vld [vmem:[#allocation2 + $0x18] sm:$0x1]  ;;  %v1777_v29 = vld [vmem:[#allocation12 + $0x7f0] sm:$0xff]  ;;  %v1588_v30 = vld [vmem:[#allocation12 + $0x208] sm:$0xff] }
 0x1b8   : > { %v1506_v39 = vadd.f32 %v1490_v36, %v1429_v35  ;;  %v1521_v54 = vmax.f32 %v1515_v34, 0.0  ;;  %v1778_v31 = vld [vmem:[#allocation12 + $0x7f8] sm:$0xff]  ;;  %v1577_v35 = vld [vmem:[#allocation12 + $0x1b0] sm:$0xff]  ;;  %v1767_v36 = vld [vmem:[#allocation12 + $0x7a0] sm:$0xff] }
 0x1b9   : > { %v1850_v41 = vrot.slane %v1517_v38, 1  ;;  %v1578_v37 = vld [vmem:[#allocation12 + $0x1b8] sm:$0xff]  ;;  %v1768_v38 = vld [vmem:[#allocation12 + $0x7a8] sm:$0xff] }
 0x1ba   : > { %v1520_v32 = vmax.f32 %v1506_v39, 0.0  ;;  %v1856_v63 = vrot.slane %v1521_v54, 1  ;;  %v1567_v39 = vld [vmem:[#allocation12 + $0x160] sm:$0xff]  ;;  %v1758_v34 = vld [vmem:[#allocation12 + $0x758] sm:$0xff]  ;;  %v1548_v54 = vld [vmem:[#allocation12 + $0xc8] sm:$0xff] }
 0x1bb   : > { %v3870_v46 = vsel %vm1849_vm2, %v1850_v41, %v1851_v56  ;;  %v1757_v41 = vld [vmem:[#allocation12 + $0x750] sm:$0xff] }
 0x1bc   : > { %1880 = vmatmul.f32.vlgmr.msra.gmra.mxu0 %v3870_v46  ;;  %1926 = vmatmul.f32.vlgmr.msra.gmra.mxu2 %v3870_v46  ;;  %v1512_v53 = vld [vmem:[#allocation2 + $0x10] sm:$0xfe]  ;;  %v1854_v61 = vrot.slane %v1520_v32, 1  ;;  %v3880_v10 = vsel %vm1849_vm2, %v1851_v56, %v1856_v63  ;;  %v1568_v56 = vld [vmem:[#allocation12 + $0x168] sm:$0xff] }
 0x1bd   : > { %2048 = vmatpush.msra.mxu0 %v1677_v9  ;;  %2094 = vmatpush.msra.mxu2 %v1678_v2  ;;  %v1518_v52 = vmax.f32 %v1512_v53, 0.0  ;;  %v1516_v3 = vld [vmem:[#allocation2 + $0x20] sm:$0x1]  ;;  %v1557_v9 = vld [vmem:[#allocation12 + $0x110] sm:$0xff]  ;;  %v1747_v2 = vld [vmem:[#allocation12 + $0x700] sm:$0xff] }
 0x1be   : > { %v1522_v7 = vmax.f32 %v1516_v3, 0.0  ;;  %v1558_v32 = vld [vmem:[#allocation12 + $0x118] sm:$0xff]  ;;  %v1737_v53 = vld [vmem:[#allocation12 + $0x6b0] sm:$0xff]  ;;  %v1528_v63 = vld [vmem:[#allocation12 + $0x28] sm:$0xff] }
 0x1bf   : > { %2049 = vmatpush.msra.mxu0 %v1667_v48  ;;  %2095 = vmatpush.msra.mxu2 %v1668_v50  ;;  %v1853_v60 = vrot.slane %v1518_v52, 1  ;;  %v1748_v48 = vld [vmem:[#allocation12 + $0x708] sm:$0xff]  ;;  %v1547_v50 = vld [vmem:[#allocation12 + $0xc0] sm:$0xff]  ;;  %v1738_v52 = vld [vmem:[#allocation12 + $0x6b8] sm:$0xff] }
 0x1c0   : > { %v1858_v20 = vrot.slane %v1522_v7, 1  ;;  %v1718_v3 = vld [vmem:[#allocation12 + $0x618] sm:$0xff]  ;;  %v1669_v7 = vld [vmem:[#allocation12 + $0x490] sm:$0xff] }
 0x1c1   : > { %2050 = vmatpush.msra.mxu0 %v1657_v57  ;;  %2096 = vmatpush.msra.mxu2 %v1658_v59  ;;  %v3875_v8 = vsel %vm1849_vm2, %v1853_v60, %v1854_v61  ;;  %v1537_v57 = vld [vmem:[#allocation12 + $0x70] sm:$0xff]  ;;  %v1727_v59 = vld [vmem:[#allocation12 + $0x660] sm:$0xff]  ;;  %v1538_v60 = vld [vmem:[#allocation12 + $0x78] sm:$0xff] }
 0x1c2   : > { %1903 = vmatmul.f32.vlgmr.msra.gmra.mxu1 %v3875_v8  ;;  %1949 = vmatmul.f32.vlgmr.msra.gmra.mxu3 %v3875_v8  ;;  %v3885_v24 = vsel %vm1849_vm2, %v1854_v61, %v1858_v20  ;;  %v1728_v61 = vld [vmem:[#allocation12 + $0x668] sm:$0xff]  ;;  %v1839_v20 = vld [vmem:[#allocation12 + $0x9e0] sm:$0xff] }
 0x1c3   : > { %2051 = vmatpush.msra.mxu0 %v1647_v62  ;;  %2071 = vmatpush.msra.mxu1 %v1837_v55  ;;  %v1527_v62 = vld [vmem:[#allocation12 + $0x20] sm:$0xff]  ;;  %v1717_v55 = vld [vmem:[#allocation12 + $0x610] sm:$0xff] }
 0x1c4   : > { %2097 = vmatpush.msra.mxu2 %v1648_v19  ;;  %2117 = vmatpush.msra.mxu3 %v1838_v4  ;;  %v1679_v19 = vld [vmem:[#allocation12 + $0x4e0] sm:$0xff]  ;;  %v1680_v4 = vld [vmem:[#allocation12 + $0x4e8] sm:$0xff] }
 0x1c5   : > { %1883 = vmatmul.f32.gmra.mxu0 %v3880_v10  ;;  %1929 = vmatmul.f32.gmra.mxu2 %v3880_v10 }
 0x1c6   : > { %2052 = vmatpush.msra.mxu0 %v1637_v5  ;;  %2072 = vmatpush.msra.mxu1 %v1827_v14  ;;  %v1707_v5 = vld [vmem:[#allocation12 + $0x5c0] sm:$0xff]  ;;  %v1708_v14 = vld [vmem:[#allocation12 + $0x5c8] sm:$0xff] }
 0x1c7   : > { %2098 = vmatpush.msra.mxu2 %v1638_v11  ;;  %2118 = vmatpush.msra.mxu3 %v1828_v12  ;;  %v1670_v11 = vld [vmem:[#allocation12 + $0x498] sm:$0xff]  ;;  %v1697_v12 = vld [vmem:[#allocation12 + $0x570] sm:$0xff] }
 0x1c8   : > { %2053 = vmatpush.msra.mxu0 %v1627_v21  ;;  %2073 = vmatpush.msra.mxu1 %v1817_v27  ;;  %v1698_v21 = vld [vmem:[#allocation12 + $0x578] sm:$0xff]  ;;  %v1659_v27 = vld [vmem:[#allocation12 + $0x440] sm:$0xff] }
 0x1c9   : > { %2099 = vmatpush.msra.mxu2 %v1628_v45  ;;  %2119 = vmatpush.msra.mxu3 %v1818_v13  ;;  %v1660_v45 = vld [vmem:[#allocation12 + $0x448] sm:$0xff]  ;;  %v1687_v13 = vld [vmem:[#allocation12 + $0x520] sm:$0xff] }
 0x1ca   : > { %2054 = vmatpush.msra.mxu0 %v1617_v16  ;;  %2074 = vmatpush.msra.mxu1 %v1807_v18  ;;  %v1688_v16 = vld [vmem:[#allocation12 + $0x528] sm:$0xff]  ;;  %v1649_v18 = vld [vmem:[#allocation12 + $0x3f0] sm:$0xff] }
 0x1cb   : > { %2100 = vmatpush.msra.mxu2 %v1618_v22  ;;  %2120 = vmatpush.msra.mxu3 %v1808_v0  ;;  %v1650_v22 = vld [vmem:[#allocation12 + $0x3f8] sm:$0xff]  ;;  %v1840_v0 = vld [vmem:[#allocation12 + $0x9e8] sm:$0xff] }
 0x1cc   : > { %1906 = vmatmul.f32.gmra.mxu1 %v3885_v24  ;;  %1952 = vmatmul.f32.gmra.mxu3 %v3885_v24 }
 0x1cd   : > { %2055 = vmatpush.msra.mxu0 %v1607_v23  ;;  %2075 = vmatpush.msra.mxu1 %v1797_v15  ;;  %v1639_v23 = vld [vmem:[#allocation12 + $0x3a0] sm:$0xff]  ;;  %v1829_v15 = vld [vmem:[#allocation12 + $0x990] sm:$0xff] }
 0x1ce   : > { %2101 = vmatpush.msra.mxu2 %v1608_v25  ;;  %2121 = vmatpush.msra.mxu3 %v1798_v1  ;;  %v1640_v25 = vld [vmem:[#allocation12 + $0x3a8] sm:$0xff]  ;;  %v1830_v1 = vld [vmem:[#allocation12 + $0x998] sm:$0xff] }
 0x1cf   : > { %1972 = vmatmul.f32.vlgmr.msrb.gmra.mxu0 %v3870_v46  ;;  %2018 = vmatmul.f32.vlgmr.msrb.gmra.mxu2 %v3870_v46 }
 0x1d0   : > { %2056 = vmatpush.msra.mxu0 %v1597_v43  ;;  %2076 = vmatpush.msra.mxu1 %v1787_v6  ;;  %v1629_v43 = vld [vmem:[#allocation12 + $0x350] sm:$0xff]  ;;  %v1819_v6 = vld [vmem:[#allocation12 + $0x940] sm:$0xff] }
 0x1d1   : > { %2102 = vmatpush.msra.mxu2 %v1598_v17  ;;  %2122 = vmatpush.msra.mxu3 %v1788_v26  ;;  %v1630_v17 = vld [vmem:[#allocation12 + $0x358] sm:$0xff]  ;;  %v1820_v26 = vld [vmem:[#allocation12 + $0x948] sm:$0xff] }
 0x1d2   : > { %2057 = vmatpush.msra.mxu0 %v1587_v28  ;;  %2077 = vmatpush.msra.mxu1 %v1777_v29  ;;  %v1619_v28 = vld [vmem:[#allocation12 + $0x300] sm:$0xff]  ;;  %v1809_v29 = vld [vmem:[#allocation12 + $0x8f0] sm:$0xff] }
 0x1d3   : > { %2103 = vmatpush.msra.mxu2 %v1588_v30  ;;  %2123 = vmatpush.msra.mxu3 %v1778_v31  ;;  %v1620_v30 = vld [vmem:[#allocation12 + $0x308] sm:$0xff]  ;;  %v1810_v31 = vld [vmem:[#allocation12 + $0x8f8] sm:$0xff] }
 0x1d4   : > { %2058 = vmatpush.msra.mxu0 %v1577_v35  ;;  %2078 = vmatpush.msra.mxu1 %v1767_v36  ;;  %v1609_v35 = vld [vmem:[#allocation12 + $0x2b0] sm:$0xff]  ;;  %v1799_v36 = vld [vmem:[#allocation12 + $0x8a0] sm:$0xff] }
 0x1d5   : > { %2104 = vmatpush.msra.mxu2 %v1578_v37  ;;  %2124 = vmatpush.msra.mxu3 %v1768_v38  ;;  %v1610_v37 = vld [vmem:[#allocation12 + $0x2b8] sm:$0xff]  ;;  %v1800_v38 = vld [vmem:[#allocation12 + $0x8a8] sm:$0xff] }
 0x1d6   : > { %1995 = vmatmul.f32.vlgmr.msrb.gmra.mxu1 %v3875_v8  ;;  %2041 = vmatmul.f32.vlgmr.msrb.gmra.mxu3 %v3875_v8 }
 0x1d7   : > { %2059 = vmatpush.msra.mxu0 %v1567_v39  ;;  %2079 = vmatpush.msra.mxu1 %v1757_v41  ;;  %v1599_v39 = vld [vmem:[#allocation12 + $0x260] sm:$0xff]  ;;  %v1789_v41 = vld [vmem:[#allocation12 + $0x850] sm:$0xff] }
 0x1d8   : > { %2105 = vmatpush.msra.mxu2 %v1568_v56  ;;  %2125 = vmatpush.msra.mxu3 %v1758_v34  ;;  %v1600_v56 = vld [vmem:[#allocation12 + $0x268] sm:$0xff]  ;;  %v1790_v34 = vld [vmem:[#allocation12 + $0x858] sm:$0xff] }
 0x1d9   : > { %1975 = vmatmul.f32.gmra.mxu0 %v3880_v10  ;;  %2021 = vmatmul.f32.gmra.mxu2 %v3880_v10 }
 0x1da   : > { %2060 = vmatpush.msra.mxu0 %v1557_v9  ;;  %2080 = vmatpush.msra.mxu1 %v1747_v2  ;;  %v1589_v9 = vld [vmem:[#allocation12 + $0x210] sm:$0xff]  ;;  %v1779_v2 = vld [vmem:[#allocation12 + $0x800] sm:$0xff] }
 0x1db   : > { %2106 = vmatpush.msra.mxu2 %v1558_v32  ;;  %2126 = vmatpush.msra.mxu3 %v1748_v48  ;;  %v1590_v32 = vld [vmem:[#allocation12 + $0x218] sm:$0xff]  ;;  %v1780_v48 = vld [vmem:[#allocation12 + $0x808] sm:$0xff] }
 0x1dc   : > { %2061 = vmatpush.msra.mxu0 %v1547_v50  ;;  %2081 = vmatpush.msra.mxu1 %v1737_v53  ;;  %v1579_v50 = vld [vmem:[#allocation12 + $0x1c0] sm:$0xff]  ;;  %v1769_v53 = vld [vmem:[#allocation12 + $0x7b0] sm:$0xff] }
 0x1dd   : > { %2107 = vmatpush.msra.mxu2 %v1548_v54  ;;  %2127 = vmatpush.msra.mxu3 %v1738_v52  ;;  %v1580_v54 = vld [vmem:[#allocation12 + $0x1c8] sm:$0xff]  ;;  %v1770_v52 = vld [vmem:[#allocation12 + $0x7b8] sm:$0xff] }
 0x1de   : > { %2062 = vmatpush.msra.mxu0 %v1537_v57  ;;  %2082 = vmatpush.msra.mxu1 %v1727_v59  ;;  %v1569_v57 = vld [vmem:[#allocation12 + $0x170] sm:$0xff]  ;;  %v1759_v59 = vld [vmem:[#allocation12 + $0x760] sm:$0xff] }
 0x1df   : > { %2108 = vmatpush.msra.mxu2 %v1538_v60  ;;  %2128 = vmatpush.msra.mxu3 %v1728_v61  ;;  %v1570_v60 = vld [vmem:[#allocation12 + $0x178] sm:$0xff]  ;;  %v1760_v61 = vld [vmem:[#allocation12 + $0x768] sm:$0xff] }
 0x1e0   : > { %1998 = vmatmul.f32.gmra.mxu1 %v3885_v24  ;;  %2044 = vmatmul.f32.gmra.mxu3 %v3885_v24 }
 0x1e1   : > { %2063 = vmatpush.msra.mxu0 %v1527_v62  ;;  %2083 = vmatpush.msra.mxu1 %v1717_v55  ;;  %v1559_v62 = vld [vmem:[#allocation12 + $0x120] sm:$0xff]  ;;  %v1749_v55 = vld [vmem:[#allocation12 + $0x710] sm:$0xff] }
 0x1e2   : > { %2109 = vmatpush.msra.mxu2 %v1528_v63  ;;  %2129 = vmatpush.msra.mxu3 %v1718_v3  ;;  %v1560_v63 = vld [vmem:[#allocation12 + $0x128] sm:$0xff]  ;;  %v1750_v3 = vld [vmem:[#allocation12 + $0x718] sm:$0xff] }
 0x1e3   : > { %2140 = vmatpush.msrb.mxu0 %v1679_v19  ;;  %2084 = vmatpush.msra.mxu1 %v1707_v5  ;;  %v1549_v19 = vld [vmem:[#allocation12 + $0xd0] sm:$0xff]  ;;  %v1550_v5 = vld [vmem:[#allocation12 + $0xd8] sm:$0xff] }
 0x1e4   : > { %2186 = vmatpush.msrb.mxu2 %v1680_v4  ;;  %2064 = vmatmul.f32.vlgmr.msra.gmra.mxu0 %v3870_v46  ;;  %v1739_v4 = vld [vmem:[#allocation12 + $0x6c0] sm:$0xff] }
 0x1e5   : > { %2110 = vmatmul.f32.vlgmr.msra.gmra.mxu2 %v3870_v46  ;;  %2130 = vmatpush.msra.mxu3 %v1708_v14  ;;  %v1740_v14 = vld [vmem:[#allocation12 + $0x6c8] sm:$0xff] }
 0x1e6   : > { %2141 = vmatpush.msrb.mxu0 %v1669_v7  ;;  %2187 = vmatpush.msrb.mxu2 %v1670_v11  ;;  %v1539_v7 = vld [vmem:[#allocation12 + $0x80] sm:$0xff]  ;;  %v1729_v11 = vld [vmem:[#allocation12 + $0x670] sm:$0xff] }
 0x1e7   : > { %2085 = vmatpush.msra.mxu1 %v1697_v12  ;;  %2131 = vmatpush.msra.mxu3 %v1698_v21  ;;  %v1540_v12 = vld [vmem:[#allocation12 + $0x88] sm:$0xff]  ;;  %v1730_v21 = vld [vmem:[#allocation12 + $0x678] sm:$0xff] }
 0x1e8   : > { %2142 = vmatpush.msrb.mxu0 %v1659_v27  ;;  %2188 = vmatpush.msrb.mxu2 %v1660_v45  ;;  %v1529_v27 = vld [vmem:[#allocation12 + $0x30] sm:$0xff]  ;;  %v1719_v45 = vld [vmem:[#allocation12 + $0x620] sm:$0xff] }
 0x1e9   : > { %2086 = vmatpush.msra.mxu1 %v1687_v13  ;;  %2132 = vmatpush.msra.mxu3 %v1688_v16  ;;  %v1530_v13 = vld [vmem:[#allocation12 + $0x38] sm:$0xff]  ;;  %v1720_v16 = vld [vmem:[#allocation12 + $0x628] sm:$0xff] }
 0x1ea   : > { %2143 = vmatpush.msrb.mxu0 %v1649_v18  ;;  %2189 = vmatpush.msrb.mxu2 %v1650_v22  ;;  %v1681_v18 = vld [vmem:[#allocation12 + $0x4f0] sm:$0xff] }
 0x1eb   : > { %2163 = vmatpush.msrb.mxu1 %v1839_v20  ;;  %2209 = vmatpush.msrb.mxu3 %v1840_v0  ;;  %v1682_v20 = vld [vmem:[#allocation12 + $0x4f8] sm:$0xff]  ;;  %v1709_v22 = vld [vmem:[#allocation12 + $0x5d0] sm:$0xff] }
 0x1ec   : > { %2087 = vmatmul.f32.vlgmr.msra.gmra.mxu1 %v3875_v8  ;;  %2133 = vmatmul.f32.vlgmr.msra.gmra.mxu3 %v3875_v8  ;;  %v1710_v0 = vld [vmem:[#allocation12 + $0x5d8] sm:$0xff] }
 0x1ed   : > { %2144 = vmatpush.msrb.mxu0 %v1639_v23  ;;  %2164 = vmatpush.msrb.mxu1 %v1829_v15  ;;  %v1671_v23 = vld [vmem:[#allocation12 + $0x4a0] sm:$0xff]  ;;  %v1672_v15 = vld [vmem:[#allocation12 + $0x4a8] sm:$0xff] }
 0x1ee   : > { %2190 = vmatpush.msrb.mxu2 %v1640_v25  ;;  %2210 = vmatpush.msrb.mxu3 %v1830_v1  ;;  %v1699_v25 = vld [vmem:[#allocation12 + $0x580] sm:$0xff]  ;;  %v1700_v1 = vld [vmem:[#allocation12 + $0x588] sm:$0xff] }
 0x1ef   : > { %2067 = vmatmul.f32.gmra.mxu0 %v3880_v10  ;;  %2113 = vmatmul.f32.gmra.mxu2 %v3880_v10 }
 0x1f0   : > { %2145 = vmatpush.msrb.mxu0 %v1629_v43  ;;  %2165 = vmatpush.msrb.mxu1 %v1819_v6  ;;  %v1661_v43 = vld [vmem:[#allocation12 + $0x450] sm:$0xff]  ;;  %v1662_v6 = vld [vmem:[#allocation12 + $0x458] sm:$0xff] }
 0x1f1   : > { %2191 = vmatpush.msrb.mxu2 %v1630_v17  ;;  %2211 = vmatpush.msrb.mxu3 %v1820_v26  ;;  %v1689_v17 = vld [vmem:[#allocation12 + $0x530] sm:$0xff]  ;;  %v1690_v26 = vld [vmem:[#allocation12 + $0x538] sm:$0xff] }
 0x1f2   : > { %2146 = vmatpush.msrb.mxu0 %v1619_v28  ;;  %2166 = vmatpush.msrb.mxu1 %v1809_v29  ;;  %v1651_v28 = vld [vmem:[#allocation12 + $0x400] sm:$0xff]  ;;  %v1841_v29 = vld [vmem:[#allocation12 + $0x9f0] sm:$0xff] }
 0x1f3   : > { %2192 = vmatpush.msrb.mxu2 %v1620_v30  ;;  %2212 = vmatpush.msrb.mxu3 %v1810_v31  ;;  %v1652_v30 = vld [vmem:[#allocation12 + $0x408] sm:$0xff]  ;;  %v1842_v31 = vld [vmem:[#allocation12 + $0x9f8] sm:$0xff] }
 0x1f4   : > { %2147 = vmatpush.msrb.mxu0 %v1609_v35  ;;  %2167 = vmatpush.msrb.mxu1 %v1799_v36  ;;  %v1641_v35 = vld [vmem:[#allocation12 + $0x3b0] sm:$0xff]  ;;  %v1831_v36 = vld [vmem:[#allocation12 + $0x9a0] sm:$0xff] }
 0x1f5   : > { %2193 = vmatpush.msrb.mxu2 %v1610_v37  ;;  %2213 = vmatpush.msrb.mxu3 %v1800_v38  ;;  %v1642_v37 = vld [vmem:[#allocation12 + $0x3b8] sm:$0xff]  ;;  %v1832_v38 = vld [vmem:[#allocation12 + $0x9a8] sm:$0xff] }
 0x1f6   : > { %2090 = vmatmul.f32.gmra.mxu1 %v3885_v24  ;;  %2136 = vmatmul.f32.gmra.mxu3 %v3885_v24 }
 0x1f7   : > { %2148 = vmatpush.msrb.mxu0 %v1599_v39  ;;  %2168 = vmatpush.msrb.mxu1 %v1789_v41  ;;  %v1631_v39 = vld [vmem:[#allocation12 + $0x360] sm:$0xff]  ;;  %v1821_v41 = vld [vmem:[#allocation12 + $0x950] sm:$0xff] }
 0x1f8   : > { %2194 = vmatpush.msrb.mxu2 %v1600_v56  ;;  %2214 = vmatpush.msrb.mxu3 %v1790_v34  ;;  %v1632_v56 = vld [vmem:[#allocation12 + $0x368] sm:$0xff]  ;;  %v1822_v34 = vld [vmem:[#allocation12 + $0x958] sm:$0xff] }
 0x1f9   : > { %2149 = vmatpush.msrb.mxu0 %v1589_v9  ;;  %2169 = vmatpush.msrb.mxu1 %v1779_v2  ;;  %v1621_v9 = vld [vmem:[#allocation12 + $0x310] sm:$0xff]  ;;  %v1811_v2 = vld [vmem:[#allocation12 + $0x900] sm:$0xff] }
 0x1fa   : > { %2195 = vmatpush.msrb.mxu2 %v1590_v32  ;;  %2215 = vmatpush.msrb.mxu3 %v1780_v48  ;;  %v1622_v32 = vld [vmem:[#allocation12 + $0x318] sm:$0xff]  ;;  %v1812_v48 = vld [vmem:[#allocation12 + $0x908] sm:$0xff] }
 0x1fb   : > { %2150 = vmatpush.msrb.mxu0 %v1579_v50  ;;  %2170 = vmatpush.msrb.mxu1 %v1769_v53  ;;  %v1611_v50 = vld [vmem:[#allocation12 + $0x2c0] sm:$0xff]  ;;  %v1801_v53 = vld [vmem:[#allocation12 + $0x8b0] sm:$0xff] }
 0x1fc   : > { %2196 = vmatpush.msrb.mxu2 %v1580_v54  ;;  %2216 = vmatpush.msrb.mxu3 %v1770_v52  ;;  %v1612_v54 = vld [vmem:[#allocation12 + $0x2c8] sm:$0xff]  ;;  %v1802_v52 = vld [vmem:[#allocation12 + $0x8b8] sm:$0xff] }
 0x1fd   : > { %2151 = vmatpush.msrb.mxu0 %v1569_v57  ;;  %2171 = vmatpush.msrb.mxu1 %v1759_v59  ;;  %v1601_v57 = vld [vmem:[#allocation12 + $0x270] sm:$0xff]  ;;  %v1791_v59 = vld [vmem:[#allocation12 + $0x860] sm:$0xff] }
 0x1fe   : > { %2197 = vmatpush.msrb.mxu2 %v1570_v60  ;;  %2217 = vmatpush.msrb.mxu3 %v1760_v61  ;;  %v1602_v60 = vld [vmem:[#allocation12 + $0x278] sm:$0xff]  ;;  %v1792_v61 = vld [vmem:[#allocation12 + $0x868] sm:$0xff] }
 0x1ff   : > { %2152 = vmatpush.msrb.mxu0 %v1559_v62  ;;  %2172 = vmatpush.msrb.mxu1 %v1749_v55  ;;  %v1591_v62 = vld [vmem:[#allocation12 + $0x220] sm:$0xff]  ;;  %v1781_v55 = vld [vmem:[#allocation12 + $0x810] sm:$0xff] }
 0x200   : > { %2198 = vmatpush.msrb.mxu2 %v1560_v63  ;;  %2218 = vmatpush.msrb.mxu3 %v1750_v3  ;;  %v1592_v63 = vld [vmem:[#allocation12 + $0x228] sm:$0xff]  ;;  %v1782_v3 = vld [vmem:[#allocation12 + $0x818] sm:$0xff] }
 0x201   : > { %2153 = vmatpush.msrb.mxu0 %v1549_v19  ;;  %2173 = vmatpush.msrb.mxu1 %v1739_v4  ;;  %v1581_v19 = vld [vmem:[#allocation12 + $0x1d0] sm:$0xff]  ;;  %v1771_v4 = vld [vmem:[#allocation12 + $0x7c0] sm:$0xff] }
 0x202   : > { %2199 = vmatpush.msrb.mxu2 %v1550_v5  ;;  %2219 = vmatpush.msrb.mxu3 %v1740_v14  ;;  %v1582_v5 = vld [vmem:[#allocation12 + $0x1d8] sm:$0xff]  ;;  %v1772_v14 = vld [vmem:[#allocation12 + $0x7c8] sm:$0xff] }
 0x203   : > { %2154 = vmatpush.msrb.mxu0 %v1539_v7  ;;  %2174 = vmatpush.msrb.mxu1 %v1729_v11  ;;  %v1571_v7 = vld [vmem:[#allocation12 + $0x180] sm:$0xff]  ;;  %v1761_v11 = vld [vmem:[#allocation12 + $0x770] sm:$0xff] }
 0x204   : > { %2200 = vmatpush.msrb.mxu2 %v1540_v12  ;;  %2220 = vmatpush.msrb.mxu3 %v1730_v21  ;;  %v1572_v12 = vld [vmem:[#allocation12 + $0x188] sm:$0xff]  ;;  %v1762_v21 = vld [vmem:[#allocation12 + $0x778] sm:$0xff] }
 0x205   : > { %2155 = vmatpush.msrb.mxu0 %v1529_v27  ;;  %2175 = vmatpush.msrb.mxu1 %v1719_v45  ;;  %v1561_v27 = vld [vmem:[#allocation12 + $0x130] sm:$0xff]  ;;  %v1751_v45 = vld [vmem:[#allocation12 + $0x720] sm:$0xff] }
 0x206   : > { %2201 = vmatpush.msrb.mxu2 %v1530_v13  ;;  %2221 = vmatpush.msrb.mxu3 %v1720_v16  ;;  %v1562_v13 = vld [vmem:[#allocation12 + $0x138] sm:$0xff]  ;;  %v1752_v16 = vld [vmem:[#allocation12 + $0x728] sm:$0xff] }
 0x207   : > { %2156 = vmatmul.f32.vlgmr.msrb.gmra.mxu0 %v3870_v46  ;;  %2202 = vmatmul.f32.vlgmr.msrb.gmra.mxu2 %v3870_v46 }
 0x208   : > { %2232 = vmatpush.msra.mxu0 %v1681_v18  ;;  %2278 = vmatpush.msra.mxu2 %v1682_v20  ;;  %v1551_v18 = vld [vmem:[#allocation12 + $0xe0] sm:$0xff]  ;;  %v1741_v20 = vld [vmem:[#allocation12 + $0x6d0] sm:$0xff] }
 0x209   : > { %2176 = vmatpush.msrb.mxu1 %v1709_v22  ;;  %2222 = vmatpush.msrb.mxu3 %v1710_v0  ;;  %v1552_v22 = vld [vmem:[#allocation12 + $0xe8] sm:$0xff]  ;;  %v1742_v0 = vld [vmem:[#allocation12 + $0x6d8] sm:$0xff] }
 0x20a   : > { %2233 = vmatpush.msra.mxu0 %v1671_v23  ;;  %2279 = vmatpush.msra.mxu2 %v1672_v15  ;;  %v1541_v23 = vld [vmem:[#allocation12 + $0x90] sm:$0xff]  ;;  %v1731_v15 = vld [vmem:[#allocation12 + $0x680] sm:$0xff] }
 0x20b   : > { %2177 = vmatpush.msrb.mxu1 %v1699_v25  ;;  %2223 = vmatpush.msrb.mxu3 %v1700_v1  ;;  %v1542_v25 = vld [vmem:[#allocation12 + $0x98] sm:$0xff]  ;;  %v1732_v1 = vld [vmem:[#allocation12 + $0x688] sm:$0xff] }
 0x20c   : > { %2234 = vmatpush.msra.mxu0 %v1661_v43  ;;  %2280 = vmatpush.msra.mxu2 %v1662_v6  ;;  %v1531_v43 = vld [vmem:[#allocation12 + $0x40] sm:$0xff]  ;;  %v1721_v6 = vld [vmem:[#allocation12 + $0x630] sm:$0xff] }
 0x20d   : > { %2178 = vmatpush.msrb.mxu1 %v1689_v17  ;;  %2224 = vmatpush.msrb.mxu3 %v1690_v26  ;;  %v1532_v17 = vld [vmem:[#allocation12 + $0x48] sm:$0xff]  ;;  %v1722_v26 = vld [vmem:[#allocation12 + $0x638] sm:$0xff] }
 0x20e   : > { %2179 = vmatmul.f32.vlgmr.msrb.gmra.mxu1 %v3875_v8  ;;  %2225 = vmatmul.f32.vlgmr.msrb.gmra.mxu3 %v3875_v8 }
 0x20f   : > { %2235 = vmatpush.msra.mxu0 %v1651_v28  ;;  %2255 = vmatpush.msra.mxu1 %v1841_v29  ;;  %v1711_v28 = vld [vmem:[#allocation12 + $0x5e0] sm:$0xff]  ;;  %v1712_v29 = vld [vmem:[#allocation12 + $0x5e8] sm:$0xff] }
 0x210   : > { %2281 = vmatpush.msra.mxu2 %v1652_v30  ;;  %2301 = vmatpush.msra.mxu3 %v1842_v31  ;;  %v1701_v30 = vld [vmem:[#allocation12 + $0x590] sm:$0xff]  ;;  %v1702_v31 = vld [vmem:[#allocation12 + $0x598] sm:$0xff] }
 0x211   : > { %2159 = vmatmul.f32.gmra.mxu0 %v3880_v10  ;;  %2205 = vmatmul.f32.gmra.mxu2 %v3880_v10 }
 0x212   : > { %2236 = vmatpush.msra.mxu0 %v1641_v35  ;;  %2256 = vmatpush.msra.mxu1 %v1831_v36  ;;  %v1691_v35 = vld [vmem:[#allocation12 + $0x540] sm:$0xff]  ;;  %v1692_v36 = vld [vmem:[#allocation12 + $0x548] sm:$0xff] }
 0x213   : > { %2282 = vmatpush.msra.mxu2 %v1642_v37  ;;  %2302 = vmatpush.msra.mxu3 %v1832_v38  ;;  %v2475_v37 = vld [vmem:[#allocation15 + $0x1e8] sm:$0xff]  ;;  %v2470_v38 = vld [vmem:[#allocation15 + $0x1c0] sm:$0xff] }
 0x214   : > { %2237 = vmatpush.msra.mxu0 %v1631_v39  ;;  %2257 = vmatpush.msra.mxu1 %v1821_v41  ;;  %v2471_v39 = vld [vmem:[#allocation15 + $0x1c8] sm:$0xff]  ;;  %v2466_v41 = vld [vmem:[#allocation15 + $0x1a0] sm:$0xff] }
 0x215   : > { %2283 = vmatpush.msra.mxu2 %v1632_v56  ;;  %2303 = vmatpush.msra.mxu3 %v1822_v34  ;;  %v2467_v56 = vld [vmem:[#allocation15 + $0x1a8] sm:$0xff] }
 0x216   : > { %2238 = vmatpush.msra.mxu0 %v1621_v9  ;;  %2258 = vmatpush.msra.mxu1 %v1811_v2  ;;  %v2538_v9 = vld [vmem:[#allocation15 + $0x3e0] sm:$0xff]  ;;  %v2463_v2 = vld [vmem:[#allocation15 + $0x188] sm:$0xff] }
 0x217   : > { %2284 = vmatpush.msra.mxu2 %v1622_v32  ;;  %2304 = vmatpush.msra.mxu3 %v1812_v48  ;;  %v2458_v32 = vld [vmem:[#allocation15 + $0x160] sm:$0xff] }
 0x218   : > { %2182 = vmatmul.f32.gmra.mxu1 %v3885_v24  ;;  %2228 = vmatmul.f32.gmra.mxu3 %v3885_v24  ;;  %v2534_v48 = vld [vmem:[#allocation15 + $0x3c0] sm:$0xff] }
 0x219   : > { %2239 = vmatpush.msra.mxu0 %v1611_v50  ;;  %2259 = vmatpush.msra.mxu1 %v1801_v53  ;;  %v2459_v50 = vld [vmem:[#allocation15 + $0x168] sm:$0xff] }
 0x21a   : > { %2285 = vmatpush.msra.mxu2 %v1612_v54  ;;  %2305 = vmatpush.msra.mxu3 %v1802_v52  ;;  %v2535_v53 = vld [vmem:[#allocation15 + $0x3c8] sm:$0xff]  ;;  %v2454_v54 = vld [vmem:[#allocation15 + $0x140] sm:$0xff] }
 0x21b   : > { %2240 = vmatpush.msra.mxu0 %v1601_v57  ;;  %2260 = vmatpush.msra.mxu1 %v1791_v59  ;;  %v2530_v52 = vld [vmem:[#allocation15 + $0x3a0] sm:$0xff]  ;;  %v2455_v57 = vld [vmem:[#allocation15 + $0x148] sm:$0xff] }
 0x21c   : > { %2286 = vmatpush.msra.mxu2 %v1602_v60  ;;  %2306 = vmatpush.msra.mxu3 %v1792_v61  ;;  %v2531_v61 = vld [vmem:[#allocation15 + $0x3a8] sm:$0xff] }
 0x21d   : > { %2241 = vmatpush.msra.mxu0 %v1591_v62  ;;  %2261 = vmatpush.msra.mxu1 %v1781_v55  ;;  %v2450_v62 = vld [vmem:[#allocation15 + $0x120] sm:$0xff] }
 0x21e   : > { %2287 = vmatpush.msra.mxu2 %v1592_v63  ;;  %2307 = vmatpush.msra.mxu3 %v1782_v3  ;;  %v2526_v55 = vld [vmem:[#allocation15 + $0x380] sm:$0xff]  ;;  %v2451_v63 = vld [vmem:[#allocation15 + $0x128] sm:$0xff] }
 0x21f   : > { %2242 = vmatpush.msra.mxu0 %v1581_v19  ;;  %2262 = vmatpush.msra.mxu1 %v1771_v4  ;;  %v2527_v3 = vld [vmem:[#allocation15 + $0x388] sm:$0xff]  ;;  %v2446_v19 = vld [vmem:[#allocation15 + $0x100] sm:$0xff] }
 0x220   : > { %2288 = vmatpush.msra.mxu2 %v1582_v5  ;;  %2308 = vmatpush.msra.mxu3 %v1772_v14  ;;  %v2522_v4 = vld [vmem:[#allocation15 + $0x360] sm:$0xff]  ;;  %v2447_v5 = vld [vmem:[#allocation15 + $0x108] sm:$0xff] }
 0x221   : > { %2243 = vmatpush.msra.mxu0 %v1571_v7  ;;  %2263 = vmatpush.msra.mxu1 %v1761_v11  ;;  %v2523_v11 = vld [vmem:[#allocation15 + $0x368] sm:$0xff] }
 0x222   : > { %2289 = vmatpush.msra.mxu2 %v1572_v12  ;;  %2309 = vmatpush.msra.mxu3 %v1762_v21  ;;  %v2442_v12 = vld [vmem:[#allocation15 + $0xe0] sm:$0xff] }
 0x223   : > { %2244 = vmatpush.msra.mxu0 %v1561_v27  ;;  %2264 = vmatpush.msra.mxu1 %v1751_v45  ;;  %v2518_v21 = vld [vmem:[#allocation15 + $0x340] sm:$0xff]  ;;  %v2443_v27 = vld [vmem:[#allocation15 + $0xe8] sm:$0xff] }
 0x224   : > { %2290 = vmatpush.msra.mxu2 %v1562_v13  ;;  %2310 = vmatpush.msra.mxu3 %v1752_v16  ;;  %v2519_v45 = vld [vmem:[#allocation15 + $0x348] sm:$0xff]  ;;  %v2438_v13 = vld [vmem:[#allocation15 + $0xc0] sm:$0xff] }
 0x225   : > { %2245 = vmatpush.msra.mxu0 %v1551_v18  ;;  %2265 = vmatpush.msra.mxu1 %v1741_v20  ;;  %v2514_v16 = vld [vmem:[#allocation15 + $0x320] sm:$0xff]  ;;  %v2439_v18 = vld [vmem:[#allocation15 + $0xc8] sm:$0xff] }
 0x226   : > { %2291 = vmatpush.msra.mxu2 %v1552_v22  ;;  %2311 = vmatpush.msra.mxu3 %v1742_v0  ;;  %v2515_v20 = vld [vmem:[#allocation15 + $0x328] sm:$0xff]  ;;  %v2434_v22 = vld [vmem:[#allocation15 + $0xa0] sm:$0xff] }
 0x227   : > { %2246 = vmatpush.msra.mxu0 %v1541_v23  ;;  %2266 = vmatpush.msra.mxu1 %v1731_v15  ;;  %v2510_v0 = vld [vmem:[#allocation15 + $0x300] sm:$0xff]  ;;  %v2435_v23 = vld [vmem:[#allocation15 + $0xa8] sm:$0xff] }
 0x228   : > { %2292 = vmatpush.msra.mxu2 %v1542_v25  ;;  %2312 = vmatpush.msra.mxu3 %v1732_v1  ;;  %v3937_v1 = vld [vmem:[#allocation14] sm:$0x3] }
 0x229   : > { %2247 = vmatpush.msra.mxu0 %v1531_v43  ;;  %2267 = vmatpush.msra.mxu1 %v1721_v6  ;;  %v2511_v43 = vld [vmem:[#allocation15 + $0x308] sm:$0xff]  ;;  %v2430_v6 = vld [vmem:[#allocation15 + $0x80] sm:$0xff] }
 0x22a   : > { %2293 = vmatpush.msra.mxu2 %v1532_v17  ;;  %2313 = vmatpush.msra.mxu3 %v1722_v26  ;;  %v2506_v17 = vld [vmem:[#allocation15 + $0x2e0] sm:$0xff]  ;;  %v2431_v26 = vld [vmem:[#allocation15 + $0x88] sm:$0xff] }
 0x22b   : > { %2248 = vmatmul.f32.vlgmr.msra.gmra.mxu0 %v3870_v46  ;;  %2294 = vmatmul.f32.vlgmr.msra.gmra.mxu2 %v3870_v46  ;;  %v2474_v46 = vld [vmem:[#allocation15 + $0x1e0] sm:$0xff] }
 0x22c   : > { %2268 = vmatpush.msra.mxu1 %v1711_v28  ;;  %2314 = vmatpush.msra.mxu3 %v1712_v29  ;;  %v2507_v28 = vld [vmem:[#allocation15 + $0x2e8] sm:$0xff]  ;;  %v2326_v29 = vperm.slane %v3937_v1, 0 }
 0x22d   : > { %2562 = vmatpush.msrb.mxu0 %v2474_v46  ;;  %2608 = vmatpush.msrb.mxu2 %v2475_v37  ;;  %v2503_v37 = vld [vmem:[#allocation15 + $0x2c8] sm:$0xff] }
 0x22e   : > { %2269 = vmatpush.msra.mxu1 %v1701_v30  ;;  %2315 = vmatpush.msra.mxu3 %v1702_v31  ;;  %v2426_v30 = vld [vmem:[#allocation15 + $0x60] sm:$0xff] }
 0x22f   : > { %2563 = vmatpush.msrb.mxu0 %v2470_v38  ;;  %2609 = vmatpush.msrb.mxu2 %v2471_v39  ;;  %v2502_v31 = vld [vmem:[#allocation15 + $0x2c0] sm:$0xff] }
 0x230   : > { %2270 = vmatpush.msra.mxu1 %v1691_v35  ;;  %2316 = vmatpush.msra.mxu3 %v1692_v36  ;;  %v2427_v35 = vld [vmem:[#allocation15 + $0x68] sm:$0xff]  ;;  %v2422_v39 = vld [vmem:[#allocation15 + $0x40] sm:$0xff] }
 0x231   : > { %2271 = vmatmul.f32.vlgmr.msra.gmra.mxu1 %v3875_v8  ;;  %2317 = vmatmul.f32.vlgmr.msra.gmra.mxu3 %v3875_v8 }
 0x232   : > { %2564 = vmatpush.msrb.mxu0 %v2466_v41  ;;  %2610 = vmatpush.msrb.mxu2 %v2467_v56  ;;  %v2498_v41 = vld [vmem:[#allocation15 + $0x2a0] sm:$0xff]  ;;  %v2423_v56 = vld [vmem:[#allocation15 + $0x48] sm:$0xff] }
 0x233   : > { %2251 = vmatmul.f32.gmra.mxu0 %v3880_v10  ;;  %2297 = vmatmul.f32.gmra.mxu2 %v3880_v10  ;;  %v2462_v10 = vld [vmem:[#allocation15 + $0x180] sm:$0xff] }
 0x234   : > { %2565 = vmatpush.msrb.mxu0 %v2462_v10  ;;  %2585 = vmatpush.msrb.mxu1 %v2538_v9  ;;  %v2499_v10 = vld [vmem:[#allocation15 + $0x2a8] sm:$0xff] }
 0x235   : > { %2611 = vmatpush.msrb.mxu2 %v2463_v2  ;;  %v2418_v2 = vld [vmem:[#allocation15 + $0x20] sm:$0xff] }
 0x236   : > { %2566 = vmatpush.msrb.mxu0 %v2458_v32  ;;  %2586 = vmatpush.msrb.mxu1 %v2534_v48  ;;  %v2419_v32 = vld [vmem:[#allocation15 + $0x28] sm:$0xff] }
 0x237   : > { %2612 = vmatpush.msrb.mxu2 %v2459_v50  ;;  %v2495_v48 = vld [vmem:[#allocation15 + $0x288] sm:$0xff] }
 0x238   : > { %2567 = vmatpush.msrb.mxu0 %v2454_v54  ;;  %2587 = vmatpush.msrb.mxu1 %v2530_v52  ;;  %v2414_v54 = vld [vmem:[#allocation15] sm:$0xff] }
 0x239   : > { %2274 = vmatmul.f32.gmra.mxu1 %v3885_v24  ;;  %2320 = vmatmul.f32.gmra.mxu3 %v3885_v24  ;;  %v3921_v34 = vpop.f32.mrf.mxu0  ;;  %v2539_v24 = vld [vmem:[#allocation15 + $0x3e8] sm:$0xff]  ;;  %v2490_v52 = vld [vmem:[#allocation15 + $0x260] sm:$0xff] }
 0x23a   : > { %2631 = vmatpush.msrb.mxu3 %v2539_v24  ;;  %2613 = vmatpush.msrb.mxu2 %v2455_v57  ;;  %v2494_v24 = vld [vmem:[#allocation15 + $0x280] sm:$0xff]  ;;  %v2415_v57 = vld [vmem:[#allocation15 + $0x8] sm:$0xff] }
 0x23b   : > { %2568 = vmatpush.msrb.mxu0 %v2450_v62  ;;  %2588 = vmatpush.msrb.mxu1 %v2526_v55  ;;  %v2491_v55 = vld [vmem:[#allocation15 + $0x268] sm:$0xff] }
 0x23c   : > { %2632 = vmatpush.msrb.mxu3 %v2535_v53  ;;  %2614 = vmatpush.msrb.mxu2 %v2451_v63  ;;  %v2327_v53 = vperm.slane %v3937_v1, 1  ;;  %v2476_v63 = vld [vmem:[#allocation15 + $0x1f0] sm:$0xff]  ;;  %v2449_v1 = vld [vmem:[#allocation15 + $0x118] sm:$0xff] }
 0x23d   : > { %2569 = vmatpush.msrb.mxu0 %v2446_v19  ;;  %2589 = vmatpush.msrb.mxu1 %v2522_v4  ;;  %v2486_v4 = vld [vmem:[#allocation15 + $0x240] sm:$0xff] }
 0x23e   : > { %2633 = vmatpush.msrb.mxu3 %v2531_v61  ;;  %2615 = vmatpush.msrb.mxu2 %v2447_v5  ;;  %v2487_v5 = vld [vmem:[#allocation15 + $0x248] sm:$0xff] }
 0x23f   : > { %v3923_v8 = vpop.f32.mrf.mxu1  ;;  %v3925_v59 = vpop.f32.mrf.mxu2  ;;  %2570 = vmatpush.msrb.mxu0 %v2442_v12  ;;  %2590 = vmatpush.msrb.mxu1 %v2518_v21  ;;  %v2473_v12 = vld [vmem:[#allocation15 + $0x1d8] sm:$0xff] }
 0x240   : > { %2634 = vmatpush.msrb.mxu3 %v2527_v3  ;;  %2616 = vmatpush.msrb.mxu2 %v2443_v27  ;;  %v2477_v3 = vld [vmem:[#allocation15 + $0x1f8] sm:$0xff]  ;;  %v3950_v21 = vadd.f32 %v3923_v8, %v3921_v34  ;;  %v2478_v34 = vld [vmem:[#allocation15 + $0x200] sm:$0xff]  ;;  %v2479_v8 = vld [vmem:[#allocation15 + $0x208] sm:$0xff] }
 0x241   : > { %2571 = vmatpush.msrb.mxu0 %v2438_v13  ;;  %2591 = vmatpush.msrb.mxu1 %v2514_v16  ;;  %v2483_v13 = vld [vmem:[#allocation15 + $0x228] sm:$0xff] }
 0x242   : > { %v3929_v14 = vpop.f32.mrf.mxu0  ;;  %2635 = vmatpush.msrb.mxu3 %v2523_v11  ;;  %2617 = vmatpush.msrb.mxu2 %v2439_v18  ;;  %v2472_v11 = vld [vmem:[#allocation15 + $0x1d0] sm:$0xff] }
 0x243   : > { %2572 = vmatpush.msrb.mxu0 %v2434_v22  ;;  %2592 = vmatpush.msrb.mxu1 %v2510_v0  ;;  %v2469_v22 = vld [vmem:[#allocation15 + $0x1b8] sm:$0xff] }
 0x244   : > { %2636 = vmatpush.msrb.mxu3 %v2519_v45  ;;  %2618 = vmatpush.msrb.mxu2 %v2435_v23  ;;  %v2482_v45 = vld [vmem:[#allocation15 + $0x220] sm:$0xff] }
 0x245   : > { %v3927_v60 = vpop.f32.mrf.mxu3  ;;  %2573 = vmatpush.msrb.mxu0 %v2430_v6  ;;  %2593 = vmatpush.msrb.mxu1 %v2506_v17  ;;  %v2540_v6 = vld [vmem:[#allocation15 + $0x3f0] sm:$0xff]  ;;  %v2465_v17 = vld [vmem:[#allocation15 + $0x198] sm:$0xff] }
 0x246   : > { %2637 = vmatpush.msrb.mxu3 %v2515_v20  ;;  %2619 = vmatpush.msrb.mxu2 %v2431_v26  ;;  %v2468_v20 = vld [vmem:[#allocation15 + $0x1b0] sm:$0xff]  ;;  %v2366_v26 = vrot.slane %v3950_v21, 6 }
 0x247   : > { %2574 = vmatpush.msrb.mxu0 %v2426_v30  ;;  %2594 = vmatpush.msrb.mxu1 %v2502_v31  ;;  %v2541_v30 = vld [vmem:[#allocation15 + $0x3f8] sm:$0xff]  ;;  %v2420_v21 = vld [vmem:[#allocation15 + $0x30] sm:$0xff] }
 0x248   : > { %v3933_v15 = vpop.f32.mrf.mxu2  ;;  %2638 = vmatpush.msrb.mxu3 %v2511_v43  ;;  %2620 = vmatpush.msrb.mxu2 %v2427_v35  ;;  %v2464_v43 = vld [vmem:[#allocation15 + $0x190] sm:$0xff] }
 0x249   : > { %v3931_v7 = vpop.f32.mrf.mxu1  ;;  %2575 = vmatpush.msrb.mxu0 %v2422_v39  ;;  %2595 = vmatpush.msrb.mxu1 %v2498_v41  ;;  %v2460_v35 = vld [vmem:[#allocation15 + $0x170] sm:$0xff]  ;;  %v2537_v39 = vld [vmem:[#allocation15 + $0x3d8] sm:$0xff] }
 0x24a   : > { %2639 = vmatpush.msrb.mxu3 %v2507_v28  ;;  %2621 = vmatpush.msrb.mxu2 %v2423_v56 }
 0x24b   : > { %2576 = vmatpush.msrb.mxu0 %v2418_v2  ;;  %2596 = vmatpush.msrb.mxu1 %v2494_v24  ;;  %v2532_v2 = vld [vmem:[#allocation15 + $0x3b0] sm:$0xff]  ;;  %v2457_v24 = vld [vmem:[#allocation15 + $0x158] sm:$0xff] }
 0x24c   : > { %v1973_v36 = vpop.f32.mrf.mxu0  ;;  %2640 = vmatpush.msrb.mxu3 %v2503_v37  ;;  %2622 = vmatpush.msrb.mxu2 %v2419_v32 }
 0x24d   : > { %2577 = vmatpush.msrb.mxu0 %v2414_v54  ;;  %2597 = vmatpush.msrb.mxu1 %v2490_v52  ;;  %v2453_v54 = vld [vmem:[#allocation15 + $0x138] sm:$0xff] }
 0x24e   : > { %2641 = vmatpush.msrb.mxu3 %v2499_v10  ;;  %2623 = vmatpush.msrb.mxu2 %v2415_v57  ;;  %v2456_v10 = vld [vmem:[#allocation15 + $0x150] sm:$0xff] }
 0x24f   : > { %v3935_v25 = vpop.f32.mrf.mxu3  ;;  %2654 = vmatpush.msra.mxu0 %v2476_v63  ;;  %2598 = vmatpush.msrb.mxu1 %v2486_v4  ;;  %v2448_v63 = vld [vmem:[#allocation15 + $0x110] sm:$0xff] }
 0x250   : > { %2642 = vmatpush.msrb.mxu3 %v2495_v48  ;;  %2700 = vmatpush.msra.mxu2 %v2477_v3  ;;  %v2528_v48 = vld [vmem:[#allocation15 + $0x390] sm:$0xff] }
 0x251   : > { %2655 = vmatpush.msra.mxu0 %v2472_v11  ;;  %2599 = vmatpush.msrb.mxu1 %v2482_v45  ;;  %v2524_v3 = vld [vmem:[#allocation15 + $0x370] sm:$0xff] }
 0x252   : > { %v2019_v61 = vpop.f32.mrf.mxu2  ;;  %2643 = vmatpush.msrb.mxu3 %v2491_v55  ;;  %2701 = vmatpush.msra.mxu2 %v2473_v12  ;;  %v2445_v12 = vld [vmem:[#allocation15 + $0xf8] sm:$0xff] }
 0x253   : > { %v1996_v46 = vpop.f32.mrf.mxu1  ;;  %2656 = vmatpush.msra.mxu0 %v2468_v20  ;;  %2600 = vmatpush.msrb.mxu1 %v2478_v34  ;;  %v2440_v20 = vld [vmem:[#allocation15 + $0xd0] sm:$0xff] }
 0x254   : > { %v1997_v38 = vadd.f32 %v1996_v46, %v1973_v36  ;;  %2644 = vmatpush.msrb.mxu3 %v2487_v5  ;;  %2702 = vmatpush.msra.mxu2 %v2469_v22  ;;  %v2536_v36 = vld [vmem:[#allocation15 + $0x3d0] sm:$0xff]  ;;  %v3966_v46 = vadd.f32 %v3927_v60, %v3925_v59  ;;  %v2533_v59 = vld [vmem:[#allocation15 + $0x3b8] sm:$0xff] }
 0x255   : > { %2657 = vmatpush.msra.mxu0 %v2464_v43  ;;  %2677 = vmatpush.msra.mxu1 %v2540_v6  ;;  %v2452_v60 = vld [vmem:[#allocation15 + $0x130] sm:$0xff]  ;;  %v2517_v43 = vld [vmem:[#allocation15 + $0x338] sm:$0xff]  ;;  %v3990_v6 = vadd.f32 %v3935_v25, %v3933_v15 }
 0x256   : > { %v3942_v9 = vadd.f32 %v2326_v29, %v1997_v38  ;;  %v1976_v16 = vpop.f32.mrf.mxu0  ;;  %2645 = vmatpush.msrb.mxu3 %v2483_v13  ;;  %2703 = vmatpush.msra.mxu2 %v2465_v17  ;;  %v2367_v52 = vrot.slane %v3966_v46, 6  ;;  %v2521_v13 = vld [vmem:[#allocation15 + $0x358] sm:$0xff]  ;;  %v2516_v22 = vld [vmem:[#allocation15 + $0x330] sm:$0xff] }
 0x257   : > { %2658 = vmatpush.msra.mxu0 %v2460_v35  ;;  %2678 = vmatpush.msra.mxu1 %v2536_v36  ;;  %v2437_v35 = vld [vmem:[#allocation15 + $0xb8] sm:$0xff] }
 0x258   : > { %v2338_v50 = vrot.slane %v3942_v9, 7  ;;  %2646 = vmatpush.msrb.mxu3 %v2479_v8  ;;  %v2441_v8 = vld [vmem:[#allocation15 + $0xd8] sm:$0xff] }
 0x259   : > { %v2042_v62 = vpop.f32.mrf.mxu3  ;;  %2659 = vmatpush.msra.mxu0 %v2456_v10  ;;  %2679 = vmatpush.msra.mxu1 %v2532_v2  ;;  %v2513_v36 = vld [vmem:[#allocation15 + $0x318] sm:$0xff]  ;;  %v2370_v10 = vrot.slane %v3990_v6, 6 }
 0x25a   : > { %2350 = vst [vmem:[#allocation2 + $0x28] sm:$0xfe] %v2338_v50  ;;  %v2043_v19 = vadd.f32 %v2042_v62, %v2019_v61  ;;  %2723 = vmatpush.msra.mxu3 %v2541_v30  ;;  %v2529_v61 = vld [vmem:[#allocation15 + $0x398] sm:$0xff]  ;;  %v3980_v62 = vadd.f32 %v3931_v7, %v3929_v14  ;;  %v2444_v14 = vld [vmem:[#allocation15 + $0xf0] sm:$0xff] }
 0x25b   : > { %2660 = vmatpush.msra.mxu0 %v2452_v60  ;;  %2680 = vmatpush.msra.mxu1 %v2528_v48  ;;  %v2520_v7 = vld [vmem:[#allocation15 + $0x350] sm:$0xff]  ;;  %v2509_v25 = vld [vmem:[#allocation15 + $0x2f8] sm:$0xff] }
 0x25c   : > { %v3954_v27 = vadd.f32 %v2327_v53, %v2043_v19  ;;  %v2022_v41 = vpop.f32.mrf.mxu2  ;;  %2724 = vmatpush.msra.mxu3 %v2537_v39  ;;  %v2436_v30 = vld [vmem:[#allocation15 + $0xb0] sm:$0xff] }
 0x25d   : > { %v1999_v18 = vpop.f32.mrf.mxu1  ;;  %2661 = vmatpush.msra.mxu0 %v2448_v63  ;;  %2681 = vmatpush.msra.mxu1 %v2524_v3  ;;  %v2432_v39 = vld [vmem:[#allocation15 + $0x90] sm:$0xff]  ;;  %v2425_v63 = vld [vmem:[#allocation15 + $0x58] sm:$0xff] }
 0x25e   : > { %v2339_v0 = vrot.slane %v3954_v27, 7  ;;  %v2000_v23 = vadd.f32 %v1999_v18, %v1976_v16  ;;  %2725 = vmatpush.msra.mxu3 %v2533_v59  ;;  %v2368_v16 = vrot.slane %v3980_v62, 6  ;;  %v2504_v59 = vld [vmem:[#allocation15 + $0x2d0] sm:$0xff] }
 0x25f   : > { %2662 = vmatpush.msra.mxu0 %v2444_v14  ;;  %2682 = vmatpush.msra.mxu1 %v2520_v7  ;;  %v2421_v14 = vld [vmem:[#allocation15 + $0x38] sm:$0xff]  ;;  %v2488_v27 = vld [vmem:[#allocation15 + $0x250] sm:$0xff] }
 0x260   : > { %2351 = vst [vmem:[#allocation2 + $0x10] sm:$0xfe] %v2339_v0  ;;  %v3962_v28 = vadd.f32 %v2326_v29, %v2000_v23  ;;  %v2461_v29 = vld [vmem:[#allocation15 + $0x178] sm:$0xff]  ;;  %2726 = vmatpush.msra.mxu3 %v2529_v61  ;;  %v2369_v62 = vsel %vm1474_vm1, %v2366_v26, %v2368_v16 }
 0x261   : > { %v2356_v31 = vld [vmem:[#allocation2 + $0x28] sm:$0xfc]  ;;  %2704 = vmatpush.msra.mxu2 %v2461_v29  ;;  %v2065_v5 = vpop.f32.mrf.mxu0  ;;  %2663 = vmatpush.msra.mxu0 %v2440_v20 }
 0x262   : > { %v2378_v37 = vadd.f32 %v2366_v26, %v2356_v31  ;;  %v2340_v38 = vrot.slane %v3962_v28, 7  ;;  %2683 = vmatpush.msra.mxu1 %v2516_v22  ;;  %v2512_v31 = vld [vmem:[#allocation15 + $0x310] sm:$0xff]  ;;  %v2505_v61 = vld [vmem:[#allocation15 + $0x2d8] sm:$0xff] }
 0x263   : > { %v2045_v56 = vpop.f32.mrf.mxu3  ;;  %2705 = vmatpush.msra.mxu2 %v2457_v24  ;;  %2664 = vmatpush.msra.mxu0 %v2436_v30  ;;  %v2496_v26 = vld [vmem:[#allocation15 + $0x290] sm:$0xff]  ;;  %v2497_v7 = vld [vmem:[#allocation15 + $0x298] sm:$0xff] }
 0x264   : > { %2384 = vst [vmem:[#allocation2 + $0x28] sm:$0xfc] %v2378_v37  ;;  %v2046_v32 = vadd.f32 %v2045_v56, %v2022_v41  ;;  %2684 = vmatpush.msra.mxu1 %v2512_v31  ;;  %v2508_v41 = vld [vmem:[#allocation15 + $0x2f0] sm:$0xff]  ;;  %v2433_v56 = vld [vmem:[#allocation15 + $0x98] sm:$0xff]  ;;  %v2341_v2 = vsel %vm1445_vm0, %v2338_v50, %v2340_v38 }
 0x265   : > { %2354 = vst [vmem:[#allocation2 + $0x18] sm:$0x1] %v2340_v38  ;;  %2706 = vmatpush.msra.mxu2 %v2453_v54  ;;  %2665 = vmatpush.msra.mxu0 %v2432_v39  ;;  %v2429_v54 = vld [vmem:[#allocation15 + $0x78] sm:$0xff]  ;;  %v2424_v50 = vld [vmem:[#allocation15 + $0x50] sm:$0xff] }
 0x266   : > { %v3976_v57 = vadd.f32 %v2327_v53, %v2046_v32  ;;  %v2525_v53 = vld [vmem:[#allocation15 + $0x378] sm:$0xff]  ;;  %2685 = vmatpush.msra.mxu1 %v2508_v41  ;;  %v2428_v32 = vld [vmem:[#allocation15 + $0x70] sm:$0xff] }
 0x267   : > { %v2357_v55 = vld [vmem:[#allocation2 + $0x10] sm:$0xfc]  ;;  %2707 = vmatpush.msra.mxu2 %v2449_v1  ;;  %2727 = vmatpush.msra.mxu3 %v2525_v53  ;;  %v2500_v38 = vld [vmem:[#allocation15 + $0x2b0] sm:$0xff] }
 0x268   : > { %v2379_v19 = vadd.f32 %v2367_v52, %v2357_v55  ;;  %v2342_v4 = vrot.slane %v3976_v57, 7  ;;  %v2111_v37 = vpop.f32.mrf.mxu2  ;;  %2666 = vmatpush.msra.mxu0 %v2428_v32  ;;  %2686 = vmatpush.msra.mxu1 %v2504_v59  ;;  %v2501_v1 = vld [vmem:[#allocation15 + $0x2b8] sm:$0xff]  ;;  %v2484_v30 = vld [vmem:[#allocation15 + $0x230] sm:$0xff] }
 0x269   : > { %v2088_v11 = vpop.f32.mrf.mxu1  ;;  %2708 = vmatpush.msra.mxu2 %v2445_v12  ;;  %2728 = vmatpush.msra.mxu3 %v2521_v13  ;;  %v2492_v13 = vld [vmem:[#allocation15 + $0x270] sm:$0xff]  ;;  %v2493_v22 = vld [vmem:[#allocation15 + $0x278] sm:$0xff] }
 0x26a   : > { %2385 = vst [vmem:[#allocation2 + $0x10] sm:$0xfc] %v2379_v19  ;;  %v2089_v45 = vadd.f32 %v2088_v11, %v2065_v5  ;;  %v2380_v19 = vadd.f32 %v2369_v62, %v2341_v2  ;;  %2667 = vmatpush.msra.mxu0 %v2424_v50  ;;  %2687 = vmatpush.msra.mxu1 %v2500_v38  ;;  %v2485_v31 = vld [vmem:[#allocation15 + $0x238] sm:$0xff] }
 0x26b   : > { %2355 = vst [vmem:[#allocation2 + $0x20] sm:$0x1] %v2342_v4  ;;  %v2390_v18 = vld [vmem:[#allocation2 + $0x28] sm:$0xff]  ;;  %2709 = vmatpush.msra.mxu2 %v2441_v8  ;;  %2729 = vmatpush.msra.mxu3 %v2517_v43  ;;  %v2343_v12 = vsel %vm1445_vm0, %v2339_v0, %v2342_v4 }
 0x26c   : > { %v2360_v23 = vld [vmem:[#allocation2 + $0x18] sm:$0x3]  ;;  %v2394_v34 = vadd.f32 %v2390_v18, %v2089_v45  ;;  %v2068_v55 = vpop.f32.mrf.mxu0  ;;  %2668 = vmatpush.msra.mxu0 %v2420_v21  ;;  %2688 = vmatpush.msra.mxu1 %v2496_v26  ;;  %v2416_v45 = vld [vmem:[#allocation15 + $0x10] sm:$0xff]  ;;  %v2489_v0 = vld [vmem:[#allocation15 + $0x258] sm:$0xff] }
 0x26d   : > { %v2382_v17 = vadd.f32 %v2368_v16, %v2360_v23  ;;  %2710 = vmatpush.msra.mxu2 %v2437_v35  ;;  %2730 = vmatpush.msra.mxu3 %v2513_v36  ;;  %v2417_v16 = vld [vmem:[#allocation15 + $0x18] sm:$0xff]  ;;  %v2371_v23 = vsel %vm1474_vm1, %v2367_v52, %v2370_v10 }
 0x26e   : > { %2398 = vst [vmem:[#allocation2 + $0x28] sm:$0xff] %v2394_v34  ;;  %2669 = vmatpush.msra.mxu0 %v2416_v45  ;;  %2689 = vmatpush.msra.mxu1 %v2492_v13  ;;  %v2381_v43 = vadd.f32 %v2371_v23, %v2343_v12 }
 0x26f   : > { %2388 = vst [vmem:[#allocation2 + $0x18] sm:$0x3] %v2382_v17  ;;  %v2134_v29 = vpop.f32.mrf.mxu3  ;;  %2711 = vmatpush.msra.mxu2 %v2433_v56  ;;  %2731 = vmatpush.msra.mxu3 %v2509_v25 }
 0x270   : > { %v2135_v15 = vadd.f32 %v2134_v29, %v2111_v37  ;;  %2690 = vmatpush.msra.mxu1 %v2488_v27  ;;  %v2480_v37 = vld [vmem:[#allocation15 + $0x210] sm:$0xff]  ;;  %v2481_v29 = vld [vmem:[#allocation15 + $0x218] sm:$0xff] }
 0x271   : > { %v2391_v24 = vld [vmem:[#allocation2 + $0x10] sm:$0xff]  ;;  %2712 = vmatpush.msra.mxu2 %v2429_v54  ;;  %2732 = vmatpush.msra.mxu3 %v2505_v61 }
 0x272   : > { %v2361_v60 = vld [vmem:[#allocation2 + $0x20] sm:$0x3]  ;;  %v2395_v48 = vadd.f32 %v2391_v24, %v2135_v15  ;;  %v2114_v34 = vpop.f32.mrf.mxu2  ;;  %2691 = vmatpush.msra.mxu1 %v2484_v30 }
 0x273   : > { %v2383_v28 = vadd.f32 %v2370_v10, %v2361_v60  ;;  %v2091_v9 = vpop.f32.mrf.mxu1  ;;  %2713 = vmatpush.msra.mxu2 %v2425_v63  ;;  %2733 = vmatpush.msra.mxu3 %v2501_v1 }
 0x274   : > { %2399 = vst [vmem:[#allocation2 + $0x10] sm:$0xff] %v2395_v48  ;;  %v2092_v3 = vadd.f32 %v2091_v9, %v2068_v55  ;;  %2692 = vmatpush.msra.mxu1 %v2480_v37 }
 0x275   : > { %2389 = vst [vmem:[#allocation2 + $0x20] sm:$0x3] %v2383_v28  ;;  %v2402_v53 = vld [vmem:[#allocation2 + $0x28] sm:$0xfe]  ;;  %2714 = vmatpush.msra.mxu2 %v2421_v14  ;;  %2734 = vmatpush.msra.mxu3 %v2497_v7 }
 0x276   : > { %v2396_v5 = vadd.f32 %v2380_v19, %v2092_v3  ;;  %v2408_v11 = vmax.f32 %v2402_v53, 0.0  ;;  %v2406_v8 = vld [vmem:[#allocation2 + $0x18] sm:$0x1] }
 0x277   : > { %2715 = vmatpush.msra.mxu2 %v2417_v16  ;;  %2735 = vmatpush.msra.mxu3 %v2493_v22  ;;  %v2412_v36 = vmax.f32 %v2406_v8, 0.0 }
 0x278   : > { %v2410_v18 = vmax.f32 %v2396_v5, 0.0  ;;  %v2548_v20 = vrot.slane %v2408_v11, 1  ;;  %v4017_v11 = vld [vmem:[#allocation17] sm:$0xf] }
 0x279   : > { %v2137_v57 = vpop.f32.mrf.mxu3  ;;  %2736 = vmatpush.msra.mxu3 %v2489_v0  ;;  %v2554_v25 = vrot.slane %v2412_v36, 1  ;;  %v2764_v13 = vperm.slane %v4017_v11, 0 }
 0x27a   : > { %v2138_v4 = vadd.f32 %v2137_v57, %v2114_v34  ;;  %v2549_v6 = vrot.slane %v2410_v18, 1 }
 0x27b   : > { %v2403_v17 = vld [vmem:[#allocation2 + $0x10] sm:$0xfe]  ;;  %2737 = vmatpush.msra.mxu3 %v2485_v31 }
 0x27c   : > { %v2397_v35 = vadd.f32 %v2381_v43, %v2138_v4  ;;  %v2550_v46 = vsel %vm1849_vm2, %v2548_v20, %v2549_v6  ;;  %v2409_v52 = vmax.f32 %v2403_v17, 0.0  ;;  %v2407_v56 = vld [vmem:[#allocation2 + $0x20] sm:$0x1]  ;;  %v2555_v24 = vsel %vm1849_vm2, %v2549_v6, %v2554_v25 }
 0x27d   : > { %2578 = vmatmul.f32.vlgmr.msrb.gmra.mxu0 %v2550_v46  ;;  %2624 = vmatmul.f32.vlgmr.msrb.gmra.mxu2 %v2550_v46  ;;  %v2413_v2 = vmax.f32 %v2407_v56, 0.0  ;;  %v2765_v4 = vperm.slane %v4017_v11, 1 }
 0x27e   : > { %v2411_v39 = vmax.f32 %v2397_v35, 0.0  ;;  %v2551_v41 = vrot.slane %v2409_v52, 1  ;;  %2738 = vmatpush.msra.mxu3 %v2481_v29 }
 0x27f   : > { %v2556_v32 = vrot.slane %v2413_v2, 1  ;;  %v2766_v2 = vperm.slane %v4017_v11, 2 }
 0x280   : > { %v2552_v15 = vrot.slane %v2411_v39, 1 }
 0x282   : > { %v2553_v10 = vsel %vm1849_vm2, %v2551_v41, %v2552_v15  ;;  %v2557_v59 = vsel %vm1849_vm2, %v2552_v15, %v2556_v32 }
 0x283   : > { %2601 = vmatmul.f32.vlgmr.msrb.gmra.mxu1 %v2553_v10  ;;  %2647 = vmatmul.f32.vlgmr.msrb.gmra.mxu3 %v2553_v10 }
 0x284   : > { %v2157_v60 = vpop.f32.mrf.mxu0 }
 0x285   : > { %2581 = vmatmul.f32.gmra.mxu0 %v2555_v24  ;;  %2627 = vmatmul.f32.gmra.mxu2 %v2555_v24 }
 0x28a   : > { %v2203_v54 = vpop.f32.mrf.mxu2 }
 0x28b   : > { %2604 = vmatmul.f32.gmra.mxu1 %v2557_v59  ;;  %2650 = vmatmul.f32.gmra.mxu3 %v2557_v59  ;;  %v2180_v48 = vpop.f32.mrf.mxu1 }
 0x28c   : > { %v2181_v7 = vadd.f32 %v2180_v48, %v2157_v60 }
 0x28d   : > { %2670 = vmatmul.f32.vlgmr.msra.gmra.mxu0 %v2550_v46  ;;  %2716 = vmatmul.f32.vlgmr.msra.gmra.mxu2 %v2550_v46 }
 0x28e   : > { %v2160_v61 = vpop.f32.mrf.mxu0 }
 0x291   : > { %v2226_v62 = vpop.f32.mrf.mxu3 }
 0x292   : > { %v2227_v22 = vadd.f32 %v2226_v62, %v2203_v54 }
 0x293   : > { %2693 = vmatmul.f32.vlgmr.msra.gmra.mxu1 %v2553_v10  ;;  %2739 = vmatmul.f32.vlgmr.msra.gmra.mxu3 %v2553_v10 }
 0x294   : > { %v2206_v55 = vpop.f32.mrf.mxu2 }
 0x295   : > { %2673 = vmatmul.f32.gmra.mxu0 %v2555_v24  ;;  %2719 = vmatmul.f32.gmra.mxu2 %v2555_v24  ;;  %v2183_v28 = vpop.f32.mrf.mxu1 }
 0x296   : > { %v2184_v57 = vadd.f32 %v2183_v28, %v2160_v61 }
 0x29b   : > { %2696 = vmatmul.f32.gmra.mxu1 %v2557_v59  ;;  %2742 = vmatmul.f32.gmra.mxu3 %v2557_v59  ;;  %v2229_v50 = vpop.f32.mrf.mxu3 }
 0x29c   : > { %v2230_v52 = vadd.f32 %v2229_v50, %v2206_v55  ;;  %v2767_v50 = vperm.slane %v4017_v11, 3 }
 0x2a8   : > { %v2249_v9 = vpop.f32.mrf.mxu0 }
 0x2ae   : > { %v2272_v38 = vpop.f32.mrf.mxu1  ;;  %v2295_v63 = vpop.f32.mrf.mxu2 }
 0x2af   : > { %v2273_v41 = vadd.f32 %v2272_v38, %v2249_v9 }
 0x2b0   : > { %v2252_v3 = vpop.f32.mrf.mxu0 }
 0x2b4   : > { %v2318_v19 = vpop.f32.mrf.mxu3 }
 0x2b5   : > { %v2319_v60 = vadd.f32 %v2318_v19, %v2295_v63 }
 0x2b6   : > { %v2275_v1 = vpop.f32.mrf.mxu1  ;;  %v4013_v53 = vpop.f32.mrf.mxu2 }
 0x2b7   : > { %v2276_v62 = vadd.f32 %v2275_v1, %v2252_v3 }
 0x2bc   : > { %v4015_v26 = vpop.f32.mrf.mxu3 }
 0x2fa   : > { %v2579_v21 = vpop.f32.mrf.mxu0 }
 0x300   : > { %v2602_v5 = vpop.f32.mrf.mxu1  ;;  %v2625_v14 = vpop.f32.mrf.mxu2 }
 0x301   : > { %v2603_v12 = vadd.f32 %v2602_v5, %v2579_v21  ;;  %v2322_v5 = vadd.f32 %v4015_v26, %v4013_v53 }
 0x302   : > { %v2582_v16 = vpop.f32.mrf.mxu0 }
 0x303   : > { %v2746_v45 = vadd.f32 %v2603_v12, %v2181_v7 }
 0x305   : > { %v2754_v18 = vadd.f32 %v2746_v45, %v3796_v40 }
 0x306   : > { %v2648_v20 = vpop.f32.mrf.mxu3 }
 0x307   : > { %v2772_v23 = vadd.f32 %v2764_v13, %v2754_v18  ;;  %v2649_v34 = vadd.f32 %v2648_v20, %v2625_v14 }
 0x308   : > { %v2605_v8 = vpop.f32.mrf.mxu1  ;;  %v2628_v6 = vpop.f32.mrf.mxu2 }
 0x309   : > { %v2780_v27 = vmax.f32 %v2772_v23, 0.0  ;;  %v2747_v0 = vadd.f32 %v2649_v34, %v2227_v22  ;;  %v2606_v43 = vadd.f32 %v2605_v8, %v2582_v16 }
 0x30a   : > { %v2671_v35 = vpop.f32.mrf.mxu0 }
 0x30b   : > { %2788 = vst [vmem:[%s4023_s23] sm:$0xff] %v2780_v27  ;;  %v2755_v17 = vadd.f32 %v2747_v0, %v3798_v44  ;;  %v2750_v40 = vadd.f32 %v2606_v43, %v2184_v57 }
 0x30d   : > { %v2773_v30 = vadd.f32 %v2765_v4, %v2755_v17  ;;  %v2758_v31 = vadd.f32 %v2750_v40, %v3800_v47 }
 0x30e   : > { %v2651_v46 = vpop.f32.mrf.mxu3 }
 0x30f   : > { %v2781_v36 = vmax.f32 %v2773_v30, 0.0  ;;  %v2776_v37 = vadd.f32 %v2764_v13, %v2758_v31  ;;  %v2652_v29 = vadd.f32 %v2651_v46, %v2628_v6 }
 0x310   : > { %v2694_v39 = vpop.f32.mrf.mxu1  ;;  %v2717_v47 = vpop.f32.mrf.mxu2 }
 0x311   : > { %2789 = vst [vmem:[%s4023_s23 + $0x8] sm:$0xff] %v2781_v36  ;;  %v2784_v56 = vmax.f32 %v2776_v37, 0.0  ;;  %v2751_v15 = vadd.f32 %v2652_v29, %v2230_v52  ;;  %v2695_v25 = vadd.f32 %v2694_v39, %v2671_v35 }
 0x312   : > { %v2674_v28 = vpop.f32.mrf.mxu0 }
 0x313   : > { %2792 = vst [vmem:[%s4023_s23 + $0x20] sm:$0xff] %v2784_v56  ;;  %v2759_v44 = vadd.f32 %v2751_v15, %v3802_v49  ;;  %v2748_v10 = vadd.f32 %v2695_v25, %v2273_v41 }
 0x315   : > { %v2777_v24 = vadd.f32 %v2765_v4, %v2759_v44  ;;  %v2756_v32 = vadd.f32 %v2748_v10, %v3804_v51 }
 0x316   : > { %v2740_v59 = vpop.f32.mrf.mxu3 }
 0x317   : > { %v2785_v48 = vmax.f32 %v2777_v24, 0.0  ;;  %v2774_v54 = vadd.f32 %v2766_v2, %v2756_v32  ;;  %v2741_v61 = vadd.f32 %v2740_v59, %v2717_v47 }
 0x318   : > { %v2697_v55 = vpop.f32.mrf.mxu1  ;;  %v2720_v3 = vpop.f32.mrf.mxu2 }
 0x319   : > { %2793 = vst [vmem:[%s4023_s23 + $0x28] sm:$0xff] %v2785_v48  ;;  %v2782_v9 = vmax.f32 %v2774_v54, 0.0  ;;  %v2749_v49 = vadd.f32 %v2741_v61, %v2319_v60  ;;  %v2698_v38 = vadd.f32 %v2697_v55, %v2674_v28 }
 0x31b   : > { %2790 = vst [vmem:[%s4023_s23 + $0x10] sm:$0xff] %v2782_v9  ;;  %v2757_v51 = vadd.f32 %v2749_v49, %v3806_v58  ;;  %v2752_v21 = vadd.f32 %v2698_v38, %v2276_v62 }
 0x31d   : > { %v2775_v63 = vadd.f32 %v2767_v50, %v2757_v51  ;;  %v2760_v19 = vadd.f32 %v2752_v21, %v3808_v33 }
 0x31e   : > { %v2743_v1 = vpop.f32.mrf.mxu3 }
 0x31f   : > { %v2783_v14 = vmax.f32 %v2775_v63, 0.0  ;;  %v2778_v11 = vadd.f32 %v2766_v2, %v2760_v19  ;;  %v2744_v7 = vadd.f32 %v2743_v1, %v2720_v3 }
 0x321   : > { %2791 = vst [vmem:[%s4023_s23 + $0x18] sm:$0xff] %v2783_v14  ;;  %v2786_v58 = vmax.f32 %v2778_v11, 0.0  ;;  %v2753_v12 = vadd.f32 %v2744_v7, %v2322_v5 }
 0x323   : > { %2794 = vst [vmem:[%s4023_s23 + $0x30] sm:$0xff] %v2786_v58  ;;  %v2761_v33 = vadd.f32 %v2753_v12, %v3810_v42 }
 0x325   : > { %v2779_v45 = vadd.f32 %v2767_v50, %v2761_v33 }
 0x327   : > { %v2787_v53 = vmax.f32 %v2779_v45, 0.0 }
 0x329   : > { %2795 = vst [vmem:[%s4023_s23 + $0x38] sm:$0xff] %v2787_v53 }
 0x32a   : > { %3427 = shalt.err (!%p3424_p9)
}
 0x32b   : > { %s3500_s29 = smov 512   ;;  %s3501_s17 = smov 32  }
 0x32c   : > { %3027 = dma.vmem_to_hbm [thread:$0]  (%p3659_p4), %s2810_s16, 1024, %s2812_s15, %s2797_s19, %s3500_s29, %s3500_s29, %s3501_s17  }
 0x32d PF: > { %s2826_s23 = sand.u32 1, %s3470_s30   ;;  %p4103_p10 = scmp.ge.s32.totalorder %s3482_s12, 2 }
 0x32e   : > { %s2827_s13 = scalar_lea.sflag [#allocation5], %s2826_s23 }
 0x32f   : > { %p3059_p13 = pnand %p4103_p10, %p3663_p6 }
 0x331   : > { %p3060_p11 = pneg %p3059_p13 }
 0x333   : > { %3465 = dma.done.wait (%p3060_p11), %s2827_s13, 1024  }
 0x334   : > { %3467 = vsyncadd (%p3060_p11), %s2827_s13, 4294966272  ;;  %p26_p0 = scmp.ge.s32.totalorder %s3633_s20, 4   ;;  %s4104_s30 = smov %s3474_s10 }
 0x335   : > { %s4105_s10 = smov %s3478_s11  ;;  %s4106_s11 = smov %s3644_s18 }
 0x336   : > { %s4107_s12 = smov %s3633_s20  ;;  %28 = sbr.rel (!%p26_p0) target bundleno = 14 (0xe), region = 133 }
 0x33b   :  { %2833 = vsyncpa [#allocation4], 1 }
 0x33c   :  { %2835 = vsyncpa [#allocation4 + $0x1], 1 }
 0x33d   :  { %2836 = vsyncpa [#allocation7], 1 }
 0x33e   :  { %2837 = vsyncpa [#allocation10], 1 }
 0x33f   :  { %2838 = vsyncpa [#allocation13], 1 }
 0x340   :  { %2839 = vsyncpa [#allocation16], 1 }
 0x341   :  { %2840 = vsyncpa [#allocation5], 1 }
 0x342   :  { %2842 = vsyncpa [#allocation5 + $0x1], 1 }

</bundles_post_ra>
